<compile_context>
chip_gen: v7x
topology: tpu7x:2x2x1
jax: 0.10.0
libtpu: 0.0.40
codegen_flags: <defaults>
</compile_context>

<pallas_src>
import numpy as np

import jax
import jax.numpy as jnp
from jax.experimental import pallas as pl
from jax.experimental.pallas import tpu as pltpu

# Compat shim: newer JAX exposes pltpu.CompilerParams, older TPUCompilerParams.
_CompilerParams = getattr(pltpu, "CompilerParams", None) or getattr(
    pltpu, "TPUCompilerParams")

# Images per grid step.  Must be a multiple of 8 (f32 sublane tile) so every
# in-kernel row slice is tile aligned; 8..32 all fit comfortably in VMEM.
_TB = 8


# ----------------------------- fused kernel --------------------------------

def _lenet_kernel(x_ref,      # (2, 2, 6*TB, 140) bf16 : [t, pq, u*TB+i, (kh,kw)]
                  c1w_ref,    # (140, 512)  bf16 : banded conv1, cols (pj, b, c)
                  c1b_ref,    # (1, 256)    f32
                  c2w_ref,    # (1280, 512) bf16 : rows (kh, b, c), cols (pj, beta, d)
                  c2b_ref,    # (1, 256)    f32
                  fc1w_ref,   # (4, 256, 512) bf16
                  fc1b_ref,   # (1, 512)    f32
                  fc2w_ref,   # (512, 128)  bf16
                  fc2b_ref,   # (1, 128)    f32 (-1e30 in the 118 pad lanes)
                  out_ref):   # (TB, 128)   f32
    f32, bf16 = jnp.float32, jnp.bfloat16
    tb = out_ref.shape[0]

    # ---- conv1 (5x5, 1->20) fused with 2x2 max-pool + relu -----------------
    # Pooled row a = 2u + t comes from conv rows 4u + 2t + pq; the 5 kh taps
    # are folded into K=140 by the wrapper-side im2row.  Column halves of the
    # 512-wide result are the even/odd conv output columns (pool over width).
    p1 = []
    for t in range(2):                      # pooled-row parity
        m = None
        for pq in range(2):                 # conv row within the pooled pair
            r = jnp.dot(x_ref[t, pq], c1w_ref[...],
                        preferred_element_type=f32)           # (6*TB, 512)
            r = jnp.maximum(r[:, :256], r[:, 256:])           # pool over cols
            m = r if m is None else jnp.maximum(m, r)         # pool over rows
        p1.append(jnp.maximum(m + c1b_ref[...], 0.0))         # (6*TB, 256) f32

    # ---- conv2 (5x5, 20->50) fused with 2x2 max-pool + relu ----------------
    # conv2 row i2 = 2*alpha + pi; tap kh reads pooled1 row 2*alpha + pi + kh
    # = 2*(alpha+s) + t  -> a tile-aligned 4*TB-row window of p1[t].
    # The 5 taps are concatenated along lanes (256-aligned) -> K = 1280.
    m2 = None
    for pi in range(2):                     # conv2 row within the pooled pair
        pieces = []
        for kh in range(5):
            t = (pi + kh) % 2
            s = (pi + kh) // 2
            pieces.append(p1[t][s * tb:(s + 4) * tb, :])      # (4*TB, 256)
        lhs2 = jnp.concatenate(pieces, axis=-1).astype(bf16)  # (4*TB, 1280)
        r = jnp.dot(lhs2, c2w_ref[...], preferred_element_type=f32)  # (4*TB, 512)
        r = jnp.maximum(r[:, :256], r[:, 256:])               # pool over cols
        m2 = r if m2 is None else jnp.maximum(m2, r)          # pool over rows
    p2 = jnp.maximum(m2 + c2b_ref[...], 0.0)                  # (4*TB, 256) f32

    # ---- fc1 (800->500, padded to 512) + relu; batched over the TB images --
    acc = None
    for alpha in range(4):                  # pooled2 row index
        xa = p2[alpha * tb:(alpha + 1) * tb, :].astype(bf16)  # (TB, 256)
        r = jnp.dot(xa, fc1w_ref[alpha], preferred_element_type=f32)
        acc = r if acc is None else acc + r
    z1 = jnp.maximum(acc + fc1b_ref[...], 0.0)                # (TB, 512)

    # ---- fc2 (500->10, padded to 128 lanes) + log_softmax ------------------
    logits = jnp.dot(z1.astype(bf16), fc2w_ref[...],
                     preferred_element_type=f32) + fc2b_ref[...]      # (TB, 128)
    mx = jnp.max(logits, axis=-1, keepdims=True)
    sh = logits - mx
    lse = jnp.log(jnp.sum(jnp.exp(sh), axis=-1, keepdims=True))
    out_ref[...] = (sh - lse).astype(out_ref.dtype)


# --------------------------- parameter prep --------------------------------

def prepare_params(params):
    """One-time host-side prep: banded conv weights (taps folded into K),
    permuted/padded FC weights, lane-padded biases."""
    w1 = np.asarray(params["conv1_w"], np.float32)     # (20, 1, 5, 5)
    b1 = np.asarray(params["conv1_b"], np.float32)     # (20,)
    w2 = np.asarray(params["conv2_w"], np.float32)     # (50, 20, 5, 5)
    b2 = np.asarray(params["conv2_b"], np.float32)     # (50,)
    wf1 = np.asarray(params["fc1_w"], np.float32)      # (500, 800)
    bf1 = np.asarray(params["fc1_b"], np.float32)      # (500,)
    wf2 = np.asarray(params["fc2_w"], np.float32)      # (10, 500)
    bf2 = np.asarray(params["fc2_b"], np.float32)      # (10,)

    # conv1 banded:  c1w[kh*28 + j, pj*256 + b*20 + c] = w1[c,0,kh, j-(2b+pj)]
    w1k = np.transpose(w1[:, 0], (1, 2, 0))            # (kh, kw, c)
    c1 = np.zeros((2, 5, 28, 12, 20), np.float32)      # [pj, kh, j, b, c]
    for pj in range(2):
        for kh in range(5):
            for b in range(12):
                j0 = 2 * b + pj
                c1[pj, kh, j0:j0 + 5, b, :] = w1k[kh]
    c1 = c1.reshape(2, 140, 240)
    c1 = np.pad(c1, ((0, 0), (0, 0), (0, 16)))          # (2, 140, 256)
    c1w = np.transpose(c1, (1, 0, 2)).reshape(140, 512)
    c1b = np.pad(np.tile(b1, 12), (0, 16)).reshape(1, 256)

    # conv2 banded: c2w[kh*256 + b*20 + c, pj*256 + beta*50 + d]
    #               = w2[d, c, kh, b - (2*beta + pj)]
    w2k = np.transpose(w2, (2, 3, 1, 0))                # (kh, kw, c, d)
    c2 = np.zeros((5, 12, 20, 2, 4, 50), np.float32)    # [kh, b, c, pj, beta, d]
    for kh in range(5):
        for pj in range(2):
            for beta in range(4):
                j0 = 2 * beta + pj
                c2[kh, j0:j0 + 5, :, pj, beta, :] = w2k[kh]
    c2 = c2.reshape(5, 240, 2, 200)
    c2 = np.pad(c2, ((0, 0), (0, 16), (0, 0), (0, 56)))  # (5, 256, 2, 256)
    c2w = c2.reshape(1280, 512)
    c2b = np.pad(np.tile(b2, 4), (0, 56)).reshape(1, 256)

    # fc1: torch flatten index = d*16 + alpha*4 + beta (NCHW .view(-1, 800));
    # kernel p2 layout is rows (alpha, img), cols (beta*50 + d, 56 pad).
    f1 = wf1.reshape(500, 50, 4, 4)                     # (o, d, alpha, beta)
    fc1w = np.transpose(f1, (2, 3, 1, 0)).reshape(4, 200, 500)
    fc1w = np.pad(fc1w, ((0, 0), (0, 56), (0, 12)))     # (4, 256, 512)
    fc1b = np.pad(bf1, (0, 12)).reshape(1, 512)

    # fc2: pad 10 classes to a lane-dense 128; -1e30 pad bias + zero pad weight
    # columns contribute exactly 0 to the softmax sum (keep f32 logits/bias).
    fc2w = np.zeros((512, 128), np.float32)
    fc2w[:500, :10] = wf2.T
    fc2b = np.full((1, 128), -1e30, np.float32)
    fc2b[0, :10] = bf2

    return {
        "c1w": jnp.asarray(c1w, jnp.bfloat16), "c1b": jnp.asarray(c1b),
        "c2w": jnp.asarray(c2w, jnp.bfloat16), "c2b": jnp.asarray(c2b),
        "fc1w": jnp.asarray(fc1w, jnp.bfloat16), "fc1b": jnp.asarray(fc1b),
        "fc2w": jnp.asarray(fc2w, jnp.bfloat16), "fc2b": jnp.asarray(fc2b),
    }


# ------------------------------ forward ------------------------------------

@jax.jit
def lenet_forward(x_nchw, prep):
    n = x_nchw.shape[0]
    tb = _TB
    nb = (n + tb - 1) // tb
    n_pad = nb * tb

    x2 = x_nchw.reshape(n, 28, 28)
    if n_pad != n:
        x2 = jnp.pad(x2, ((0, n_pad - n), (0, 0), (0, 0)))

    # im2row for conv1 with the 5 kh taps folded into K=140:
    # window (t, pq, u) of image i = input rows [4u + 2t + pq, +5) flattened.
    win = [x2[:, i:i + 5, :].reshape(n_pad, 140) for i in range(24)]
    xw = jnp.stack([win[4 * u + 2 * t + pq]
                    for t in range(2) for pq in range(2) for u in range(6)],
                   axis=0)                                   # (24, n_pad, 140)
    # Pre-block the batch so in-kernel rows are (u outer, image inner).
    xw = xw.reshape(2, 2, 6, nb, tb, 140).transpose(3, 0, 1, 2, 4, 5)
    xw = xw.reshape(nb, 2, 2, 6 * tb, 140).astype(jnp.bfloat16)

    def full_spec(a):
        return pl.BlockSpec(a.shape, lambda b: (0,) * a.ndim)

    out = pl.pallas_call(
        _lenet_kernel,
        out_shape=jax.ShapeDtypeStruct((n_pad, 128), jnp.float32),
        grid=(nb,),
        in_specs=[
            pl.BlockSpec((None, 2, 2, 6 * tb, 140), lambda b: (b, 0, 0, 0, 0)),
            full_spec(prep["c1w"]), full_spec(prep["c1b"]),
            full_spec(prep["c2w"]), full_spec(prep["c2b"]),
            full_spec(prep["fc1w"]), full_spec(prep["fc1b"]),
            full_spec(prep["fc2w"]), full_spec(prep["fc2b"]),
        ],
        out_specs=pl.BlockSpec((tb, 128), lambda b: (b, 0)),
        compiler_params=_CompilerParams(
            dimension_semantics=("parallel",),
            vmem_limit_bytes=32 * 1024 * 1024),
    )(xw, prep["c1w"], prep["c1b"], prep["c2w"], prep["c2b"],
      prep["fc1w"], prep["fc1b"], prep["fc2w"], prep["fc2b"])

    return out[:n, :10]


# -------------------------- pure-JAX reference ------------------------------

def lenet_reference(x_nchw, params):
    """Plain XLA reference with the exact semantics of the PyTorch module."""
    dimnums = ("NCHW", "OIHW", "NCHW")
    y = jax.lax.conv_general_dilated(x_nchw, params["conv1_w"], (1, 1), "VALID",
                                     dimension_numbers=dimnums)
    y = y + params["conv1_b"][None, :, None, None]
    y = jax.lax.reduce_window(y, -jnp.inf, jax.lax.max,
                              (1, 1, 2, 2), (1, 1, 2, 2), "VALID")
    y = jnp.maximum(y, 0.0)
    y = jax.lax.conv_general_dilated(y, params["conv2_w"], (1, 1), "VALID",
                                     dimension_numbers=dimnums)
    y = y + params["conv2_b"][None, :, None, None]
    y = jax.lax.reduce_window(y, -jnp.inf, jax.lax.max,
                              (1, 1, 2, 2), (1, 1, 2, 2), "VALID")
    y = jnp.maximum(y, 0.0)
    feat = y.reshape(y.shape[0], 800)                    # torch x.view(-1, 800)
    h = jnp.maximum(feat @ params["fc1_w"].T + params["fc1_b"], 0.0)
    logits = h @ params["fc2_w"].T + params["fc2_b"]
    return jax.nn.log_softmax(logits, axis=-1)


def init_params(key):
    ks = jax.random.split(key, 8)
    s = 0.05
    return {
        "conv1_w": s * jax.random.normal(ks[0], (20, 1, 5, 5), jnp.float32),
        "conv1_b": s * jax.random.normal(ks[1], (20,), jnp.float32),
        "conv2_w": s * jax.random.normal(ks[2], (50, 20, 5, 5), jnp.float32),
        "conv2_b": s * jax.random.normal(ks[3], (50,), jnp.float32),
        "fc1_w": s * jax.random.normal(ks[4], (500, 800), jnp.float32),
        "fc1_b": s * jax.random.normal(ks[5], (500,), jnp.float32),
        "fc2_w": s * jax.random.normal(ks[6], (10, 500), jnp.float32),
        "fc2_b": s * jax.random.normal(ks[7], (10,), jnp.float32),
    }


if __name__ == "__main__":
    key = jax.random.PRNGKey(0)
    pkey, xkey = jax.random.split(key)
    params = init_params(pkey)
    prep = prepare_params(params)      # one-time parameter prep (host-side)
    # fc1 expects 800 = 50*4*4 features, which pins the input to (N, 1, 28, 28).
    # Batch 16 -> grid of 2 parallel steps (both v7x TensorCores busy).
    x = jax.random.normal(xkey, (16, 1, 28, 28), jnp.float32)

    out = jax.block_until_ready(lenet_forward(x, prep))

    assert out.shape == (16, 10)
    assert bool(jnp.all(jnp.isfinite(out)))
    # log_softmax sanity: exp(out) sums to 1 per row.
    row_sums = jnp.sum(jnp.exp(out), axis=-1)
    assert bool(jnp.allclose(row_sums, 1.0, atol=1e-4))
    # Numerical check vs. pure-JAX reference (bf16 MXU operands, f32 accum).
    ref = lenet_reference(x, params)
    assert bool(jnp.allclose(out, ref, atol=5e-2))

    print("KERNEL_OK")
</pallas_src>

<mosaic_0001>
module attributes {stable_mosaic.version = 11 : i64} {
  func.func @_lenet_kernel(%arg0: i32, %arg1: memref<1x2x2x48x140xbf16, #tpu.memory_space<vmem>>, %arg2: memref<140x512xbf16, #tpu.memory_space<vmem>>, %arg3: memref<1x256xf32, #tpu.memory_space<vmem>>, %arg4: memref<1280x512xbf16, #tpu.memory_space<vmem>>, %arg5: memref<1x256xf32, #tpu.memory_space<vmem>>, %arg6: memref<4x256x512xbf16, #tpu.memory_space<vmem>>, %arg7: memref<1x512xf32, #tpu.memory_space<vmem>>, %arg8: memref<512x128xbf16, #tpu.memory_space<vmem>>, %arg9: memref<1x128xf32, #tpu.memory_space<vmem>>, %arg10: memref<8x128xf32, #tpu.memory_space<vmem>>) attributes {dimension_semantics = [#tpu.dimension_semantics<parallel>], iteration_bounds = array<i64: 2>, scalar_prefetch = 0 : i64, scratch_operands = 0 : i64, tpu.core_type = #tpu.core_type<tc>, window_params = [{transform_indices = @transform_0, window_bounds = array<i64: 1, 2, 2, 48, 140>}, {pipeline_mode = #tpu.pipeline_mode<synchronous>, transform_indices = @transform_1, window_bounds = array<i64: 140, 512>}, {pipeline_mode = #tpu.pipeline_mode<synchronous>, transform_indices = @transform_2, window_bounds = array<i64: 1, 256>}, {pipeline_mode = #tpu.pipeline_mode<synchronous>, transform_indices = @transform_3, window_bounds = array<i64: 1280, 512>}, {pipeline_mode = #tpu.pipeline_mode<synchronous>, transform_indices = @transform_4, window_bounds = array<i64: 1, 256>}, {pipeline_mode = #tpu.pipeline_mode<synchronous>, transform_indices = @transform_5, window_bounds = array<i64: 4, 256, 512>}, {pipeline_mode = #tpu.pipeline_mode<synchronous>, transform_indices = @transform_6, window_bounds = array<i64: 1, 512>}, {pipeline_mode = #tpu.pipeline_mode<synchronous>, transform_indices = @transform_7, window_bounds = array<i64: 512, 128>}, {pipeline_mode = #tpu.pipeline_mode<synchronous>, transform_indices = @transform_8, window_bounds = array<i64: 1, 128>}, {transform_indices = @transform_9, window_bounds = array<i64: 8, 128>}]} {
    %c0 = arith.constant 0 : index
    %c0_0 = arith.constant 0 : index
    %c0_1 = arith.constant 0 : index
    %c0_2 = arith.constant 0 : index
    %c0_3 = arith.constant 0 : index
    %0 = vector.load %arg1[%c0, %c0_0, %c0_1, %c0_2, %c0_3] : memref<1x2x2x48x140xbf16, #tpu.memory_space<vmem>>, vector<1x1x1x48x140xbf16>
    %1 = vector.shape_cast %0 : vector<1x1x1x48x140xbf16> to vector<48x140xbf16>
    %c0_4 = arith.constant 0 : index
    %c0_5 = arith.constant 0 : index
    %2 = vector.load %arg2[%c0_4, %c0_5] : memref<140x512xbf16, #tpu.memory_space<vmem>>, vector<140x512xbf16>
    %cst = arith.constant dense<0.000000e+00> : vector<48x512xf32>
    %3 = tpu.matmul %1, %2, %cst {dimension_numbers = #tpu.dot_dimension_numbers<[1], [0], [0], [1], [0, 0, 1, 1], [], []>} : vector<48x140xbf16>, vector<140x512xbf16>, vector<48x512xf32> -> vector<48x512xf32>
    %4 = vector.extract_strided_slice %3 {offsets = [0, 0], sizes = [48, 256], strides = [1, 1]} : vector<48x512xf32> to vector<48x256xf32>
    %5 = vector.extract_strided_slice %3 {offsets = [0, 256], sizes = [48, 256], strides = [1, 1]} : vector<48x512xf32> to vector<48x256xf32>
    %6 = arith.maximumf %4, %5 : vector<48x256xf32>
    %c0_6 = arith.constant 0 : index
    %c0_7 = arith.constant 0 : index
    %c1 = arith.constant 1 : index
    %c0_8 = arith.constant 0 : index
    %c0_9 = arith.constant 0 : index
    %7 = vector.load %arg1[%c0_6, %c0_7, %c1, %c0_8, %c0_9] : memref<1x2x2x48x140xbf16, #tpu.memory_space<vmem>>, vector<1x1x1x48x140xbf16>
    %8 = vector.shape_cast %7 : vector<1x1x1x48x140xbf16> to vector<48x140xbf16>
    %c0_10 = arith.constant 0 : index
    %c0_11 = arith.constant 0 : index
    %9 = vector.load %arg2[%c0_10, %c0_11] : memref<140x512xbf16, #tpu.memory_space<vmem>>, vector<140x512xbf16>
    %cst_12 = arith.constant dense<0.000000e+00> : vector<48x512xf32>
    %10 = tpu.matmul %8, %9, %cst_12 {dimension_numbers = #tpu.dot_dimension_numbers<[1], [0], [0], [1], [0, 0, 1, 1], [], []>} : vector<48x140xbf16>, vector<140x512xbf16>, vector<48x512xf32> -> vector<48x512xf32>
    %11 = vector.extract_strided_slice %10 {offsets = [0, 0], sizes = [48, 256], strides = [1, 1]} : vector<48x512xf32> to vector<48x256xf32>
    %12 = vector.extract_strided_slice %10 {offsets = [0, 256], sizes = [48, 256], strides = [1, 1]} : vector<48x512xf32> to vector<48x256xf32>
    %13 = arith.maximumf %11, %12 : vector<48x256xf32>
    %14 = arith.maximumf %6, %13 : vector<48x256xf32>
    %c0_13 = arith.constant 0 : index
    %c0_14 = arith.constant 0 : index
    %15 = vector.load %arg3[%c0_13, %c0_14] : memref<1x256xf32, #tpu.memory_space<vmem>>, vector<1x256xf32>
    %16 = vector.broadcast %15 : vector<1x256xf32> to vector<48x256xf32>
    %17 = arith.addf %14, %16 : vector<48x256xf32>
    %cst_15 = arith.constant 0.000000e+00 : f32
    %18 = vector.broadcast %cst_15 : f32 to vector<48x256xf32>
    %19 = arith.maximumf %17, %18 : vector<48x256xf32>
    %c0_16 = arith.constant 0 : index
    %c1_17 = arith.constant 1 : index
    %c0_18 = arith.constant 0 : index
    %c0_19 = arith.constant 0 : index
    %c0_20 = arith.constant 0 : index
    %20 = vector.load %arg1[%c0_16, %c1_17, %c0_18, %c0_19, %c0_20] : memref<1x2x2x48x140xbf16, #tpu.memory_space<vmem>>, vector<1x1x1x48x140xbf16>
    %21 = vector.shape_cast %20 : vector<1x1x1x48x140xbf16> to vector<48x140xbf16>
    %c0_21 = arith.constant 0 : index
    %c0_22 = arith.constant 0 : index
    %22 = vector.load %arg2[%c0_21, %c0_22] : memref<140x512xbf16, #tpu.memory_space<vmem>>, vector<140x512xbf16>
    %cst_23 = arith.constant dense<0.000000e+00> : vector<48x512xf32>
    %23 = tpu.matmul %21, %22, %cst_23 {dimension_numbers = #tpu.dot_dimension_numbers<[1], [0], [0], [1], [0, 0, 1, 1], [], []>} : vector<48x140xbf16>, vector<140x512xbf16>, vector<48x512xf32> -> vector<48x512xf32>
    %24 = vector.extract_strided_slice %23 {offsets = [0, 0], sizes = [48, 256], strides = [1, 1]} : vector<48x512xf32> to vector<48x256xf32>
    %25 = vector.extract_strided_slice %23 {offsets = [0, 256], sizes = [48, 256], strides = [1, 1]} : vector<48x512xf32> to vector<48x256xf32>
    %26 = arith.maximumf %24, %25 : vector<48x256xf32>
    %c0_24 = arith.constant 0 : index
    %c1_25 = arith.constant 1 : index
    %c1_26 = arith.constant 1 : index
    %c0_27 = arith.constant 0 : index
    %c0_28 = arith.constant 0 : index
    %27 = vector.load %arg1[%c0_24, %c1_25, %c1_26, %c0_27, %c0_28] : memref<1x2x2x48x140xbf16, #tpu.memory_space<vmem>>, vector<1x1x1x48x140xbf16>
    %28 = vector.shape_cast %27 : vector<1x1x1x48x140xbf16> to vector<48x140xbf16>
    %c0_29 = arith.constant 0 : index
    %c0_30 = arith.constant 0 : index
    %29 = vector.load %arg2[%c0_29, %c0_30] : memref<140x512xbf16, #tpu.memory_space<vmem>>, vector<140x512xbf16>
    %cst_31 = arith.constant dense<0.000000e+00> : vector<48x512xf32>
    %30 = tpu.matmul %28, %29, %cst_31 {dimension_numbers = #tpu.dot_dimension_numbers<[1], [0], [0], [1], [0, 0, 1, 1], [], []>} : vector<48x140xbf16>, vector<140x512xbf16>, vector<48x512xf32> -> vector<48x512xf32>
    %31 = vector.extract_strided_slice %30 {offsets = [0, 0], sizes = [48, 256], strides = [1, 1]} : vector<48x512xf32> to vector<48x256xf32>
    %32 = vector.extract_strided_slice %30 {offsets = [0, 256], sizes = [48, 256], strides = [1, 1]} : vector<48x512xf32> to vector<48x256xf32>
    %33 = arith.maximumf %31, %32 : vector<48x256xf32>
    %34 = arith.maximumf %26, %33 : vector<48x256xf32>
    %c0_32 = arith.constant 0 : index
    %c0_33 = arith.constant 0 : index
    %35 = vector.load %arg3[%c0_32, %c0_33] : memref<1x256xf32, #tpu.memory_space<vmem>>, vector<1x256xf32>
    %36 = vector.broadcast %35 : vector<1x256xf32> to vector<48x256xf32>
    %37 = arith.addf %34, %36 : vector<48x256xf32>
    %cst_34 = arith.constant 0.000000e+00 : f32
    %38 = vector.broadcast %cst_34 : f32 to vector<48x256xf32>
    %39 = arith.maximumf %37, %38 : vector<48x256xf32>
    %40 = vector.extract_strided_slice %19 {offsets = [0, 0], sizes = [32, 256], strides = [1, 1]} : vector<48x256xf32> to vector<32x256xf32>
    %41 = vector.extract_strided_slice %39 {offsets = [0, 0], sizes = [32, 256], strides = [1, 1]} : vector<48x256xf32> to vector<32x256xf32>
    %42 = vector.extract_strided_slice %19 {offsets = [8, 0], sizes = [32, 256], strides = [1, 1]} : vector<48x256xf32> to vector<32x256xf32>
    %43 = vector.extract_strided_slice %39 {offsets = [8, 0], sizes = [32, 256], strides = [1, 1]} : vector<48x256xf32> to vector<32x256xf32>
    %44 = vector.extract_strided_slice %19 {offsets = [16, 0], sizes = [32, 256], strides = [1, 1]} : vector<48x256xf32> to vector<32x256xf32>
    %45 = tpu.concatenate %40, %41, %42, %43, %44 in 1 : vector<32x256xf32>, vector<32x256xf32>, vector<32x256xf32>, vector<32x256xf32>, vector<32x256xf32> -> vector<32x1280xf32>
    %46 = arith.truncf %45 : vector<32x1280xf32> to vector<32x1280xbf16>
    %c0_35 = arith.constant 0 : index
    %c0_36 = arith.constant 0 : index
    %47 = vector.load %arg4[%c0_35, %c0_36] : memref<1280x512xbf16, #tpu.memory_space<vmem>>, vector<1280x512xbf16>
    %cst_37 = arith.constant dense<0.000000e+00> : vector<32x512xf32>
    %48 = tpu.matmul %46, %47, %cst_37 {dimension_numbers = #tpu.dot_dimension_numbers<[1], [0], [0], [1], [0, 0, 1, 1], [], []>} : vector<32x1280xbf16>, vector<1280x512xbf16>, vector<32x512xf32> -> vector<32x512xf32>
    %49 = vector.extract_strided_slice %48 {offsets = [0, 0], sizes = [32, 256], strides = [1, 1]} : vector<32x512xf32> to vector<32x256xf32>
    %50 = vector.extract_strided_slice %48 {offsets = [0, 256], sizes = [32, 256], strides = [1, 1]} : vector<32x512xf32> to vector<32x256xf32>
    %51 = arith.maximumf %49, %50 : vector<32x256xf32>
    %52 = vector.extract_strided_slice %39 {offsets = [0, 0], sizes = [32, 256], strides = [1, 1]} : vector<48x256xf32> to vector<32x256xf32>
    %53 = vector.extract_strided_slice %19 {offsets = [8, 0], sizes = [32, 256], strides = [1, 1]} : vector<48x256xf32> to vector<32x256xf32>
    %54 = vector.extract_strided_slice %39 {offsets = [8, 0], sizes = [32, 256], strides = [1, 1]} : vector<48x256xf32> to vector<32x256xf32>
    %55 = vector.extract_strided_slice %19 {offsets = [16, 0], sizes = [32, 256], strides = [1, 1]} : vector<48x256xf32> to vector<32x256xf32>
    %56 = vector.extract_strided_slice %39 {offsets = [16, 0], sizes = [32, 256], strides = [1, 1]} : vector<48x256xf32> to vector<32x256xf32>
    %57 = tpu.concatenate %52, %53, %54, %55, %56 in 1 : vector<32x256xf32>, vector<32x256xf32>, vector<32x256xf32>, vector<32x256xf32>, vector<32x256xf32> -> vector<32x1280xf32>
    %58 = arith.truncf %57 : vector<32x1280xf32> to vector<32x1280xbf16>
    %c0_38 = arith.constant 0 : index
    %c0_39 = arith.constant 0 : index
    %59 = vector.load %arg4[%c0_38, %c0_39] : memref<1280x512xbf16, #tpu.memory_space<vmem>>, vector<1280x512xbf16>
    %cst_40 = arith.constant dense<0.000000e+00> : vector<32x512xf32>
    %60 = tpu.matmul %58, %59, %cst_40 {dimension_numbers = #tpu.dot_dimension_numbers<[1], [0], [0], [1], [0, 0, 1, 1], [], []>} : vector<32x1280xbf16>, vector<1280x512xbf16>, vector<32x512xf32> -> vector<32x512xf32>
    %61 = vector.extract_strided_slice %60 {offsets = [0, 0], sizes = [32, 256], strides = [1, 1]} : vector<32x512xf32> to vector<32x256xf32>
    %62 = vector.extract_strided_slice %60 {offsets = [0, 256], sizes = [32, 256], strides = [1, 1]} : vector<32x512xf32> to vector<32x256xf32>
    %63 = arith.maximumf %61, %62 : vector<32x256xf32>
    %64 = arith.maximumf %51, %63 : vector<32x256xf32>
    %c0_41 = arith.constant 0 : index
    %c0_42 = arith.constant 0 : index
    %65 = vector.load %arg5[%c0_41, %c0_42] : memref<1x256xf32, #tpu.memory_space<vmem>>, vector<1x256xf32>
    %66 = vector.broadcast %65 : vector<1x256xf32> to vector<32x256xf32>
    %67 = arith.addf %64, %66 : vector<32x256xf32>
    %cst_43 = arith.constant 0.000000e+00 : f32
    %68 = vector.broadcast %cst_43 : f32 to vector<32x256xf32>
    %69 = arith.maximumf %67, %68 : vector<32x256xf32>
    %70 = vector.extract_strided_slice %69 {offsets = [0, 0], sizes = [8, 256], strides = [1, 1]} : vector<32x256xf32> to vector<8x256xf32>
    %71 = arith.truncf %70 : vector<8x256xf32> to vector<8x256xbf16>
    %c0_44 = arith.constant 0 : index
    %c0_45 = arith.constant 0 : index
    %c0_46 = arith.constant 0 : index
    %72 = vector.load %arg6[%c0_44, %c0_45, %c0_46] : memref<4x256x512xbf16, #tpu.memory_space<vmem>>, vector<1x256x512xbf16>
    %73 = vector.shape_cast %72 : vector<1x256x512xbf16> to vector<256x512xbf16>
    %cst_47 = arith.constant dense<0.000000e+00> : vector<8x512xf32>
    %74 = tpu.matmul %71, %73, %cst_47 {dimension_numbers = #tpu.dot_dimension_numbers<[1], [0], [0], [1], [0, 0, 1, 1], [], []>} : vector<8x256xbf16>, vector<256x512xbf16>, vector<8x512xf32> -> vector<8x512xf32>
    %75 = vector.extract_strided_slice %69 {offsets = [8, 0], sizes = [8, 256], strides = [1, 1]} : vector<32x256xf32> to vector<8x256xf32>
    %76 = arith.truncf %75 : vector<8x256xf32> to vector<8x256xbf16>
    %c1_48 = arith.constant 1 : index
    %c0_49 = arith.constant 0 : index
    %c0_50 = arith.constant 0 : index
    %77 = vector.load %arg6[%c1_48, %c0_49, %c0_50] : memref<4x256x512xbf16, #tpu.memory_space<vmem>>, vector<1x256x512xbf16>
    %78 = vector.shape_cast %77 : vector<1x256x512xbf16> to vector<256x512xbf16>
    %cst_51 = arith.constant dense<0.000000e+00> : vector<8x512xf32>
    %79 = tpu.matmul %76, %78, %cst_51 {dimension_numbers = #tpu.dot_dimension_numbers<[1], [0], [0], [1], [0, 0, 1, 1], [], []>} : vector<8x256xbf16>, vector<256x512xbf16>, vector<8x512xf32> -> vector<8x512xf32>
    %80 = arith.addf %74, %79 : vector<8x512xf32>
    %81 = vector.extract_strided_slice %69 {offsets = [16, 0], sizes = [8, 256], strides = [1, 1]} : vector<32x256xf32> to vector<8x256xf32>
    %82 = arith.truncf %81 : vector<8x256xf32> to vector<8x256xbf16>
    %c2 = arith.constant 2 : index
    %c0_52 = arith.constant 0 : index
    %c0_53 = arith.constant 0 : index
    %83 = vector.load %arg6[%c2, %c0_52, %c0_53] : memref<4x256x512xbf16, #tpu.memory_space<vmem>>, vector<1x256x512xbf16>
    %84 = vector.shape_cast %83 : vector<1x256x512xbf16> to vector<256x512xbf16>
    %cst_54 = arith.constant dense<0.000000e+00> : vector<8x512xf32>
    %85 = tpu.matmul %82, %84, %cst_54 {dimension_numbers = #tpu.dot_dimension_numbers<[1], [0], [0], [1], [0, 0, 1, 1], [], []>} : vector<8x256xbf16>, vector<256x512xbf16>, vector<8x512xf32> -> vector<8x512xf32>
    %86 = arith.addf %80, %85 : vector<8x512xf32>
    %87 = vector.extract_strided_slice %69 {offsets = [24, 0], sizes = [8, 256], strides = [1, 1]} : vector<32x256xf32> to vector<8x256xf32>
    %88 = arith.truncf %87 : vector<8x256xf32> to vector<8x256xbf16>
    %c3 = arith.constant 3 : index
    %c0_55 = arith.constant 0 : index
    %c0_56 = arith.constant 0 : index
    %89 = vector.load %arg6[%c3, %c0_55, %c0_56] : memref<4x256x512xbf16, #tpu.memory_space<vmem>>, vector<1x256x512xbf16>
    %90 = vector.shape_cast %89 : vector<1x256x512xbf16> to vector<256x512xbf16>
    %cst_57 = arith.constant dense<0.000000e+00> : vector<8x512xf32>
    %91 = tpu.matmul %88, %90, %cst_57 {dimension_numbers = #tpu.dot_dimension_numbers<[1], [0], [0], [1], [0, 0, 1, 1], [], []>} : vector<8x256xbf16>, vector<256x512xbf16>, vector<8x512xf32> -> vector<8x512xf32>
    %92 = arith.addf %86, %91 : vector<8x512xf32>
    %c0_58 = arith.constant 0 : index
    %c0_59 = arith.constant 0 : index
    %93 = vector.load %arg7[%c0_58, %c0_59] : memref<1x512xf32, #tpu.memory_space<vmem>>, vector<1x512xf32>
    %94 = vector.broadcast %93 : vector<1x512xf32> to vector<8x512xf32>
    %95 = arith.addf %92, %94 : vector<8x512xf32>
    %cst_60 = arith.constant 0.000000e+00 : f32
    %96 = vector.broadcast %cst_60 : f32 to vector<8x512xf32>
    %97 = arith.maximumf %95, %96 : vector<8x512xf32>
    %98 = arith.truncf %97 : vector<8x512xf32> to vector<8x512xbf16>
    %c0_61 = arith.constant 0 : index
    %c0_62 = arith.constant 0 : index
    %99 = vector.load %arg8[%c0_61, %c0_62] : memref<512x128xbf16, #tpu.memory_space<vmem>>, vector<512x128xbf16>
    %cst_63 = arith.constant dense<0.000000e+00> : vector<8x128xf32>
    %100 = tpu.matmul %98, %99, %cst_63 {dimension_numbers = #tpu.dot_dimension_numbers<[1], [0], [0], [1], [0, 0, 1, 1], [], []>} : vector<8x512xbf16>, vector<512x128xbf16>, vector<8x128xf32> -> vector<8x128xf32>
    %c0_64 = arith.constant 0 : index
    %c0_65 = arith.constant 0 : index
    %101 = vector.load %arg9[%c0_64, %c0_65] : memref<1x128xf32, #tpu.memory_space<vmem>>, vector<1x128xf32>
    %102 = vector.broadcast %101 : vector<1x128xf32> to vector<8x128xf32>
    %103 = arith.addf %100, %102 : vector<8x128xf32>
    %cst_66 = arith.constant dense<0xFF800000> : vector<8xf32>
    %104 = vector.multi_reduction <maximumf>, %103, %cst_66 [1] : vector<8x128xf32> to vector<8xf32>
    %105 = vector.shape_cast %104 : vector<8xf32> to vector<8x1xf32>
    %106 = vector.broadcast %105 : vector<8x1xf32> to vector<8x128xf32>
    %107 = arith.subf %103, %106 : vector<8x128xf32>
    %108 = math.exp %107 : vector<8x128xf32>
    %cst_67 = arith.constant dense<0.000000e+00> : vector<8xf32>
    %109 = vector.multi_reduction <add>, %108, %cst_67 [1] : vector<8x128xf32> to vector<8xf32>
    %110 = vector.shape_cast %109 : vector<8xf32> to vector<8x1xf32>
    %111 = math.log %110 : vector<8x1xf32>
    %112 = vector.broadcast %111 : vector<8x1xf32> to vector<8x128xf32>
    %113 = arith.subf %107, %112 : vector<8x128xf32>
    %c0_68 = arith.constant 0 : index
    %c0_69 = arith.constant 0 : index
    %114 = vector.load %arg10[%c0_68, %c0_69] : memref<8x128xf32, #tpu.memory_space<vmem>>, vector<8x128xf32>
    tpu.vector_store %arg10[%c0_68, %c0_69], %113 {strides = array<i32>} : memref<8x128xf32, #tpu.memory_space<vmem>>, vector<8x128xf32>,
    return
  }
  func.func @transform_0(%arg0: i32) -> (i32, i32, i32, i32, i32) {
    %c0_i32 = arith.constant 0 : i32
    %c0_i32_0 = arith.constant 0 : i32
    %c0_i32_1 = arith.constant 0 : i32
    %c0_i32_2 = arith.constant 0 : i32
    %c0_i32_3 = arith.constant 0 : i32
    return %arg0, %c0_i32, %c0_i32_0, %c0_i32_1, %c0_i32_2 : i32, i32, i32, i32, i32
  }
  func.func @transform_1(%arg0: i32) -> (i32, i32) {
    %c0_i32 = arith.constant 0 : i32
    %c0_i32_0 = arith.constant 0 : i32
    %c0_i32_1 = arith.constant 0 : i32
    return %c0_i32, %c0_i32_0 : i32, i32
  }
  func.func @transform_2(%arg0: i32) -> (i32, i32) {
    %c0_i32 = arith.constant 0 : i32
    %c0_i32_0 = arith.constant 0 : i32
    %c0_i32_1 = arith.constant 0 : i32
    return %c0_i32, %c0_i32_0 : i32, i32
  }
  func.func @transform_3(%arg0: i32) -> (i32, i32) {
    %c0_i32 = arith.constant 0 : i32
    %c0_i32_0 = arith.constant 0 : i32
    %c0_i32_1 = arith.constant 0 : i32
    return %c0_i32, %c0_i32_0 : i32, i32
  }
  func.func @transform_4(%arg0: i32) -> (i32, i32) {
    %c0_i32 = arith.constant 0 : i32
    %c0_i32_0 = arith.constant 0 : i32
    %c0_i32_1 = arith.constant 0 : i32
    return %c0_i32, %c0_i32_0 : i32, i32
  }
  func.func @transform_5(%arg0: i32) -> (i32, i32, i32) {
    %c0_i32 = arith.constant 0 : i32
    %c0_i32_0 = arith.constant 0 : i32
    %c0_i32_1 = arith.constant 0 : i32
    %c0_i32_2 = arith.constant 0 : i32
    return %c0_i32, %c0_i32_0, %c0_i32_1 : i32, i32, i32
  }
  func.func @transform_6(%arg0: i32) -> (i32, i32) {
    %c0_i32 = arith.constant 0 : i32
    %c0_i32_0 = arith.constant 0 : i32
    %c0_i32_1 = arith.constant 0 : i32
    return %c0_i32, %c0_i32_0 : i32, i32
  }
  func.func @transform_7(%arg0: i32) -> (i32, i32) {
    %c0_i32 = arith.constant 0 : i32
    %c0_i32_0 = arith.constant 0 : i32
    %c0_i32_1 = arith.constant 0 : i32
    return %c0_i32, %c0_i32_0 : i32, i32
  }
  func.func @transform_8(%arg0: i32) -> (i32, i32) {
    %c0_i32 = arith.constant 0 : i32
    %c0_i32_0 = arith.constant 0 : i32
    %c0_i32_1 = arith.constant 0 : i32
    return %c0_i32, %c0_i32_0 : i32, i32
  }
  func.func @transform_9(%arg0: i32) -> (i32, i32) {
    %c0_i32 = arith.constant 0 : i32
    %c0_i32_0 = arith.constant 0 : i32
    return %arg0, %c0_i32 : i32, i32
  }
}

</mosaic_0001>

<bundles_post_ra>
// kernel: lenet_forward.1
= control target key start
LH: loop header
LB: loop body
LE: loop exit
PB: predicated region body
PF: predicated region fallthrough
CT: control target
= control target key end

     0   :  { %14 = vsyncpa [#allocation3], 0  ;;  %s13019_s0 = inlined_call_operand.vmem [shape: bf16[2,2,2,48,140], index: 0, kind: input, shape index: {}]   ;;  %s13020_s1 = inlined_call_operand.vmem [shape: bf16[140,512], index: 1, kind: input, shape index: {}]   ;;  %s13021_s2 = inlined_call_operand.vmem [shape: f32[1,256], index: 2, kind: input, shape index: {}]   ;;  %s13022_s3 = inlined_call_operand.vmem [shape: bf16[1280,512], index: 3, kind: input, shape index: {}]   ;;  %s13023_s4 = inlined_call_operand.vmem [shape: f32[1,256], index: 4, kind: input, shape index: {}]   ;;  %s13024_s5 = inlined_call_operand.vmem [shape: bf16[4,256,512], index: 5, kind: input, shape index: {}]   ;;  %s13025_s6 = inlined_call_operand.vmem [shape: f32[1,512], index: 6, kind: input, shape index: {}]   ;;  %s13026_s7 = inlined_call_operand.vmem [shape: bf16[512,128], index: 7, kind: input, shape index: {}]   ;;  %s13027_s8 = inlined_call_operand.vmem [shape: f32[1,128], index: 8, kind: input, shape index: {}]   ;;  %s13028_s9 = inlined_call_operand.hbm [shape: f32[16,128], index: 9, kind: output, shape index: {}]  }
   0x1   :  { %16 = vsyncpa [#allocation3 + $0x1], 0  ;;  %s9171_s30 = smov 0   ;;  %s9173_s10 = smov 0  }
   0x2   :  { %s9175_s11 = smov 0   ;;  %s9177_s12 = smov 0  }
   0x3 LB: > { %s9192_s13 = sadd.s32 4294967295, %s9118_s12   ;;  %s6761_s14 = sadd.s32 4294967294, %s9118_s12   ;;  %s9118_s12 = sphi %s9177_s12, %s13369_s12   ;;  %s9114_s11 = sphi %s9175_s11, %s13368_s11   ;;  %s9110_s10 = sphi %s9173_s10, %s13367_s10   ;;  %s9106_s30 = sphi %s9171_s30, %s13366_s30  }
   0x4   : > { %s9196_s15 = sadd.s32 1, %s9118_s12   ;;  %s223_s16 = sadd.s32 1, %s9114_s11 }
   0x5   : > { %s220_s17 = ssub.s32 %s9118_s12, %s9196_s15  ;;  %p233_p0 = scmp.ne.s32.totalorder %s9114_s11, %s9110_s10 }
   0x6   : > { %p221_p1 = scmp.eq.s32.totalorder %s220_s17, 0  ;;  %p234_p2 = scmp.eq.s32.totalorder %s9192_s13, 1 }
   0x7   : > { %p239_p3 = scmp.ne.s32.totalorder %s9110_s10, %s9106_s30  ;;  %p240_p4 = scmp.eq.s32.totalorder %s6761_s14, 1 }
   0x8   : > { %s9207_s18 = scalar_select %p221_p1, %s9114_s11, %s223_s16  }
   0x9   : > { %p9209_p5 = por %p234_p2, %p233_p0  ;;  %p9213_p6 = por %p240_p4, %p239_p3 }
   0xa   : > { %p6764_p7 = scmp.ge.s32.totalorder %s9118_s12, 1  ;;  %p290_p8 = scmp.lt.s32.totalorder %s9118_s12, 3 }
   0xc   : > { %p291_p9 = pnand %p6764_p7, %p290_p8 }
   0xe   : > { %294 = sbr.rel (%p291_p9) target bundleno = 2098 (0x832), region = 56 }
  0x15   : > { %v9222_v0 = vld [vmem:[%s13020_s1 + $0x4] ss:$16 sps:$4 sm:$0xff]   ;;  %v9227_v1 = vld [vmem:[%s13020_s1 + $0xc] ss:$16 sps:$4 sm:$0xff]   ;;  %v9233_v2 = vld [vmem:[%s13020_s1] ss:$16 sps:$4 sm:$0xff]  }
  0x16   : > { %600 = vmatprep.subr.bf16.mxu0 %v9222_v0  ;;  %v9238_v3 = vld [vmem:[%s13020_s1 + $0x8] ss:$16 sps:$4 sm:$0xff]   ;;  %663 = vmatprep.subr.bf16.mxu1 %v9227_v1  ;;  %v9244_v4 = vld [vmem:[%s13020_s1 + $0x24] ss:$16 sps:$4 sm:$0xff]   ;;  %v9251_v5 = vld [vmem:[%s13020_s1 + $0x2c] ss:$16 sps:$4 sm:$0xff]  }
  0x17   : > { %601 = vmatpush1.bf16.msra.mxu0 %v9233_v2  ;;  %664 = vmatpush1.bf16.msra.mxu1 %v9238_v3  ;;  %v9256_v6 = vld [vmem:[%s13020_s1 + $0x20] ss:$16 sps:$4 sm:$0xff]   ;;  %v9262_v7 = vld [vmem:[%s13020_s1 + $0x28] ss:$16 sps:$4 sm:$0xff]   ;;  %v9268_v8 = vld [vmem:[%s13020_s1 + $0x44] ss:$16 sps:$4 sm:$0xff]  }
  0x18   : > { %602 = vmatprep.subr.bf16.mxu0 %v9244_v4  ;;  %665 = vmatprep.subr.bf16.mxu1 %v9251_v5  ;;  %v9273_v9 = vld [vmem:[%s13020_s1 + $0x4c] ss:$16 sps:$4 sm:$0xff]   ;;  %v9278_v10 = vld [vmem:[%s13020_s1 + $0x40] ss:$16 sps:$4 sm:$0xff]   ;;  %v9283_v11 = vld [vmem:[%s13020_s1 + $0x48] ss:$16 sps:$4 sm:$0xff]  }
  0x19   : > { %v9290_v12 = vld [vmem:[%s13020_s1 + $0x64] ss:$16 sps:$4 sm:$0xff]   ;;  %v9297_v13 = vld [vmem:[%s13020_s1 + $0x6c] ss:$16 sps:$4 sm:$0xff]   ;;  %p326_p10 = scmp.lt.s32.totalorder %s9192_s13, 1  ;;  %vm577_vm0 = vcmask 97280  }
  0x1a   : > { %v9303_v14 = vld [vmem:[%s13020_s1 + $0x60] ss:$16 sps:$4 sm:$0xff]   ;;  %v9310_v15 = vld [vmem:[%s13020_s1 + $0x68] ss:$16 sps:$4 sm:$0xff]   ;;  %v9315_v16 = vld [vmem:[%s13020_s1 + $0x84] ss:$16 sps:$4 sm:$0xff]  }
  0x1b   : > { %603 = vmatpush1.bf16.msra.mxu0 %v9256_v6  ;;  %666 = vmatpush1.bf16.msra.mxu1 %v9262_v7  ;;  %v9322_v17 = vld [vmem:[%s13020_s1 + $0x8c] ss:$16 sps:$4 sm:$0xff]   ;;  %s327_s21 = scalar_select %p326_p10, %s9192_s13, 1  ;;  %v9328_v18 = vld [vmem:[%s13020_s1 + $0x80] ss:$16 sps:$4 sm:$0xff]   ;;  %vm587_vm1 = vcmask 1045504  }
  0x1c   : > { %604 = vmatprep.subr.bf16.mxu0 %v9268_v8  ;;  %667 = vmatprep.subr.bf16.mxu1 %v9273_v9  ;;  %v9333_v19 = vld [vmem:[%s13020_s1 + $0x88] ss:$16 sps:$4 sm:$0xff]   ;;  %v9340_v20 = vld [vmem:[%s13020_s1 + $0xa4] ss:$16 sps:$4 sm:$0xff]   ;;  %v9347_v21 = vld [vmem:[%s13020_s1 + $0xac] ss:$16 sps:$4 sm:$0xff]  }
  0x1d   : > { %s7854_s14 = smul.u32 192, %s327_s21  ;;  %v9352_v22 = vld [vmem:[%s13020_s1 + $0xa0] ss:$16 sps:$4 sm:$0xff]   ;;  %v9359_v23 = vld [vmem:[%s13020_s1 + $0xa8] ss:$16 sps:$4 sm:$0xff]   ;;  %s7679_s28 = sshll.u32 %s9192_s13, 7 }
  0x1e   : > { %v9364_v24 = vld [vmem:[%s13020_s1 + $0xc4] ss:$16 sps:$4 sm:$0xff]   ;;  %v9371_v25 = vld [vmem:[%s13020_s1 + $0xcc] ss:$16 sps:$4 sm:$0xff]   ;;  %v9381_v26 = vld [vmem:[%s13020_s1 + $0xc0] ss:$16 sps:$4 sm:$0xff]   ;;  %s12977_s24 = scalar_lea.hbm %s13028_s9, %s7679_s28 }
  0x1f   : > { %605 = vmatpush1.bf16.msra.mxu0 %v9278_v10  ;;  %668 = vmatpush1.bf16.msra.mxu1 %v9283_v11  ;;  %s9376_s29 = scalar_lea.vmem %s13019_s0, %s7854_s14  ;;  %v9386_v27 = vld [vmem:[%s13020_s1 + $0xc8] ss:$16 sps:$4 sm:$0xff]   ;;  %v9393_v28 = vld [vmem:[%s13020_s1 + $0xe4] ss:$16 sps:$4 sm:$0xff]   ;;  %v9400_v29 = vld [vmem:[%s13020_s1 + $0xec] ss:$16 sps:$4 sm:$0xff]  }
  0x20   : > { %606 = vmatprep.subr.bf16.mxu0 %v9290_v12  ;;  %669 = vmatprep.subr.bf16.mxu1 %v9297_v13  ;;  %v7950_v30 = vld [vmem:[%s9376_s29 + $0x4] ss:$8 sps:$4 sm:$0xff]   ;;  %v9406_v31 = vld [vmem:[%s13020_s1 + $0xe0] ss:$16 sps:$4 sm:$0xff]   ;;  %v9411_v32 = vld [vmem:[%s13020_s1 + $0xe8] ss:$16 sps:$4 sm:$0xff]  }
  0x21   : > { %v9416_v33 = vld [vmem:[%s13020_s1 + $0x104] ss:$16 sps:$4 sm:$0x3f]   ;;  %v9421_v34 = vld [vmem:[%s13020_s1 + $0x10c] ss:$16 sps:$4 sm:$0x3f]   ;;  %6810 = vmatprep.mubr.msk.bf16.mxu0 %vm577_vm0, %v7950_v30  ;;  %6814 = vmatprep.mubr.msk.bf16.mxu1 %vm577_vm0, %v7950_v30 }
  0x22   : > { %v7946_v35 = vld [vmem:[%s13020_s1 + $0x100] ss:$16 sps:$4 sm:$0x3f]   ;;  %v7947_v36 = vld [vmem:[%s13020_s1 + $0x108] ss:$16 sps:$4 sm:$0x3f]  }
  0x23   : > { %607 = vmatpush1.bf16.msra.mxu0 %v9303_v14  ;;  %670 = vmatpush1.bf16.msra.mxu1 %v9310_v15  ;;  %v9442_v37 = vsel %vm587_vm1, %v7946_v35, 0  ;;  %v9445_v38 = vsel %vm587_vm1, %v7947_v36, 0  ;;  %v7948_v39 = vld [vmem:[%s9376_s29] ss:$8 sps:$4 sm:$0xff]   ;;  %v7951_v40 = vld [vmem:[%s9376_s29 + $0x14] ss:$8 sps:$4 sm:$0xff]  }
  0x24   : > { %608 = vmatprep.subr.bf16.mxu0 %v9315_v16  ;;  %671 = vmatprep.subr.bf16.mxu1 %v9322_v17  ;;  %v7953_v41 = vld [vmem:[%s9376_s29 + $0x10] ss:$8 sps:$4 sm:$0xff]   ;;  %v7954_v42 = vld [vmem:[%s9376_s29 + $0x24] ss:$8 sps:$4 sm:$0xff]   ;;  %v7956_v43 = vld [vmem:[%s9376_s29 + $0x20] ss:$8 sps:$4 sm:$0xff]  }
  0x25   : > { %v7959_v44 = vld [vmem:[%s9376_s29 + $0x34] ss:$8 sps:$4 sm:$0xff]   ;;  %v7957_v45 = vld [vmem:[%s9376_s29 + $0x30] ss:$8 sps:$4 sm:$0xff]   ;;  %v7960_v46 = vld [vmem:[%s9376_s29 + $0x44] ss:$8 sps:$4 sm:$0xff]  }
  0x26   : > { %v7962_v47 = vld [vmem:[%s9376_s29 + $0x40] ss:$8 sps:$4 sm:$0xff]   ;;  %v7963_v48 = vld [vmem:[%s9376_s29 + $0x54] ss:$8 sps:$4 sm:$0xff]   ;;  %v7965_v49 = vld [vmem:[%s9376_s29 + $0x50] ss:$8 sps:$4 sm:$0xff]  }
  0x27   : > { %609 = vmatpush1.bf16.msra.mxu0 %v9328_v18  ;;  %672 = vmatpush1.bf16.msra.mxu1 %v9333_v19  ;;  %v7968_v50 = vld [vmem:[%s9376_s29 + $0x64] ss:$8 sps:$4 sm:$0xff]   ;;  %v7966_v51 = vld [vmem:[%s9376_s29 + $0x60] ss:$8 sps:$4 sm:$0xff]   ;;  %v7969_v52 = vld [vmem:[%s9376_s29 + $0x74] ss:$8 sps:$4 sm:$0xff]  }
  0x28   : > { %610 = vmatprep.subr.bf16.mxu0 %v9340_v20  ;;  %673 = vmatprep.subr.bf16.mxu1 %v9347_v21  ;;  %v7971_v53 = vld [vmem:[%s9376_s29 + $0x70] ss:$8 sps:$4 sm:$0xff]   ;;  %v7972_v54 = vld [vmem:[%s9376_s29 + $0x84] ss:$8 sps:$4 sm:$0xff]   ;;  %v7974_v55 = vld [vmem:[%s9376_s29 + $0x80] ss:$8 sps:$4 sm:$0xff]  }
  0x29   : > { %v7977_v56 = vld [vmem:[%s9376_s29 + $0x94] ss:$8 sps:$4 sm:$0xff]   ;;  %v7975_v59 = vld [vmem:[%s9376_s29 + $0x90] ss:$8 sps:$4 sm:$0xff]   ;;  %v7978_v60 = vld [vmem:[%s9376_s29 + $0xa4] ss:$8 sps:$4 sm:$0xff]  }
  0x2a   : > { %v7986_v57 = vld [vmem:[%s13022_s3 + $0x4] ss:$16 sps:$4 sm:$0xff]   ;;  %v7989_v58 = vld [vmem:[%s13022_s3 + $0xc] ss:$16 sps:$4 sm:$0xff]   ;;  %v7984_v61 = vld [vmem:[%s13022_s3] ss:$16 sps:$4 sm:$0xff]  }
  0x2b   : > { %611 = vmatpush1.bf16.msra.mxu0 %v9352_v22  ;;  %674 = vmatpush1.bf16.msra.mxu1 %v9359_v23  ;;  %v7987_v62 = vld [vmem:[%s13022_s3 + $0x8] ss:$16 sps:$4 sm:$0xff]   ;;  %v7992_v63 = vld [vmem:[%s13022_s3 + $0x24] ss:$16 sps:$4 sm:$0xff]   ;;  %v8043_v35 = vld [vmem:[%s13022_s3 + $0x12c] ss:$16 sps:$4 sm:$0xff]  }
  0x2c   : > { %612 = vmatprep.subr.bf16.mxu0 %v9364_v24  ;;  %675 = vmatprep.subr.bf16.mxu1 %v9371_v25  ;;  %v8034_v30 = vld [vmem:[%s13022_s3 + $0x104] ss:$16 sps:$4 sm:$0xff]   ;;  %v8038_v36 = vld [vmem:[%s13022_s3 + $0x120] ss:$16 sps:$4 sm:$0xff]   ;;  %s9120_s13 = smov [#allocation2]  }
  0x2d   : > { %s9060_s21 = sshll.u32 %s9120_s13, 4  ;;  %s9061_s21 = int_to_ptr.vmem [resolvable:$false] %s9060_s21 }
  0x2e   : > { %s9062_s26 = scalar_lea.vmem %s9061_s21, 256 }
  0x2f   : > { %613 = vmatpush1.bf16.msra.mxu0 %v9381_v26  ;;  %676 = vmatpush1.bf16.msra.mxu1 %v9386_v27 }
  0x30   : > { %614 = vmatprep.subr.bf16.mxu0 %v9393_v28  ;;  %677 = vmatprep.subr.bf16.mxu1 %v9400_v29 }
  0x33   : > { %615 = vmatpush1.bf16.msra.mxu0 %v9406_v31  ;;  %678 = vmatpush1.bf16.msra.mxu1 %v9411_v32 }
  0x34   : > { %6809 = vmatprep.subr.msk.bf16.mxu0 %vm587_vm1, %v9416_v33  ;;  %6813 = vmatprep.subr.msk.bf16.mxu1 %vm587_vm1, %v9421_v34 }
  0x37   : > { %617 = vmatpush1.bf16.msra.mxu0 %v9442_v37  ;;  %680 = vmatpush1.bf16.msra.mxu1 %v9445_v38 }
  0x38   : > { %781 = vmatprep.subr.bf16.mxu0 %v9222_v0  ;;  %844 = vmatprep.subr.bf16.mxu1 %v9227_v1 }
  0x3a   : > { %633 = vmatmul.mubr.bf16.vlgmr.msra.gmra.mrb[0].mxu0 %v7948_v39  ;;  %696 = vmatmul.mubr.bf16.vlgmr.msra.gmra.mrb[0].mxu1 %v7948_v39  ;;  %v8049_v39 = vld [vmem:[%s13022_s3 + $0x14c] ss:$16 sps:$4 sm:$0xff]  }
  0x3b   : > { %782 = vmatpush1.bf16.msra.mxu0 %v9233_v2  ;;  %845 = vmatpush1.bf16.msra.mxu1 %v9238_v3 }
  0x3c   : > { %783 = vmatprep.subr.bf16.mxu0 %v9244_v4  ;;  %846 = vmatprep.subr.bf16.mxu1 %v9251_v5 }
  0x3d   : > { %6811 = vmatprep.mubr.msk.bf16.mxu0 %vm577_vm0, %v7951_v40  ;;  %6815 = vmatprep.mubr.msk.bf16.mxu1 %vm577_vm0, %v7951_v40  ;;  %v8044_v40 = vld [vmem:[%s13022_s3 + $0x140] ss:$16 sps:$4 sm:$0xff]  }
  0x3f   : > { %784 = vmatpush1.bf16.msra.mxu0 %v9256_v6  ;;  %847 = vmatpush1.bf16.msra.mxu1 %v9262_v7 }
  0x40   : > { %785 = vmatprep.subr.bf16.mxu0 %v9268_v8  ;;  %848 = vmatprep.subr.bf16.mxu1 %v9273_v9 }
  0x42   : > { %643 = vmatmul.mubr.bf16.gmra.mrb[4].mxu0 %v7953_v41  ;;  %706 = vmatmul.mubr.bf16.gmra.mrb[4].mxu1 %v7953_v41  ;;  %v8047_v41 = vld [vmem:[%s13022_s3 + $0x148] ss:$16 sps:$4 sm:$0xff]  }
  0x43   : > { %786 = vmatpush1.bf16.msra.mxu0 %v9278_v10  ;;  %849 = vmatpush1.bf16.msra.mxu1 %v9283_v11 }
  0x44   : > { %787 = vmatprep.subr.bf16.mxu0 %v9290_v12  ;;  %850 = vmatprep.subr.bf16.mxu1 %v9297_v13 }
  0x45   : > { %6812 = vmatprep.mubr.msk.bf16.mxu0 %vm577_vm0, %v7954_v42  ;;  %6816 = vmatprep.mubr.msk.bf16.mxu1 %vm577_vm0, %v7954_v42  ;;  %v8052_v42 = vld [vmem:[%s13022_s3 + $0x164] ss:$16 sps:$4 sm:$0xff]  }
  0x47   : > { %788 = vmatpush1.bf16.msra.mxu0 %v9303_v14  ;;  %851 = vmatpush1.bf16.msra.mxu1 %v9310_v15 }
  0x48   : > { %789 = vmatprep.subr.bf16.mxu0 %v9315_v16  ;;  %852 = vmatprep.subr.bf16.mxu1 %v9322_v17 }
  0x4a   : > { %653 = vmatmul.mubr.bf16.gmra.mrb[8].mxu0 %v7956_v43  ;;  %716 = vmatmul.mubr.bf16.gmra.mrb[8].mxu1 %v7956_v43  ;;  %v8055_v43 = vld [vmem:[%s13022_s3 + $0x16c] ss:$16 sps:$4 sm:$0xff]  }
  0x4b   : > { %790 = vmatpush1.bf16.msra.mxu0 %v9328_v18  ;;  %853 = vmatpush1.bf16.msra.mxu1 %v9333_v19 }
  0x4c   : > { %791 = vmatprep.subr.bf16.mxu0 %v9340_v20  ;;  %854 = vmatprep.subr.bf16.mxu1 %v9347_v21 }
  0x4d   : > { %6830 = vmatprep.mubr.msk.bf16.mxu0 %vm577_vm0, %v7959_v44  ;;  %6834 = vmatprep.mubr.msk.bf16.mxu1 %vm577_vm0, %v7959_v44  ;;  %v8050_v44 = vld [vmem:[%s13022_s3 + $0x160] ss:$16 sps:$4 sm:$0xff]  }
  0x4f   : > { %792 = vmatpush1.bf16.msra.mxu0 %v9352_v22  ;;  %855 = vmatpush1.bf16.msra.mxu1 %v9359_v23 }
  0x50   : > { %793 = vmatprep.subr.bf16.mxu0 %v9364_v24  ;;  %856 = vmatprep.subr.bf16.mxu1 %v9371_v25 }
  0x53   : > { %794 = vmatpush1.bf16.msra.mxu0 %v9381_v26  ;;  %857 = vmatpush1.bf16.msra.mxu1 %v9386_v27 }
  0x54   : > { %795 = vmatprep.subr.bf16.mxu0 %v9393_v28  ;;  %858 = vmatprep.subr.bf16.mxu1 %v9400_v29 }
  0x57   : > { %796 = vmatpush1.bf16.msra.mxu0 %v9406_v31  ;;  %859 = vmatpush1.bf16.msra.mxu1 %v9411_v32 }
  0x58   : > { %6829 = vmatprep.subr.msk.bf16.mxu0 %vm587_vm1, %v9416_v33  ;;  %6833 = vmatprep.subr.msk.bf16.mxu1 %vm587_vm1, %v9421_v34 }
  0x5b   : > { %798 = vmatpush1.bf16.msra.mxu0 %v9442_v37  ;;  %861 = vmatpush1.bf16.msra.mxu1 %v9445_v38 }
  0x5c   : > { %1010 = vmatprep.subr.bf16.mxu0 %v9222_v0  ;;  %1073 = vmatprep.subr.bf16.mxu1 %v9227_v1 }
  0x5e   : > { %814 = vmatmul.mubr.bf16.vlgmr.msra.gmra.mrb[12].mxu0 %v7957_v45  ;;  %877 = vmatmul.mubr.bf16.vlgmr.msra.gmra.mrb[12].mxu1 %v7957_v45  ;;  %v8053_v45 = vld [vmem:[%s13022_s3 + $0x168] ss:$16 sps:$4 sm:$0xff]  }
  0x5f   : > { %1011 = vmatpush1.bf16.msra.mxu0 %v9233_v2  ;;  %1074 = vmatpush1.bf16.msra.mxu1 %v9238_v3 }
  0x60   : > { %1012 = vmatprep.subr.bf16.mxu0 %v9244_v4  ;;  %1075 = vmatprep.subr.bf16.mxu1 %v9251_v5 }
  0x61   : > { %6831 = vmatprep.mubr.msk.bf16.mxu0 %vm577_vm0, %v7960_v46  ;;  %6835 = vmatprep.mubr.msk.bf16.mxu1 %vm577_vm0, %v7960_v46  ;;  %v8058_v46 = vld [vmem:[%s13022_s3 + $0x184] ss:$16 sps:$4 sm:$0xff]  }
  0x63   : > { %1013 = vmatpush1.bf16.msra.mxu0 %v9256_v6  ;;  %1076 = vmatpush1.bf16.msra.mxu1 %v9262_v7 }
  0x64   : > { %1014 = vmatprep.subr.bf16.mxu0 %v9268_v8  ;;  %1077 = vmatprep.subr.bf16.mxu1 %v9273_v9 }
  0x66   : > { %824 = vmatmul.mubr.bf16.gmra.mrb[16].mxu0 %v7962_v47  ;;  %887 = vmatmul.mubr.bf16.gmra.mrb[16].mxu1 %v7962_v47  ;;  %v8061_v47 = vld [vmem:[%s13022_s3 + $0x18c] ss:$16 sps:$4 sm:$0xff]  }
  0x67   : > { %1015 = vmatpush1.bf16.msra.mxu0 %v9278_v10  ;;  %1078 = vmatpush1.bf16.msra.mxu1 %v9283_v11 }
  0x68   : > { %1016 = vmatprep.subr.bf16.mxu0 %v9290_v12  ;;  %1079 = vmatprep.subr.bf16.mxu1 %v9297_v13 }
  0x69   : > { %6832 = vmatprep.mubr.msk.bf16.mxu0 %vm577_vm0, %v7963_v48  ;;  %6836 = vmatprep.mubr.msk.bf16.mxu1 %vm577_vm0, %v7963_v48  ;;  %v8056_v48 = vld [vmem:[%s13022_s3 + $0x180] ss:$16 sps:$4 sm:$0xff]  }
  0x6b   : > { %1017 = vmatpush1.bf16.msra.mxu0 %v9303_v14  ;;  %1080 = vmatpush1.bf16.msra.mxu1 %v9310_v15 }
  0x6c   : > { %1018 = vmatprep.subr.bf16.mxu0 %v9315_v16  ;;  %1081 = vmatprep.subr.bf16.mxu1 %v9322_v17 }
  0x6e   : > { %834 = vmatmul.mubr.bf16.gmra.mrb[20].mxu0 %v7965_v49  ;;  %897 = vmatmul.mubr.bf16.gmra.mrb[20].mxu1 %v7965_v49  ;;  %v8059_v49 = vld [vmem:[%s13022_s3 + $0x188] ss:$16 sps:$4 sm:$0xff]  }
  0x6f   : > { %1019 = vmatpush1.bf16.msra.mxu0 %v9328_v18  ;;  %1082 = vmatpush1.bf16.msra.mxu1 %v9333_v19 }
  0x70   : > { %1020 = vmatprep.subr.bf16.mxu0 %v9340_v20  ;;  %1083 = vmatprep.subr.bf16.mxu1 %v9347_v21 }
  0x71   : > { %6850 = vmatprep.mubr.msk.bf16.mxu0 %vm577_vm0, %v7968_v50  ;;  %6854 = vmatprep.mubr.msk.bf16.mxu1 %vm577_vm0, %v7968_v50  ;;  %v8064_v50 = vld [vmem:[%s13022_s3 + $0x1a4] ss:$16 sps:$4 sm:$0xff]  }
  0x73   : > { %1021 = vmatpush1.bf16.msra.mxu0 %v9352_v22  ;;  %1084 = vmatpush1.bf16.msra.mxu1 %v9359_v23 }
  0x74   : > { %1022 = vmatprep.subr.bf16.mxu0 %v9364_v24  ;;  %1085 = vmatprep.subr.bf16.mxu1 %v9371_v25 }
  0x77   : > { %1023 = vmatpush1.bf16.msra.mxu0 %v9381_v26  ;;  %1086 = vmatpush1.bf16.msra.mxu1 %v9386_v27 }
  0x78   : > { %1024 = vmatprep.subr.bf16.mxu0 %v9393_v28  ;;  %1087 = vmatprep.subr.bf16.mxu1 %v9400_v29 }
  0x7b   : > { %1025 = vmatpush1.bf16.msra.mxu0 %v9406_v31  ;;  %1088 = vmatpush1.bf16.msra.mxu1 %v9411_v32 }
  0x7c   : > { %6849 = vmatprep.subr.msk.bf16.mxu0 %vm587_vm1, %v9416_v33  ;;  %6853 = vmatprep.subr.msk.bf16.mxu1 %vm587_vm1, %v9421_v34 }
  0x7f   : > { %1027 = vmatpush1.bf16.msra.mxu0 %v9442_v37  ;;  %1090 = vmatpush1.bf16.msra.mxu1 %v9445_v38 }
  0x80   : > { %1191 = vmatprep.subr.bf16.mxu0 %v9222_v0  ;;  %1254 = vmatprep.subr.bf16.mxu1 %v9227_v1  ;;  %v7995_v0 = vld [vmem:[%s13022_s3 + $0x2c] ss:$16 sps:$4 sm:$0xff]   ;;  %v7990_v1 = vld [vmem:[%s13022_s3 + $0x20] ss:$16 sps:$4 sm:$0xff]  }
  0x82   : > { %1043 = vmatmul.mubr.bf16.vlgmr.msra.gmra.mrb[24].mxu0 %v7966_v51  ;;  %1106 = vmatmul.mubr.bf16.vlgmr.msra.gmra.mrb[24].mxu1 %v7966_v51  ;;  %v8067_v51 = vld [vmem:[%s13022_s3 + $0x1ac] ss:$16 sps:$4 sm:$0xff]  }
  0x83   : > { %1192 = vmatpush1.bf16.msra.mxu0 %v9233_v2  ;;  %1255 = vmatpush1.bf16.msra.mxu1 %v9238_v3  ;;  %v7993_v2 = vld [vmem:[%s13022_s3 + $0x28] ss:$16 sps:$4 sm:$0xff]   ;;  %v7998_v3 = vld [vmem:[%s13022_s3 + $0x44] ss:$16 sps:$4 sm:$0xff]  }
  0x84   : > { %1193 = vmatprep.subr.bf16.mxu0 %v9244_v4  ;;  %1256 = vmatprep.subr.bf16.mxu1 %v9251_v5  ;;  %v8001_v4 = vld [vmem:[%s13022_s3 + $0x4c] ss:$16 sps:$4 sm:$0xff]   ;;  %v7980_v5 = vld [vmem:[%s9376_s29 + $0xa0] ss:$8 sps:$4 sm:$0xff]  }
  0x85   : > { %6851 = vmatprep.mubr.msk.bf16.mxu0 %vm577_vm0, %v7969_v52  ;;  %6855 = vmatprep.mubr.msk.bf16.mxu1 %vm577_vm0, %v7969_v52  ;;  %v8062_v52 = vld [vmem:[%s13022_s3 + $0x1a0] ss:$16 sps:$4 sm:$0xff]  }
  0x87   : > { %1194 = vmatpush1.bf16.msra.mxu0 %v9256_v6  ;;  %1257 = vmatpush1.bf16.msra.mxu1 %v9262_v7  ;;  %v7981_v6 = vld [vmem:[%s9376_s29 + $0xb4] ss:$8 sps:$4 sm:$0xff]   ;;  %v7996_v7 = vld [vmem:[%s13022_s3 + $0x40] ss:$16 sps:$4 sm:$0xff]  }
  0x88   : > { %1195 = vmatprep.subr.bf16.mxu0 %v9268_v8  ;;  %1258 = vmatprep.subr.bf16.mxu1 %v9273_v9  ;;  %v7999_v8 = vld [vmem:[%s13022_s3 + $0x48] ss:$16 sps:$4 sm:$0xff]   ;;  %v8004_v9 = vld [vmem:[%s13022_s3 + $0x64] ss:$16 sps:$4 sm:$0xff]  }
  0x8a   : > { %1053 = vmatmul.mubr.bf16.gmra.mrb[28].mxu0 %v7971_v53  ;;  %1116 = vmatmul.mubr.bf16.gmra.mrb[28].mxu1 %v7971_v53  ;;  %v8065_v53 = vld [vmem:[%s13022_s3 + $0x1a8] ss:$16 sps:$4 sm:$0xff]  }
  0x8b   : > { %1196 = vmatpush1.bf16.msra.mxu0 %v9278_v10  ;;  %1259 = vmatpush1.bf16.msra.mxu1 %v9283_v11  ;;  %v8007_v10 = vld [vmem:[%s13022_s3 + $0x6c] ss:$16 sps:$4 sm:$0xff]   ;;  %v8002_v11 = vld [vmem:[%s13022_s3 + $0x60] ss:$16 sps:$4 sm:$0xff]  }
  0x8c   : > { %1197 = vmatprep.subr.bf16.mxu0 %v9290_v12  ;;  %1260 = vmatprep.subr.bf16.mxu1 %v9297_v13  ;;  %v8005_v12 = vld [vmem:[%s13022_s3 + $0x68] ss:$16 sps:$4 sm:$0xff]   ;;  %v8010_v13 = vld [vmem:[%s13022_s3 + $0x84] ss:$16 sps:$4 sm:$0xff]  }
  0x8d   : > { %6852 = vmatprep.mubr.msk.bf16.mxu0 %vm577_vm0, %v7972_v54  ;;  %6856 = vmatprep.mubr.msk.bf16.mxu1 %vm577_vm0, %v7972_v54  ;;  %v8070_v54 = vld [vmem:[%s13022_s3 + $0x1c4] ss:$16 sps:$4 sm:$0xff]  }
  0x8f   : > { %1198 = vmatpush1.bf16.msra.mxu0 %v9303_v14  ;;  %1261 = vmatpush1.bf16.msra.mxu1 %v9310_v15  ;;  %v8013_v14 = vld [vmem:[%s13022_s3 + $0x8c] ss:$16 sps:$4 sm:$0xff]   ;;  %v7983_v15 = vld [vmem:[%s9376_s29 + $0xb0] ss:$8 sps:$4 sm:$0xff]   ;;  %s323_s29 = sand.u32 1, %s9110_s10  }
  0x90   : > { %1199 = vmatprep.subr.bf16.mxu0 %v9315_v16  ;;  %1262 = vmatprep.subr.bf16.mxu1 %v9322_v17  ;;  %v8008_v16 = vld [vmem:[%s13022_s3 + $0x80] ss:$16 sps:$4 sm:$0xff]   ;;  %v8011_v17 = vld [vmem:[%s13022_s3 + $0x88] ss:$16 sps:$4 sm:$0xff]   ;;  %s6765_s27 = sshll.u32 %s323_s29, 3  ;;  %s6689_s25 = scalar_lea.sflag [#allocation3], %s323_s29 }
  0x91   : > { %s325_s16 = scalar_lea.vmem [#allocation2], %s6765_s27 }
  0x92   : > { %1063 = vmatmul.mubr.bf16.gmra.mrb[32].mxu0 %v7974_v55  ;;  %1126 = vmatmul.mubr.bf16.gmra.mrb[32].mxu1 %v7974_v55  ;;  %v8073_v55 = vld [vmem:[%s13022_s3 + $0x1cc] ss:$16 sps:$4 sm:$0xff]   ;;  %s6702_s17 = sshll.u32 %s325_s16, 4  ;;  %s12979_s17 = int_to_ptr.vmem [resolvable:$true] %s6702_s17 }
  0x93   : > { %1200 = vmatpush1.bf16.msra.mxu0 %v9328_v18  ;;  %1263 = vmatpush1.bf16.msra.mxu1 %v9333_v19  ;;  %v8016_v18 = vld [vmem:[%s13022_s3 + $0xa4] ss:$16 sps:$4 sm:$0xff]   ;;  %v8019_v19 = vld [vmem:[%s13022_s3 + $0xac] ss:$16 sps:$4 sm:$0xff]   ;;  %s9056_s14 = scalar_lea.vmem %s12979_s17, 128  ;;  %p9063_p0 = scmp.lt.s32.totalorder %s12979_s17, %s9061_s21 }
  0x94   : > { %1201 = vmatprep.subr.bf16.mxu0 %v9340_v20  ;;  %1264 = vmatprep.subr.bf16.mxu1 %v9347_v21  ;;  %v8014_v20 = vld [vmem:[%s13022_s3 + $0xa0] ss:$16 sps:$4 sm:$0xff]   ;;  %v8017_v21 = vld [vmem:[%s13022_s3 + $0xa8] ss:$16 sps:$4 sm:$0xff]   ;;  %p9057_p11 = scmp.ne.s32.totalorder %s12979_s17, %s9056_s14  ;;  %p9064_p1 = scmp.lt.s32.totalorder %s9062_s26, %s9056_s14 }
  0x95   : > { %6870 = vmatprep.mubr.msk.bf16.mxu0 %vm577_vm0, %v7977_v56  ;;  %6874 = vmatprep.mubr.msk.bf16.mxu1 %vm577_vm0, %v7977_v56  ;;  %v8068_v56 = vld [vmem:[%s13022_s3 + $0x1c0] ss:$16 sps:$4 sm:$0xff]  }
  0x96   : > { %p9058_p12 = pnand %p9057_p11, %p9209_p5  ;;  %p9065_p2 = por %p9064_p1, %p9063_p0 }
  0x97   : > { %1202 = vmatpush1.bf16.msra.mxu0 %v9352_v22  ;;  %1265 = vmatpush1.bf16.msra.mxu1 %v9359_v23  ;;  %v8022_v22 = vld [vmem:[%s13022_s3 + $0xc4] ss:$16 sps:$4 sm:$0xff]   ;;  %v8025_v23 = vld [vmem:[%s13022_s3 + $0xcc] ss:$16 sps:$4 sm:$0xff]  }
  0x98   : > { %1203 = vmatprep.subr.bf16.mxu0 %v9364_v24  ;;  %1266 = vmatprep.subr.bf16.mxu1 %v9371_v25  ;;  %v8020_v24 = vld [vmem:[%s13022_s3 + $0xc0] ss:$16 sps:$4 sm:$0xff]   ;;  %v8023_v25 = vld [vmem:[%s13022_s3 + $0xc8] ss:$16 sps:$4 sm:$0xff]   ;;  %p9059_p13 = pneg %p9058_p12 }
  0x9a   : > { %p9066_p3 = pnand %p9065_p2, %p9059_p13 }
  0x9b   : > { %1204 = vmatpush1.bf16.msra.mxu0 %v9381_v26  ;;  %1267 = vmatpush1.bf16.msra.mxu1 %v9386_v27  ;;  %v8028_v26 = vld [vmem:[%s13022_s3 + $0xe4] ss:$16 sps:$4 sm:$0xff]   ;;  %v8031_v27 = vld [vmem:[%s13022_s3 + $0xec] ss:$16 sps:$4 sm:$0xff]  }
  0x9c   : > { %1205 = vmatprep.subr.bf16.mxu0 %v9393_v28  ;;  %1268 = vmatprep.subr.bf16.mxu1 %v9400_v29  ;;  %v8026_v28 = vld [vmem:[%s13022_s3 + $0xe0] ss:$16 sps:$4 sm:$0xff]   ;;  %v8029_v29 = vld [vmem:[%s13022_s3 + $0xe8] ss:$16 sps:$4 sm:$0xff]  }
  0x9f   : > { %1206 = vmatpush1.bf16.msra.mxu0 %v9406_v31  ;;  %1269 = vmatpush1.bf16.msra.mxu1 %v9411_v32  ;;  %v8037_v31 = vld [vmem:[%s13022_s3 + $0x10c] ss:$16 sps:$4 sm:$0xff]   ;;  %v8032_v32 = vld [vmem:[%s13022_s3 + $0x100] ss:$16 sps:$4 sm:$0xff]  }
  0xa0   : > { %6869 = vmatprep.subr.msk.bf16.mxu0 %vm587_vm1, %v9416_v33  ;;  %6873 = vmatprep.subr.msk.bf16.mxu1 %vm587_vm1, %v9421_v34  ;;  %v8035_v33 = vld [vmem:[%s13022_s3 + $0x108] ss:$16 sps:$4 sm:$0xff]   ;;  %v8040_v34 = vld [vmem:[%s13022_s3 + $0x124] ss:$16 sps:$4 sm:$0xff]  }
  0xa3   : > { %1208 = vmatpush1.bf16.msra.mxu0 %v9442_v37  ;;  %1271 = vmatpush1.bf16.msra.mxu1 %v9445_v38  ;;  %v8041_v37 = vld [vmem:[%s13022_s3 + $0x128] ss:$16 sps:$4 sm:$0xff]   ;;  %v8046_v38 = vld [vmem:[%s13022_s3 + $0x144] ss:$16 sps:$4 sm:$0xff]  }
  0xa4   : > { %3303 = vmatprep.subr.bf16.mxu0 %v7986_v57  ;;  %3568 = vmatprep.subr.bf16.mxu1 %v7989_v58  ;;  %v8071_v57 = vld [vmem:[%s13022_s3 + $0x1c8] ss:$16 sps:$4 sm:$0xff]   ;;  %v8076_v58 = vld [vmem:[%s13022_s3 + $0x1e4] ss:$16 sps:$4 sm:$0xff]  }
  0xa6   : > { %1224 = vmatmul.mubr.bf16.vlgmr.msra.gmra.mrb[36].mxu0 %v7975_v59  ;;  %1287 = vmatmul.mubr.bf16.vlgmr.msra.gmra.mrb[36].mxu1 %v7975_v59  ;;  %v8079_v59 = vld [vmem:[%s13022_s3 + $0x1ec] ss:$16 sps:$4 sm:$0xff]  }
  0xa7   : > { %6871 = vmatprep.mubr.msk.bf16.mxu0 %vm577_vm0, %v7978_v60  ;;  %6875 = vmatprep.mubr.msk.bf16.mxu1 %vm577_vm0, %v7978_v60  ;;  %v8074_v60 = vld [vmem:[%s13022_s3 + $0x1e0] ss:$16 sps:$4 sm:$0xff]  }
  0xa8   : > { %3304 = vmatpush1.bf16.msra.mxu0 %v7984_v61  ;;  %3569 = vmatpush1.bf16.msra.mxu1 %v7987_v62  ;;  %v8077_v61 = vld [vmem:[%s13022_s3 + $0x1e8] ss:$16 sps:$4 sm:$0xff]   ;;  %v8082_v62 = vld [vmem:[%s13022_s3 + $0x204] ss:$16 sps:$4 sm:$0xff]  }
  0xa9   : > { %3305 = vmatprep.subr.bf16.mxu0 %v7992_v63  ;;  %3570 = vmatprep.subr.bf16.mxu1 %v7995_v0  ;;  %v8085_v63 = vld [vmem:[%s13022_s3 + $0x20c] ss:$16 sps:$4 sm:$0xff]  }
  0xac   : > { %3306 = vmatpush1.bf16.msra.mxu0 %v7990_v1  ;;  %3571 = vmatpush1.bf16.msra.mxu1 %v7993_v2 }
  0xad   : > { %3307 = vmatprep.subr.bf16.mxu0 %v7998_v3  ;;  %3572 = vmatprep.subr.bf16.mxu1 %v8001_v4 }
  0xae   : > { %1234 = vmatmul.mubr.bf16.gmra.mrb[40].mxu0 %v7980_v5  ;;  %1297 = vmatmul.mubr.bf16.gmra.mrb[40].mxu1 %v7980_v5 }
  0xaf   : > { %6872 = vmatprep.mubr.msk.bf16.mxu0 %vm577_vm0, %v7981_v6  ;;  %6876 = vmatprep.mubr.msk.bf16.mxu1 %vm577_vm0, %v7981_v6 }
  0xb0   : > { %3308 = vmatpush1.bf16.msra.mxu0 %v7996_v7  ;;  %3573 = vmatpush1.bf16.msra.mxu1 %v7999_v8 }
  0xb1   : > { %3309 = vmatprep.subr.bf16.mxu0 %v8004_v9  ;;  %3574 = vmatprep.subr.bf16.mxu1 %v8007_v10 }
  0xb4   : > { %3310 = vmatpush1.bf16.msra.mxu0 %v8002_v11  ;;  %3575 = vmatpush1.bf16.msra.mxu1 %v8005_v12 }
  0xb5   : > { %3311 = vmatprep.subr.bf16.mxu0 %v8010_v13  ;;  %3576 = vmatprep.subr.bf16.mxu1 %v8013_v14 }
  0xb6   : > { %1244 = vmatmul.mubr.bf16.gmra.mrb[44].mxu0 %v7983_v15  ;;  %1307 = vmatmul.mubr.bf16.gmra.mrb[44].mxu1 %v7983_v15 }
  0xb8   : > { %3312 = vmatpush1.bf16.msra.mxu0 %v8008_v16  ;;  %3577 = vmatpush1.bf16.msra.mxu1 %v8011_v17 }
  0xb9   : > { %3313 = vmatprep.subr.bf16.mxu0 %v8016_v18  ;;  %3578 = vmatprep.subr.bf16.mxu1 %v8019_v19 }
  0xbc   : > { %3314 = vmatpush1.bf16.msra.mxu0 %v8014_v20  ;;  %3579 = vmatpush1.bf16.msra.mxu1 %v8017_v21 }
  0xbd   : > { %3315 = vmatprep.subr.bf16.mxu0 %v8022_v22  ;;  %3580 = vmatprep.subr.bf16.mxu1 %v8025_v23 }
  0xc0   : > { %3316 = vmatpush1.bf16.msra.mxu0 %v8020_v24  ;;  %3581 = vmatpush1.bf16.msra.mxu1 %v8023_v25 }
  0xc1   : > { %3317 = vmatprep.subr.bf16.mxu0 %v8028_v26  ;;  %3582 = vmatprep.subr.bf16.mxu1 %v8031_v27 }
  0xc4   : > { %3318 = vmatpush1.bf16.msra.mxu0 %v8026_v28  ;;  %3583 = vmatpush1.bf16.msra.mxu1 %v8029_v29 }
  0xc5   : > { %3319 = vmatprep.subr.bf16.mxu0 %v8034_v30  ;;  %3584 = vmatprep.subr.bf16.mxu1 %v8037_v31 }
  0xc8   : > { %3320 = vmatpush1.bf16.msra.mxu0 %v8032_v32  ;;  %3585 = vmatpush1.bf16.msra.mxu1 %v8035_v33 }
  0xc9   : > { %3321 = vmatprep.subr.bf16.mxu0 %v8040_v34  ;;  %3586 = vmatprep.subr.bf16.mxu1 %v8043_v35 }
  0xcc   : > { %3322 = vmatpush1.bf16.msra.mxu0 %v8038_v36  ;;  %3587 = vmatpush1.bf16.msra.mxu1 %v8041_v37  ;;  %v933_v36 = vlaneseq }
  0xcd   : > { %3323 = vmatprep.subr.bf16.mxu0 %v8046_v38  ;;  %3588 = vmatprep.subr.bf16.mxu1 %v8049_v39  ;;  %v931_v38 = vld [vmem:[%s13021_s2] sm:$0x3] }
  0xce   : > { %v9854_v37 = vshrl.u32 %v933_v36, 7 }
  0xd0   : > { %3324 = vmatpush1.bf16.msra.mxu0 %v8044_v40  ;;  %3589 = vmatpush1.bf16.msra.mxu1 %v8047_v41  ;;  %13144 = vst [vmem:[#allocation5_spill] sm:$0xff] %v9854_v37  ;;  %v9860_v39 = vsub.s32 0, %v9854_v37  ;;  %v9863_v40 = vsub.s32 1, %v9854_v37  ;;  %v10659_v37 = vld [vmem:[%s13022_s3 + $0x6a8] ss:$16 sps:$4 sm:$0xff]  }
  0xd1   : > { %3325 = vmatprep.subr.bf16.mxu0 %v8052_v42  ;;  %3590 = vmatprep.subr.bf16.mxu1 %v8055_v43  ;;  %13153 = vst [vmem:[#allocation12_spill] sm:$0xff] %v10659_v37 }
  0xd2   : > { %13145 = vst [vmem:[#allocation6_spill] sm:$0xff] %v9860_v39  ;;  %13146 = vst [vmem:[#allocation7_spill] sm:$0xff] %v9863_v40 }
  0xd4   : > { %3326 = vmatpush1.bf16.msra.mxu0 %v8050_v44  ;;  %3591 = vmatpush1.bf16.msra.mxu1 %v8053_v45  ;;  %v9866_v44 = vrot.slane %v931_v38, %v9860_v39  ;;  %v10670_v39 = vld [vmem:[%s13022_s3 + $0x6cc] ss:$16 sps:$4 sm:$0xff]  }
  0xd5   : > { %3327 = vmatprep.subr.bf16.mxu0 %v8058_v46  ;;  %3592 = vmatprep.subr.bf16.mxu1 %v8061_v47  ;;  %13155 = vst [vmem:[#allocation14_spill] sm:$0xff] %v10670_v39 }
  0xd8   : > { %3328 = vmatpush1.bf16.msra.mxu0 %v8056_v48  ;;  %3593 = vmatpush1.bf16.msra.mxu1 %v8059_v49  ;;  %v9869_v48 = vrot.slane %v931_v38, %v9863_v40  ;;  %v10664_v40 = vld [vmem:[%s13022_s3 + $0x6c4] ss:$16 sps:$4 sm:$0xff]  }
  0xd9   : > { %3329 = vmatprep.subr.bf16.mxu0 %v8064_v50  ;;  %3594 = vmatprep.subr.bf16.mxu1 %v8067_v51  ;;  %13154 = vst [vmem:[#allocation13_spill] sm:$0xff] %v10664_v40 }
  0xdc   : > { %3330 = vmatpush1.bf16.msra.mxu0 %v8062_v52  ;;  %3595 = vmatpush1.bf16.msra.mxu1 %v8065_v53 }
  0xdd   : > { %3331 = vmatprep.subr.bf16.mxu0 %v8070_v54  ;;  %3596 = vmatprep.subr.bf16.mxu1 %v8073_v55 }
  0xe0   : > { %3332 = vmatpush1.bf16.msra.mxu0 %v8068_v56  ;;  %3597 = vmatpush1.bf16.msra.mxu1 %v8071_v57 }
  0xe1   : > { %3333 = vmatprep.subr.bf16.mxu0 %v8076_v58  ;;  %3598 = vmatprep.subr.bf16.mxu1 %v8079_v59 }
  0xe4   : > { %3334 = vmatpush1.bf16.msra.mxu0 %v8074_v60  ;;  %3599 = vmatpush1.bf16.msra.mxu1 %v8077_v61 }
  0xe5   : > { %3356 = vmatprep.subr.bf16.mxu0 %v8082_v62  ;;  %3621 = vmatprep.subr.bf16.mxu1 %v8085_v63 }
 0x10d   : > { %v634_v0 = vpop.f32.mrb[0].mxu0  ;;  %v697_v1 = vpop.f32.mrb[0].mxu1 }
 0x10e   : > { %v726_v2 = vmax.f32 %v634_v0, %v697_v1  ;;  %v636_v3 = vpop.f32.mrb[1].mxu0  ;;  %v699_v4 = vpop.f32.mrb[1].mxu1 }
 0x10f   : > { %v727_v5 = vmax.f32 %v636_v3, %v699_v4  ;;  %v638_v6 = vpop.f32.mrb[2].mxu0  ;;  %v701_v7 = vpop.f32.mrb[2].mxu1 }
 0x110   : > { %v728_v8 = vmax.f32 %v638_v6, %v701_v7  ;;  %v640_v9 = vpop.f32.mrb[3].mxu0  ;;  %v703_v10 = vpop.f32.mrb[3].mxu1 }
 0x111   : > { %v729_v11 = vmax.f32 %v640_v9, %v703_v10 }
 0x115   : > { %v9806_v12 = vpop.f32.mrb[4].mxu0  ;;  %v9808_v13 = vpop.f32.mrb[4].mxu1 }
 0x116   : > { %v730_v14 = vmax.f32 %v9806_v12, %v9808_v13  ;;  %v9812_v15 = vpop.f32.mrb[5].mxu0  ;;  %v9814_v16 = vpop.f32.mrb[5].mxu1 }
 0x117   : > { %v731_v17 = vmax.f32 %v9812_v15, %v9814_v16  ;;  %v9818_v18 = vpop.f32.mrb[6].mxu0  ;;  %v9820_v19 = vpop.f32.mrb[6].mxu1  ;;  %v8088_v15 = vld [vmem:[%s13022_s3 + $0x224] ss:$16 sps:$4 sm:$0xff]   ;;  %v8091_v16 = vld [vmem:[%s13022_s3 + $0x22c] ss:$16 sps:$4 sm:$0xff]  }
 0x118   : > { %v732_v20 = vmax.f32 %v9818_v18, %v9820_v19  ;;  %v9824_v21 = vpop.f32.mrb[7].mxu0  ;;  %v9826_v22 = vpop.f32.mrb[7].mxu1  ;;  %v8086_v18 = vld [vmem:[%s13022_s3 + $0x220] ss:$16 sps:$4 sm:$0xff]   ;;  %v8089_v19 = vld [vmem:[%s13022_s3 + $0x228] ss:$16 sps:$4 sm:$0xff]  }
 0x119   : > { %v733_v23 = vmax.f32 %v9824_v21, %v9826_v22 }
 0x11d   : > { %v9830_v24 = vpop.f32.mrb[8].mxu0  ;;  %v9832_v25 = vpop.f32.mrb[8].mxu1 }
 0x11e   : > { %v734_v26 = vmax.f32 %v9830_v24, %v9832_v25  ;;  %v9836_v27 = vpop.f32.mrb[9].mxu0  ;;  %v9838_v28 = vpop.f32.mrb[9].mxu1  ;;  %v8100_v25 = vld [vmem:[%s13022_s3 + $0x264] ss:$16 sps:$4 sm:$0xff]  }
 0x11f   : > { %v735_v29 = vmax.f32 %v9836_v27, %v9838_v28  ;;  %v9842_v30 = vpop.f32.mrb[10].mxu0  ;;  %v9844_v31 = vpop.f32.mrb[10].mxu1 }
 0x120   : > { %v736_v32 = vmax.f32 %v9842_v30, %v9844_v31  ;;  %v9848_v33 = vpop.f32.mrb[11].mxu0  ;;  %v9850_v34 = vpop.f32.mrb[11].mxu1  ;;  %v8101_v30 = vld [vmem:[%s13022_s3 + $0x268] ss:$16 sps:$4 sm:$0xff]  }
 0x121   : > { %v737_v35 = vmax.f32 %v9848_v33, %v9850_v34 }
 0x131   : > { %v815_v41 = vpop.f32.mrb[12].mxu0  ;;  %v878_v42 = vpop.f32.mrb[12].mxu1 }
 0x132   : > { %v907_v43 = vmax.f32 %v815_v41, %v878_v42  ;;  %v817_v45 = vpop.f32.mrb[13].mxu0  ;;  %v880_v46 = vpop.f32.mrb[13].mxu1 }
 0x133   : > { %v908_v47 = vmax.f32 %v817_v45, %v880_v46  ;;  %v819_v49 = vpop.f32.mrb[14].mxu0  ;;  %v882_v50 = vpop.f32.mrb[14].mxu1  ;;  %v8080_v45 = vld [vmem:[%s13022_s3 + $0x200] ss:$16 sps:$4 sm:$0xff]   ;;  %v8083_v46 = vld [vmem:[%s13022_s3 + $0x208] ss:$16 sps:$4 sm:$0xff]  }
 0x134   : > { %v919_v51 = vmax.f32 %v726_v2, %v907_v43  ;;  %v909_v52 = vmax.f32 %v819_v49, %v882_v50  ;;  %v821_v53 = vpop.f32.mrb[15].mxu0  ;;  %v884_v54 = vpop.f32.mrb[15].mxu1 }
 0x135   : > { %v920_v55 = vmax.f32 %v727_v5, %v908_v47  ;;  %v910_v56 = vmax.f32 %v821_v53, %v884_v54 }
 0x136   : > { %v943_v57 = vadd.f32 %v9866_v44, %v919_v51  ;;  %v921_v58 = vmax.f32 %v728_v8, %v909_v52 }
 0x137   : > { %v944_v59 = vadd.f32 %v9869_v48, %v920_v55  ;;  %v922_v60 = vmax.f32 %v729_v11, %v910_v56 }
 0x138   : > { %v945_v61 = vadd.f32 %v9866_v44, %v921_v58  ;;  %v955_v1 = vmax.f32 %v943_v57, 0.0  ;;  %v8097_v58 = vld [vmem:[%s13022_s3 + $0x24c] ss:$16 sps:$4 sm:$0xff]  }
 0x139   : > { %v946_v62 = vadd.f32 %v9869_v48, %v922_v60  ;;  %v825_v63 = vpop.f32.mrb[16].mxu0  ;;  %v888_v0 = vpop.f32.mrb[16].mxu1  ;;  %v956_v7 = vmax.f32 %v944_v59, 0.0 }
 0x13a   : > { %v957_v3 = vmax.f32 %v945_v61, 0.0  ;;  %v911_v2 = vmax.f32 %v825_v63, %v888_v0  ;;  %v827_v4 = vpop.f32.mrb[17].mxu0  ;;  %v890_v6 = vpop.f32.mrb[17].mxu1  ;;  %v8092_v0 = vld [vmem:[%s13022_s3 + $0x240] ss:$16 sps:$4 sm:$0xff]  }
 0x13b   : > { %v958_v5 = vmax.f32 %v946_v62, 0.0  ;;  %v912_v9 = vmax.f32 %v827_v4, %v890_v6  ;;  %v829_v10 = vpop.f32.mrb[18].mxu0  ;;  %v892_v12 = vpop.f32.mrb[18].mxu1 }
 0x13c   : > { %v1365_v8 = vpack.c.bf16 %v957_v3, %v955_v1  ;;  %v923_v13 = vmax.f32 %v730_v14, %v911_v2  ;;  %v913_v36 = vmax.f32 %v829_v10, %v892_v12  ;;  %v831_v11 = vpop.f32.mrb[19].mxu0  ;;  %v894_v38 = vpop.f32.mrb[19].mxu1 }
 0x13d   : > { %v924_v41 = vmax.f32 %v731_v17, %v912_v9  ;;  %v914_v42 = vmax.f32 %v831_v11, %v894_v38  ;;  %v1366_v43 = vpack.c.bf16 %v958_v5, %v956_v7  ;;  %v8095_v7 = vld [vmem:[%s13022_s3 + $0x248] ss:$16 sps:$4 sm:$0xff]  }
 0x13e   : > { %v947_v47 = vadd.f32 %v9866_v44, %v923_v13  ;;  %v925_v14 = vmax.f32 %v732_v20, %v913_v36  ;;  %v8106_v13 = vld [vmem:[%s13022_s3 + $0x284] ss:$16 sps:$4 sm:$0xff]   ;;  %v8109_v36 = vld [vmem:[%s13022_s3 + $0x28c] ss:$16 sps:$4 sm:$0xff]  }
 0x13f   : > { %v948_v17 = vadd.f32 %v9869_v48, %v924_v41  ;;  %v926_v49 = vmax.f32 %v733_v23, %v914_v42  ;;  %3335 = vmatprep.mubr.bf16.mxu0 %v1366_v43  ;;  %3600 = vmatprep.mubr.bf16.mxu1 %v1366_v43  ;;  %v8094_v23 = vld [vmem:[%s13022_s3 + $0x244] ss:$16 sps:$4 sm:$0xff]   ;;  %v8104_v41 = vld [vmem:[%s13022_s3 + $0x280] ss:$16 sps:$4 sm:$0xff]   ;;  %v8107_v42 = vld [vmem:[%s13022_s3 + $0x288] ss:$16 sps:$4 sm:$0xff]  }
 0x140   : > { %v959_v20 = vmax.f32 %v947_v47, 0.0  ;;  %v949_v50 = vadd.f32 %v9866_v44, %v925_v14  ;;  %3336 = vmatmul.mubr.bf16.vlgmr.msra.gmra.mrb[48].mxu0 %v1365_v8  ;;  %3601 = vmatmul.mubr.bf16.vlgmr.msra.gmra.mrb[48].mxu1 %v1365_v8  ;;  %v8110_v14 = vld [vmem:[%s13022_s3 + $0x2a0] ss:$16 sps:$4 sm:$0xff]  }
 0x141   : > { %v960_v51 = vmax.f32 %v948_v17, 0.0  ;;  %v950_v52 = vadd.f32 %v9869_v48, %v926_v49  ;;  %v835_v21 = vpop.f32.mrb[20].mxu0  ;;  %v898_v22 = vpop.f32.mrb[20].mxu1  ;;  %3357 = vmatpush1.bf16.msra.mxu0 %v8080_v45  ;;  %3622 = vmatpush1.bf16.msra.mxu1 %v8083_v46  ;;  %v8112_v45 = vld [vmem:[%s13022_s3 + $0x2a4] ss:$16 sps:$4 sm:$0xff]  }
 0x142   : > { %v9909_v53 = vpack.c.bf16 %v959_v20, %v957_v3  ;;  %v961_v54 = vmax.f32 %v949_v50, 0.0  ;;  %v915_v55 = vmax.f32 %v835_v21, %v898_v22  ;;  %v837_v56 = vpop.f32.mrb[21].mxu0  ;;  %v900_v57 = vpop.f32.mrb[21].mxu1  ;;  %3358 = vmatprep.subr.bf16.mxu0 %v8088_v15  ;;  %3623 = vmatprep.subr.bf16.mxu1 %v8091_v16  ;;  %v8115_v46 = vld [vmem:[%s13022_s3 + $0x2ac] ss:$16 sps:$4 sm:$0xff]  }
 0x143   : > { %v9914_v59 = vpack.c.bf16 %v960_v51, %v958_v5  ;;  %v962_v60 = vmax.f32 %v950_v52, 0.0  ;;  %v916_v61 = vmax.f32 %v837_v56, %v900_v57  ;;  %v839_v62 = vpop.f32.mrb[22].mxu0  ;;  %v902_v63 = vpop.f32.mrb[22].mxu1  ;;  %v8113_v15 = vld [vmem:[%s13022_s3 + $0x2a8] ss:$16 sps:$4 sm:$0xff]  }
 0x144   : > { %v9919_v1 = vpack.c.bf16 %v961_v54, %v959_v20  ;;  %v927_v3 = vmax.f32 %v734_v26, %v915_v55  ;;  %v917_v2 = vmax.f32 %v839_v62, %v902_v63  ;;  %v841_v4 = vpop.f32.mrb[23].mxu0  ;;  %v904_v6 = vpop.f32.mrb[23].mxu1  ;;  %v8103_v26 = vld [vmem:[%s13022_s3 + $0x26c] ss:$16 sps:$4 sm:$0xff]   ;;  %v8118_v16 = vld [vmem:[%s13022_s3 + $0x2c4] ss:$16 sps:$4 sm:$0xff]  }
 0x145   : > { %v9927_v5 = vpack.c.bf16 %v962_v60, %v960_v51  ;;  %v928_v9 = vmax.f32 %v735_v29, %v916_v61  ;;  %v918_v10 = vmax.f32 %v841_v4, %v904_v6  ;;  %3359 = vmatpush1.bf16.msra.mxu0 %v8086_v18  ;;  %3624 = vmatpush1.bf16.msra.mxu1 %v8089_v19  ;;  %v8098_v29 = vld [vmem:[%s13022_s3 + $0x260] ss:$16 sps:$4 sm:$0xff]   ;;  %v8121_v17 = vld [vmem:[%s13022_s3 + $0x2cc] ss:$16 sps:$4 sm:$0xff]   ;;  %v8119_v18 = vld [vmem:[%s13022_s3 + $0x2c8] ss:$16 sps:$4 sm:$0xff]  }
 0x146   : > { %v951_v12 = vadd.f32 %v9866_v44, %v927_v3  ;;  %v929_v24 = vmax.f32 %v736_v32, %v917_v2  ;;  %3360 = vmatprep.subr.bf16.mxu0 %v8094_v23  ;;  %3625 = vmatprep.subr.bf16.mxu1 %v8097_v58  ;;  %v8116_v49 = vld [vmem:[%s13022_s3 + $0x2c0] ss:$16 sps:$4 sm:$0xff]   ;;  %v8124_v21 = vld [vmem:[%s13022_s3 + $0x2e4] ss:$16 sps:$4 sm:$0xff]   ;;  %v8127_v22 = vld [vmem:[%s13022_s3 + $0x2ec] ss:$16 sps:$4 sm:$0xff]  }
 0x147   : > { %v952_v27 = vadd.f32 %v9869_v48, %v928_v9  ;;  %v930_v28 = vmax.f32 %v737_v35, %v918_v10  ;;  %3345 = vmatprep.mubr.bf16.mxu0 %v9927_v5  ;;  %3610 = vmatprep.mubr.bf16.mxu1 %v9927_v5  ;;  %v8122_v56 = vld [vmem:[%s13022_s3 + $0x2e0] ss:$16 sps:$4 sm:$0xff]   ;;  %v8125_v57 = vld [vmem:[%s13022_s3 + $0x2e8] ss:$16 sps:$4 sm:$0xff]   ;;  %v8130_v63 = vld [vmem:[%s13022_s3 + $0x304] ss:$16 sps:$4 sm:$0xff]  }
 0x148   : > { %v963_v31 = vmax.f32 %v951_v12, 0.0  ;;  %v953_v32 = vadd.f32 %v9866_v44, %v929_v24  ;;  %3346 = vmatmul.mubr.bf16.gmra.mrb[52].mxu0 %v9919_v1  ;;  %3611 = vmatmul.mubr.bf16.gmra.mrb[52].mxu1 %v9919_v1  ;;  %v8128_v3 = vld [vmem:[%s13022_s3 + $0x300] ss:$16 sps:$4 sm:$0xff]   ;;  %v8131_v2 = vld [vmem:[%s13022_s3 + $0x308] ss:$16 sps:$4 sm:$0xff]  }
 0x149   : > { %v964_v33 = vmax.f32 %v952_v27, 0.0  ;;  %v954_v34 = vadd.f32 %v9869_v48, %v930_v28  ;;  %3361 = vmatpush1.bf16.msra.mxu0 %v8092_v0  ;;  %3626 = vmatpush1.bf16.msra.mxu1 %v8095_v7  ;;  %v8133_v0 = vld [vmem:[%s13022_s3 + $0x30c] ss:$16 sps:$4 sm:$0xff]   ;;  %v8136_v12 = vld [vmem:[%s13022_s3 + $0x324] ss:$16 sps:$4 sm:$0xff]  }
 0x14a   : > { %v9958_v35 = vpack.c.bf16 %v963_v31, %v961_v54  ;;  %v965_v8 = vmax.f32 %v953_v32, 0.0  ;;  %3362 = vmatprep.subr.bf16.mxu0 %v8100_v25  ;;  %3627 = vmatprep.subr.bf16.mxu1 %v8103_v26  ;;  %v8139_v24 = vld [vmem:[%s13022_s3 + $0x32c] ss:$16 sps:$4 sm:$0xff]   ;;  %v8134_v28 = vld [vmem:[%s13022_s3 + $0x320] ss:$16 sps:$4 sm:$0xff]  }
 0x14b   : > { %v9966_v11 = vpack.c.bf16 %v964_v33, %v962_v60  ;;  %v966_v38 = vmax.f32 %v954_v34, 0.0  ;;  %v8142_v34 = vld [vmem:[%s13022_s3 + $0x344] ss:$16 sps:$4 sm:$0xff]  }
 0x14c   : > { %v9974_v43 = vpack.c.bf16 %v965_v8, %v963_v31  ;;  %v8145_v8 = vld [vmem:[%s13022_s3 + $0x34c] ss:$16 sps:$4 sm:$0xff]  }
 0x14d   : > { %v9982_v47 = vpack.c.bf16 %v966_v38, %v964_v33  ;;  %3363 = vmatpush1.bf16.msra.mxu0 %v8098_v29  ;;  %3628 = vmatpush1.bf16.msra.mxu1 %v8101_v30  ;;  %v8137_v29 = vld [vmem:[%s13022_s3 + $0x328] ss:$16 sps:$4 sm:$0xff]  }
 0x14e   : > { %3364 = vmatprep.subr.bf16.mxu0 %v8106_v13  ;;  %3629 = vmatprep.subr.bf16.mxu1 %v8109_v36  ;;  %v8140_v13 = vld [vmem:[%s13022_s3 + $0x340] ss:$16 sps:$4 sm:$0xff]   ;;  %v8143_v36 = vld [vmem:[%s13022_s3 + $0x348] ss:$16 sps:$4 sm:$0xff]  }
 0x151   : > { %3365 = vmatpush1.bf16.msra.mxu0 %v8104_v41  ;;  %3630 = vmatpush1.bf16.msra.mxu1 %v8107_v42 }
 0x152   : > { %3366 = vmatprep.subr.bf16.mxu0 %v8112_v45  ;;  %3631 = vmatprep.subr.bf16.mxu1 %v8115_v46 }
 0x155   : > { %v10002_v19 = vpop.f32.mrb[24].mxu0  ;;  %v10004_v20 = vpop.f32.mrb[24].mxu1  ;;  %3367 = vmatpush1.bf16.msra.mxu0 %v8110_v14  ;;  %3632 = vmatpush1.bf16.msra.mxu1 %v8113_v15  ;;  %v8148_v14 = vld [vmem:[%s13022_s3 + $0x364] ss:$16 sps:$4 sm:$0xff]   ;;  %v8151_v15 = vld [vmem:[%s13022_s3 + $0x36c] ss:$16 sps:$4 sm:$0xff]  }
 0x156   : > { %v1136_v50 = vmax.f32 %v10002_v19, %v10004_v20  ;;  %v10008_v51 = vpop.f32.mrb[25].mxu0  ;;  %v10010_v52 = vpop.f32.mrb[25].mxu1  ;;  %3368 = vmatprep.subr.bf16.mxu0 %v8118_v16  ;;  %3633 = vmatprep.subr.bf16.mxu1 %v8121_v17 }
 0x157   : > { %v1137_v23 = vmax.f32 %v10008_v51, %v10010_v52  ;;  %v10020_v54 = vpop.f32.mrb[26].mxu0  ;;  %v10022_v55 = vpop.f32.mrb[26].mxu1 }
 0x158   : > { %v1138_v58 = vmax.f32 %v10020_v54, %v10022_v55  ;;  %v10032_v60 = vpop.f32.mrb[27].mxu0  ;;  %v10034_v61 = vpop.f32.mrb[27].mxu1 }
 0x159   : > { %v1139_v62 = vmax.f32 %v10032_v60, %v10034_v61  ;;  %3369 = vmatpush1.bf16.msra.mxu0 %v8116_v49  ;;  %3634 = vmatpush1.bf16.msra.mxu1 %v8119_v18 }
 0x15a   : > { %3370 = vmatprep.subr.bf16.mxu0 %v8124_v21  ;;  %3635 = vmatprep.subr.bf16.mxu1 %v8127_v22 }
 0x15d   : > { %3371 = vmatpush1.bf16.msra.mxu0 %v8122_v56  ;;  %3636 = vmatpush1.bf16.msra.mxu1 %v8125_v57  ;;  %v10050_v4 = vpop.f32.mrb[28].mxu0  ;;  %v10052_v6 = vpop.f32.mrb[28].mxu1  ;;  %v8146_v57 = vld [vmem:[%s13022_s3 + $0x360] ss:$16 sps:$4 sm:$0xff]  }
 0x15e   : > { %v1140_v7 = vmax.f32 %v10050_v4, %v10052_v6  ;;  %v10056_v9 = vpop.f32.mrb[29].mxu0  ;;  %v10058_v10 = vpop.f32.mrb[29].mxu1  ;;  %3372 = vmatprep.subr.bf16.mxu0 %v8130_v63  ;;  %3637 = vmatprep.subr.bf16.mxu1 %v8133_v0  ;;  %v8149_v63 = vld [vmem:[%s13022_s3 + $0x368] ss:$16 sps:$4 sm:$0xff]   ;;  %v8154_v0 = vld [vmem:[%s13022_s3 + $0x384] ss:$16 sps:$4 sm:$0xff]  }
 0x15f   : > { %v1141_v25 = vmax.f32 %v10056_v9, %v10058_v10  ;;  %v10068_v26 = vpop.f32.mrb[30].mxu0  ;;  %v10070_v27 = vpop.f32.mrb[30].mxu1  ;;  %v8187_v9 = vld [vmem:[%s13022_s3 + $0x42c] ss:$16 sps:$4 sm:$0xff]  }
 0x160   : > { %v1142_v30 = vmax.f32 %v10068_v26, %v10070_v27  ;;  %v10080_v31 = vpop.f32.mrb[31].mxu0  ;;  %v10082_v32 = vpop.f32.mrb[31].mxu1 }
 0x161   : > { %3373 = vmatpush1.bf16.msra.mxu0 %v8128_v3  ;;  %3638 = vmatpush1.bf16.msra.mxu1 %v8131_v2  ;;  %v1143_v33 = vmax.f32 %v10080_v31, %v10082_v32  ;;  %v8157_v3 = vld [vmem:[%s13022_s3 + $0x38c] ss:$16 sps:$4 sm:$0xff]   ;;  %v8152_v2 = vld [vmem:[%s13022_s3 + $0x380] ss:$16 sps:$4 sm:$0xff]   ;;  %v8185_v31 = vld [vmem:[%s13022_s3 + $0x428] ss:$16 sps:$4 sm:$0xff]  }
 0x162   : > { %3374 = vmatprep.subr.bf16.mxu0 %v8136_v12  ;;  %3639 = vmatprep.subr.bf16.mxu1 %v8139_v24  ;;  %v8155_v12 = vld [vmem:[%s13022_s3 + $0x388] ss:$16 sps:$4 sm:$0xff]   ;;  %v8160_v24 = vld [vmem:[%s13022_s3 + $0x3a4] ss:$16 sps:$4 sm:$0xff]  }
 0x165   : > { %3375 = vmatpush1.bf16.msra.mxu0 %v8134_v28  ;;  %3640 = vmatpush1.bf16.msra.mxu1 %v8137_v29  ;;  %v10098_v38 = vpop.f32.mrb[32].mxu0  ;;  %v10100_v41 = vpop.f32.mrb[32].mxu1  ;;  %v8163_v28 = vld [vmem:[%s13022_s3 + $0x3ac] ss:$16 sps:$4 sm:$0xff]   ;;  %v8158_v29 = vld [vmem:[%s13022_s3 + $0x3a0] ss:$16 sps:$4 sm:$0xff]  }
 0x166   : > { %v1144_v42 = vmax.f32 %v10098_v38, %v10100_v41  ;;  %v10104_v45 = vpop.f32.mrb[33].mxu0  ;;  %v10106_v46 = vpop.f32.mrb[33].mxu1  ;;  %3376 = vmatprep.subr.bf16.mxu0 %v8142_v34  ;;  %3641 = vmatprep.subr.bf16.mxu1 %v8145_v8  ;;  %v8161_v34 = vld [vmem:[%s13022_s3 + $0x3a8] ss:$16 sps:$4 sm:$0xff]   ;;  %v8166_v8 = vld [vmem:[%s13022_s3 + $0x3c4] ss:$16 sps:$4 sm:$0xff]  }
 0x167   : > { %v1145_v16 = vmax.f32 %v10104_v45, %v10106_v46  ;;  %v10116_v17 = vpop.f32.mrb[34].mxu0  ;;  %v10118_v49 = vpop.f32.mrb[34].mxu1  ;;  %v8191_v38 = vld [vmem:[%s13022_s3 + $0x448] ss:$16 sps:$4 sm:$0xff]  }
 0x168   : > { %v10122_v21 = vpop.f32.mrb[35].mxu0  ;;  %v10124_v22 = vpop.f32.mrb[35].mxu1 }
 0x169   : > { %3377 = vmatpush1.bf16.msra.mxu0 %v8140_v13  ;;  %3642 = vmatpush1.bf16.msra.mxu1 %v8143_v36  ;;  %v8169_v13 = vld [vmem:[%s13022_s3 + $0x3cc] ss:$16 sps:$4 sm:$0xff]   ;;  %v8164_v36 = vld [vmem:[%s13022_s3 + $0x3c0] ss:$16 sps:$4 sm:$0xff]   ;;  %v13148_v46 = vmax.f32 %v10122_v21, %v10124_v22 }
 0x16a   : > { %3378 = vmatprep.subr.bf16.mxu0 %v8148_v14  ;;  %3643 = vmatprep.subr.bf16.mxu1 %v8151_v15  ;;  %v8167_v14 = vld [vmem:[%s13022_s3 + $0x3c8] ss:$16 sps:$4 sm:$0xff]   ;;  %v8172_v15 = vld [vmem:[%s13022_s3 + $0x3e4] ss:$16 sps:$4 sm:$0xff]  }
 0x16d   : > { %3379 = vmatpush1.bf16.msra.mxu0 %v8146_v57  ;;  %3644 = vmatpush1.bf16.msra.mxu1 %v8149_v63  ;;  %v8175_v57 = vld [vmem:[%s13022_s3 + $0x3ec] ss:$16 sps:$4 sm:$0xff]  }
 0x16e   : > { %3380 = vmatprep.subr.bf16.mxu0 %v8154_v0  ;;  %3645 = vmatprep.subr.bf16.mxu1 %v8157_v3  ;;  %v8170_v3 = vld [vmem:[%s13022_s3 + $0x3e0] ss:$16 sps:$4 sm:$0xff]  }
 0x171   : > { %3381 = vmatpush1.bf16.msra.mxu0 %v8152_v2  ;;  %3646 = vmatpush1.bf16.msra.mxu1 %v8155_v12  ;;  %v8173_v2 = vld [vmem:[%s13022_s3 + $0x3e8] ss:$16 sps:$4 sm:$0xff]  }
 0x172   : > { %3382 = vmatprep.subr.bf16.mxu0 %v8160_v24  ;;  %3647 = vmatprep.subr.bf16.mxu1 %v8163_v28 }
 0x175   : > { %3383 = vmatpush1.bf16.msra.mxu0 %v8158_v29  ;;  %3648 = vmatpush1.bf16.msra.mxu1 %v8161_v34  ;;  %v8178_v29 = vld [vmem:[%s13022_s3 + $0x404] ss:$16 sps:$4 sm:$0xff]   ;;  %v8181_v34 = vld [vmem:[%s13022_s3 + $0x40c] ss:$16 sps:$4 sm:$0xff]  }
 0x176   : > { %3384 = vmatprep.subr.bf16.mxu0 %v8166_v8  ;;  %3649 = vmatprep.subr.bf16.mxu1 %v8169_v13 }
 0x179   : > { %v1225_v63 = vpop.f32.mrb[36].mxu0  ;;  %v1288_v0 = vpop.f32.mrb[36].mxu1  ;;  %3385 = vmatpush1.bf16.msra.mxu0 %v8164_v36  ;;  %3650 = vmatpush1.bf16.msra.mxu1 %v8167_v14 }
 0x17a   : > { %v1317_v12 = vmax.f32 %v1225_v63, %v1288_v0  ;;  %v1227_v24 = vpop.f32.mrb[37].mxu0  ;;  %v1290_v28 = vpop.f32.mrb[37].mxu1  ;;  %3386 = vmatprep.subr.bf16.mxu0 %v8172_v15  ;;  %3651 = vmatprep.subr.bf16.mxu1 %v8175_v57 }
 0x17b   : > { %v1318_v8 = vmax.f32 %v1227_v24, %v1290_v28  ;;  %v1229_v13 = vpop.f32.mrb[38].mxu0  ;;  %v1292_v36 = vpop.f32.mrb[38].mxu1 }
 0x17c   : > { %v1329_v14 = vmax.f32 %v1136_v50, %v1317_v12  ;;  %v1319_v63 = vmax.f32 %v1229_v13, %v1292_v36  ;;  %v1231_v0 = vpop.f32.mrb[39].mxu0  ;;  %v1294_v56 = vpop.f32.mrb[39].mxu1 }
 0x17d   : > { %v1330_v15 = vmax.f32 %v1137_v23, %v1318_v8  ;;  %v1320_v57 = vmax.f32 %v1231_v0, %v1294_v56  ;;  %3387 = vmatpush1.bf16.msra.mxu0 %v8170_v3  ;;  %3652 = vmatpush1.bf16.msra.mxu1 %v8173_v2  ;;  %v8179_v0 = vld [vmem:[%s13022_s3 + $0x408] ss:$16 sps:$4 sm:$0xff]  }
 0x17e   : > { %v1341_v18 = vadd.f32 %v1329_v14, %v9866_v44  ;;  %v1331_v24 = vmax.f32 %v1138_v58, %v1319_v63  ;;  %3409 = vmatprep.subr.bf16.mxu0 %v8178_v29  ;;  %3674 = vmatprep.subr.bf16.mxu1 %v8181_v34  ;;  %v8176_v63 = vld [vmem:[%s13022_s3 + $0x400] ss:$16 sps:$4 sm:$0xff]  }
 0x17f   : > { %v1342_v19 = vadd.f32 %v1330_v15, %v9869_v48  ;;  %v1332_v20 = vmax.f32 %v1139_v62, %v1320_v57 }
 0x180   : > { %v1343_v50 = vadd.f32 %v1331_v24, %v9866_v44  ;;  %v1353_v56 = vmax.f32 %v1341_v18, 0.0  ;;  %v8190_v24 = vld [vmem:[%s13022_s3 + $0x444] ss:$16 sps:$4 sm:$0xff]  }
 0x181   : > { %v1344_v51 = vadd.f32 %v1332_v20, %v9869_v48  ;;  %v1235_v52 = vpop.f32.mrb[40].mxu0  ;;  %v1298_v23 = vpop.f32.mrb[40].mxu1  ;;  %v1354_v55 = vmax.f32 %v1342_v19, 0.0 }
 0x182   : > { %v1355_v3 = vmax.f32 %v1343_v50, 0.0  ;;  %v1321_v2 = vmax.f32 %v1235_v52, %v1298_v23  ;;  %v1237_v12 = vpop.f32.mrb[41].mxu0  ;;  %v1300_v54 = vpop.f32.mrb[41].mxu1  ;;  %v8193_v23 = vld [vmem:[%s13022_s3 + $0x44c] ss:$16 sps:$4 sm:$0xff]  }
 0x183   : > { %v1356_v58 = vmax.f32 %v1344_v51, 0.0  ;;  %v1322_v28 = vmax.f32 %v1237_v12, %v1300_v54  ;;  %v1239_v29 = vpop.f32.mrb[42].mxu0  ;;  %v1302_v34 = vpop.f32.mrb[42].mxu1 }
 0x184   : > { %v10204_v8 = vpack.c.bf16 %v1355_v3, %v1353_v56  ;;  %v1333_v60 = vmax.f32 %v1140_v7, %v1321_v2  ;;  %v1323_v61 = vmax.f32 %v1239_v29, %v1302_v34  ;;  %v1241_v62 = vpop.f32.mrb[43].mxu0  ;;  %v1304_v13 = vpop.f32.mrb[43].mxu1  ;;  %v8184_v7 = vld [vmem:[%s13022_s3 + $0x424] ss:$16 sps:$4 sm:$0xff]  }
 0x185   : > { %v10209_v36 = vpack.c.bf16 %v1356_v58, %v1354_v55  ;;  %v1334_v18 = vmax.f32 %v1141_v25, %v1322_v28  ;;  %v1324_v14 = vmax.f32 %v1241_v62, %v1304_v13  ;;  %v8188_v13 = vld [vmem:[%s13022_s3 + $0x440] ss:$16 sps:$4 sm:$0xff]  }
 0x186   : > { %v1345_v4 = vadd.f32 %v1333_v60, %v9866_v44  ;;  %v1335_v6 = vmax.f32 %v1142_v30, %v1323_v61  ;;  %v8182_v30 = vld [vmem:[%s13022_s3 + $0x420] ss:$16 sps:$4 sm:$0xff]  }
 0x187   : > { %v1346_v10 = vadd.f32 %v1334_v18, %v9869_v48  ;;  %v1336_v25 = vmax.f32 %v1143_v33, %v1324_v14  ;;  %3388 = vmatprep.mubr.bf16.mxu0 %v10209_v36  ;;  %3653 = vmatprep.mubr.bf16.mxu1 %v10209_v36  ;;  %v8196_v14 = vld [vmem:[%s13022_s3 + $0x464] ss:$16 sps:$4 sm:$0xff]  }
 0x188   : > { %v1357_v26 = vmax.f32 %v1345_v4, 0.0  ;;  %v1347_v27 = vadd.f32 %v1335_v6, %v9866_v44  ;;  %3389 = vmatmul.mubr.bf16.vlgmr.msra.gmra.mrb[48].mxu0 %v10204_v8  ;;  %3654 = vmatmul.mubr.bf16.vlgmr.msra.gmra.mrb[48].mxu1 %v10204_v8  ;;  %v8197_v4 = vld [vmem:[%s13022_s3 + $0x468] ss:$16 sps:$4 sm:$0xff]  }
 0x189   : > { %v1358_v32 = vmax.f32 %v1346_v10, 0.0  ;;  %v1348_v33 = vadd.f32 %v1336_v25, %v9869_v48  ;;  %3410 = vmatpush1.bf16.msra.mxu0 %v8176_v63  ;;  %3675 = vmatpush1.bf16.msra.mxu1 %v8179_v0  ;;  %v1245_v15 = vpop.f32.mrb[44].mxu0  ;;  %v1308_v57 = vpop.f32.mrb[44].mxu1  ;;  %v8194_v0 = vld [vmem:[%s13022_s3 + $0x460] ss:$16 sps:$4 sm:$0xff]  }
 0x18a   : > { %v10249_v19 = vpack.c.bf16 %v1357_v26, %v1355_v3  ;;  %v1359_v20 = vmax.f32 %v1347_v27, 0.0  ;;  %v1325_v50 = vmax.f32 %v1245_v15, %v1308_v57  ;;  %v1247_v51 = vpop.f32.mrb[45].mxu0  ;;  %v1310_v52 = vpop.f32.mrb[45].mxu1  ;;  %3411 = vmatprep.subr.bf16.mxu0 %v8184_v7  ;;  %3676 = vmatprep.subr.bf16.mxu1 %v8187_v9  ;;  %v8205_v7 = vld [vmem:[%s13022_s3 + $0x48c] ss:$16 sps:$4 sm:$0xff]  }
 0x18b   : > { %v10254_v56 = vpack.c.bf16 %v1358_v32, %v1356_v58  ;;  %v1360_v2 = vmax.f32 %v1348_v33, 0.0  ;;  %v1326_v12 = vmax.f32 %v1247_v51, %v1310_v52  ;;  %v1249_v54 = vpop.f32.mrb[46].mxu0  ;;  %v1312_v55 = vpop.f32.mrb[46].mxu1  ;;  %v8203_v27 = vld [vmem:[%s13022_s3 + $0x488] ss:$16 sps:$4 sm:$0xff]  }
 0x18c   : > { %v10256_v28 = vpack.c.bf16 %v1359_v20, %v1357_v26  ;;  %v1337_v3 = vmax.f32 %v1144_v42, %v1325_v50  ;;  %v1327_v29 = vmax.f32 %v1249_v54, %v1312_v55  ;;  %v1251_v34 = vpop.f32.mrb[47].mxu0  ;;  %v1314_v60 = vpop.f32.mrb[47].mxu1  ;;  %v13147_v42 = vmax.f32 %v10116_v17, %v10118_v49  ;;  %v8199_v17 = vld [vmem:[%s13022_s3 + $0x46c] ss:$16 sps:$4 sm:$0xff]   ;;  %v8200_v26 = vld [vmem:[%s13022_s3 + $0x480] ss:$16 sps:$4 sm:$0xff]  }
 0x18d   : > { %v10261_v61 = vpack.c.bf16 %v1360_v2, %v1358_v32  ;;  %v1338_v58 = vmax.f32 %v1145_v16, %v1326_v12  ;;  %v1328_v62 = vmax.f32 %v1251_v34, %v1314_v60  ;;  %3412 = vmatpush1.bf16.msra.mxu0 %v8182_v30  ;;  %3677 = vmatpush1.bf16.msra.mxu1 %v8185_v31  ;;  %v8208_v31 = vld [vmem:[%s13022_s3 + $0x4a4] ss:$16 sps:$4 sm:$0xff]   ;;  %v8211_v32 = vld [vmem:[%s13022_s3 + $0x4ac] ss:$16 sps:$4 sm:$0xff]   ;;  %v8206_v33 = vld [vmem:[%s13022_s3 + $0x4a0] ss:$16 sps:$4 sm:$0xff]  }
 0x18e   : > { %v1349_v41 = vadd.f32 %v1337_v3, %v9866_v44  ;;  %v1339_v18 = vmax.f32 %v13147_v42, %v1327_v29  ;;  %3413 = vmatprep.subr.bf16.mxu0 %v8190_v24  ;;  %3678 = vmatprep.subr.bf16.mxu1 %v8193_v23  ;;  %v8209_v15 = vld [vmem:[%s13022_s3 + $0x4a8] ss:$16 sps:$4 sm:$0xff]   ;;  %v8214_v57 = vld [vmem:[%s13022_s3 + $0x4c4] ss:$16 sps:$4 sm:$0xff]   ;;  %v8217_v24 = vld [vmem:[%s13022_s3 + $0x4cc] ss:$16 sps:$4 sm:$0xff]  }
 0x18f   : > { %v1350_v45 = vadd.f32 %v1338_v58, %v9869_v48  ;;  %v1340_v16 = vmax.f32 %v13148_v46, %v1328_v62  ;;  %3398 = vmatprep.mubr.bf16.mxu0 %v10261_v61  ;;  %3663 = vmatprep.mubr.bf16.mxu1 %v10261_v61  ;;  %v8215_v50 = vld [vmem:[%s13022_s3 + $0x4c8] ss:$16 sps:$4 sm:$0xff]   ;;  %v8220_v51 = vld [vmem:[%s13022_s3 + $0x4e4] ss:$16 sps:$4 sm:$0xff]   ;;  %v8223_v52 = vld [vmem:[%s13022_s3 + $0x4ec] ss:$16 sps:$4 sm:$0xff]  }
 0x190   : > { %v1361_v49 = vmax.f32 %v1349_v41, 0.0  ;;  %v1351_v63 = vadd.f32 %v1339_v18, %v9866_v44  ;;  %3399 = vmatmul.mubr.bf16.gmra.mrb[52].mxu0 %v10256_v28  ;;  %3664 = vmatmul.mubr.bf16.gmra.mrb[52].mxu1 %v10256_v28  ;;  %v8218_v23 = vld [vmem:[%s13022_s3 + $0x4e0] ss:$16 sps:$4 sm:$0xff]   ;;  %v8226_v12 = vld [vmem:[%s13022_s3 + $0x504] ss:$16 sps:$4 sm:$0xff]  }
 0x191   : > { %v1362_v21 = vmax.f32 %v1350_v45, 0.0  ;;  %v1352_v22 = vadd.f32 %v1340_v16, %v9869_v48  ;;  %3414 = vmatpush1.bf16.msra.mxu0 %v8188_v13  ;;  %3679 = vmatpush1.bf16.msra.mxu1 %v8191_v38  ;;  %v8202_v48 = vld [vmem:[%s13022_s3 + $0x484] ss:$16 sps:$4 sm:$0xff]   ;;  %v8229_v54 = vld [vmem:[%s13022_s3 + $0x50c] ss:$16 sps:$4 sm:$0xff]  }
 0x192   : > { %v10298_v6 = vpack.c.bf16 %v1361_v49, %v1359_v20  ;;  %v1363_v44 = vmax.f32 %v1351_v63, 0.0  ;;  %3441 = vmatprep.mubr.bf16.mxu0 %v9914_v59  ;;  %3706 = vmatprep.mubr.bf16.mxu1 %v9914_v59  ;;  %v8212_v20 = vld [vmem:[%s13022_s3 + $0x4c0] ss:$16 sps:$4 sm:$0xff]   ;;  %v8227_v3 = vld [vmem:[%s13022_s3 + $0x508] ss:$16 sps:$4 sm:$0xff]  }
 0x193   : > { %v10308_v9 = vpack.c.bf16 %v1362_v21, %v1360_v2  ;;  %v1364_v10 = vmax.f32 %v1352_v22, 0.0  ;;  %3415 = vmatprep.subr.bf16.mxu0 %v8196_v14  ;;  %3680 = vmatprep.subr.bf16.mxu1 %v8199_v17  ;;  %v8221_v2 = vld [vmem:[%s13022_s3 + $0x4e8] ss:$16 sps:$4 sm:$0xff]   ;;  %v8224_v55 = vld [vmem:[%s13022_s3 + $0x500] ss:$16 sps:$4 sm:$0xff]  }
 0x194   : > { %v10310_v25 = vpack.c.bf16 %v1363_v44, %v1361_v49  ;;  %v8232_v29 = vld [vmem:[%s13022_s3 + $0x524] ss:$16 sps:$4 sm:$0xff]   ;;  %v8235_v34 = vld [vmem:[%s13022_s3 + $0x52c] ss:$16 sps:$4 sm:$0xff]   ;;  %v8230_v60 = vld [vmem:[%s13022_s3 + $0x520] ss:$16 sps:$4 sm:$0xff]  }
 0x195   : > { %3416 = vmatpush1.bf16.msra.mxu0 %v8194_v0  ;;  %3681 = vmatpush1.bf16.msra.mxu1 %v8197_v4  ;;  %v10318_v30 = vpack.c.bf16 %v1364_v10, %v1362_v21  ;;  %v8233_v58 = vld [vmem:[%s13022_s3 + $0x528] ss:$16 sps:$4 sm:$0xff]   ;;  %v8238_v62 = vld [vmem:[%s13022_s3 + $0x544] ss:$16 sps:$4 sm:$0xff]   ;;  %v8241_v13 = vld [vmem:[%s13022_s3 + $0x54c] ss:$16 sps:$4 sm:$0xff]  }
 0x196   : > { %13149 = vst [vmem:[#allocation8_spill] sm:$0xff] %v10310_v25  ;;  %3417 = vmatprep.subr.bf16.mxu0 %v8202_v48  ;;  %3682 = vmatprep.subr.bf16.mxu1 %v8205_v7  ;;  %v8236_v38 = vld [vmem:[%s13022_s3 + $0x540] ss:$16 sps:$4 sm:$0xff]   ;;  %v8239_v41 = vld [vmem:[%s13022_s3 + $0x548] ss:$16 sps:$4 sm:$0xff]  }
 0x197   : > { %13150 = vst [vmem:[#allocation9_spill] sm:$0xff] %v10318_v30  ;;  %v10395_v42 = vld [vmem:[%s13022_s3 + $0x564] ss:$16 sps:$4 sm:$0xff]   ;;  %v10400_v18 = vld [vmem:[%s13022_s3 + $0x56c] ss:$16 sps:$4 sm:$0xff]  }
 0x198   : > { %v10405_v45 = vld [vmem:[%s13022_s3 + $0x560] ss:$16 sps:$4 sm:$0xff]   ;;  %v10410_v46 = vld [vmem:[%s13022_s3 + $0x568] ss:$16 sps:$4 sm:$0xff]   ;;  %v10417_v16 = vld [vmem:[%s13022_s3 + $0x584] ss:$16 sps:$4 sm:$0xff]  }
 0x199   : > { %3418 = vmatpush1.bf16.msra.mxu0 %v8200_v26  ;;  %3683 = vmatpush1.bf16.msra.mxu1 %v8203_v27  ;;  %v10422_v14 = vld [vmem:[%s13022_s3 + $0x58c] ss:$16 sps:$4 sm:$0xff]   ;;  %v10429_v17 = vld [vmem:[%s13022_s3 + $0x580] ss:$16 sps:$4 sm:$0xff]   ;;  %v10434_v49 = vld [vmem:[%s13022_s3 + $0x588] ss:$16 sps:$4 sm:$0xff]  }
 0x19a   : > { %3419 = vmatprep.subr.bf16.mxu0 %v8208_v31  ;;  %3684 = vmatprep.subr.bf16.mxu1 %v8211_v32  ;;  %v10441_v63 = vld [vmem:[%s13022_s3 + $0x5a4] ss:$16 sps:$4 sm:$0xff]   ;;  %v10446_v21 = vld [vmem:[%s13022_s3 + $0x5ac] ss:$16 sps:$4 sm:$0xff]   ;;  %v10453_v22 = vld [vmem:[%s13022_s3 + $0x5a0] ss:$16 sps:$4 sm:$0xff]  }
 0x19b   : > { %v10458_v0 = vld [vmem:[%s13022_s3 + $0x5a8] ss:$16 sps:$4 sm:$0xff]   ;;  %v10465_v4 = vld [vmem:[%s13022_s3 + $0x5c4] ss:$16 sps:$4 sm:$0xff]   ;;  %v10470_v44 = vld [vmem:[%s13022_s3 + $0x5cc] ss:$16 sps:$4 sm:$0xff]  }
 0x19c   : > { %v10477_v48 = vld [vmem:[%s13022_s3 + $0x5c0] ss:$16 sps:$4 sm:$0xff]   ;;  %v10482_v7 = vld [vmem:[%s13022_s3 + $0x5c8] ss:$16 sps:$4 sm:$0xff]   ;;  %v10489_v10 = vld [vmem:[%s13022_s3 + $0x5e4] ss:$16 sps:$4 sm:$0xff]  }
 0x19d   : > { %3420 = vmatpush1.bf16.msra.mxu0 %v8206_v33  ;;  %3685 = vmatpush1.bf16.msra.mxu1 %v8209_v15  ;;  %v10494_v26 = vld [vmem:[%s13022_s3 + $0x5ec] ss:$16 sps:$4 sm:$0xff]   ;;  %v10501_v27 = vld [vmem:[%s13022_s3 + $0x5e0] ss:$16 sps:$4 sm:$0xff]   ;;  %v10506_v31 = vld [vmem:[%s13022_s3 + $0x5e8] ss:$16 sps:$4 sm:$0xff]  }
 0x19e   : > { %3421 = vmatprep.subr.bf16.mxu0 %v8214_v57  ;;  %3686 = vmatprep.subr.bf16.mxu1 %v8217_v24  ;;  %v10513_v32 = vld [vmem:[%s13022_s3 + $0x604] ss:$16 sps:$4 sm:$0xff]   ;;  %v10518_v33 = vld [vmem:[%s13022_s3 + $0x60c] ss:$16 sps:$4 sm:$0xff]   ;;  %v10525_v15 = vld [vmem:[%s13022_s3 + $0x600] ss:$16 sps:$4 sm:$0xff]  }
 0x19f   : > { %v10531_v57 = vld [vmem:[%s13022_s3 + $0x608] ss:$16 sps:$4 sm:$0xff]   ;;  %v10537_v24 = vld [vmem:[%s13022_s3 + $0x624] ss:$16 sps:$4 sm:$0xff]   ;;  %v10676_v25 = vld [vmem:[%s13022_s3 + $0x6c0] ss:$16 sps:$4 sm:$0xff]  }
 0x1a0   : > { %13156 = vst [vmem:[#allocation15_spill] sm:$0xff] %v10676_v25  ;;  %v10683_v30 = vld [vmem:[%s13022_s3 + $0x6c8] ss:$16 sps:$4 sm:$0xff]  }
 0x1a1   : > { %3422 = vmatpush1.bf16.msra.mxu0 %v8212_v20  ;;  %3687 = vmatpush1.bf16.msra.mxu1 %v8215_v50  ;;  %v10542_v20 = vld [vmem:[%s13022_s3 + $0x62c] ss:$16 sps:$4 sm:$0xff]   ;;  %v10551_v50 = vld [vmem:[%s13022_s3 + $0x620] ss:$16 sps:$4 sm:$0xff]   ;;  %13157 = vst [vmem:[#allocation16_spill] sm:$0xff] %v10683_v30 }
 0x1a2   : > { %3423 = vmatprep.subr.bf16.mxu0 %v8220_v51  ;;  %3688 = vmatprep.subr.bf16.mxu1 %v8223_v52  ;;  %v10558_v51 = vld [vmem:[%s13022_s3 + $0x628] ss:$16 sps:$4 sm:$0xff]   ;;  %v10563_v52 = vld [vmem:[%s13022_s3 + $0x644] ss:$16 sps:$4 sm:$0xff]  }
 0x1a5   : > { %3424 = vmatpush1.bf16.msra.mxu0 %v8218_v23  ;;  %3689 = vmatpush1.bf16.msra.mxu1 %v8221_v2  ;;  %v10570_v23 = vld [vmem:[%s13022_s3 + $0x64c] ss:$16 sps:$4 sm:$0xff]   ;;  %v10576_v2 = vld [vmem:[%s13022_s3 + $0x640] ss:$16 sps:$4 sm:$0xff]  }
 0x1a6   : > { %3425 = vmatprep.subr.bf16.mxu0 %v8226_v12  ;;  %3690 = vmatprep.subr.bf16.mxu1 %v8229_v54  ;;  %v10583_v12 = vld [vmem:[%s13022_s3 + $0x648] ss:$16 sps:$4 sm:$0xff]   ;;  %v10589_v54 = vld [vmem:[%s13022_s3 + $0x664] ss:$16 sps:$4 sm:$0xff]  }
 0x1a9   : > { %3426 = vmatpush1.bf16.msra.mxu0 %v8224_v55  ;;  %3691 = vmatpush1.bf16.msra.mxu1 %v8227_v3  ;;  %v10594_v55 = vld [vmem:[%s13022_s3 + $0x66c] ss:$16 sps:$4 sm:$0xff]   ;;  %v10603_v3 = vld [vmem:[%s13022_s3 + $0x660] ss:$16 sps:$4 sm:$0xff]  }
 0x1aa   : > { %3427 = vmatprep.subr.bf16.mxu0 %v8232_v29  ;;  %3692 = vmatprep.subr.bf16.mxu1 %v8235_v34  ;;  %v10610_v29 = vld [vmem:[%s13022_s3 + $0x668] ss:$16 sps:$4 sm:$0xff]   ;;  %v10615_v34 = vld [vmem:[%s13022_s3 + $0x684] ss:$16 sps:$4 sm:$0xff]  }
 0x1ad   : > { %3428 = vmatpush1.bf16.msra.mxu0 %v8230_v60  ;;  %3693 = vmatpush1.bf16.msra.mxu1 %v8233_v58  ;;  %v10622_v60 = vld [vmem:[%s13022_s3 + $0x68c] ss:$16 sps:$4 sm:$0xff]   ;;  %v10628_v58 = vld [vmem:[%s13022_s3 + $0x680] ss:$16 sps:$4 sm:$0xff]  }
 0x1ae   : > { %3429 = vmatprep.subr.bf16.mxu0 %v8238_v62  ;;  %3694 = vmatprep.subr.bf16.mxu1 %v8241_v13  ;;  %v10635_v62 = vld [vmem:[%s13022_s3 + $0x688] ss:$16 sps:$4 sm:$0xff]   ;;  %v10640_v13 = vld [vmem:[%s13022_s3 + $0x6a4] ss:$16 sps:$4 sm:$0xff]  }
 0x1b1   : > { %3430 = vmatpush1.bf16.msra.mxu0 %v8236_v38  ;;  %3695 = vmatpush1.bf16.msra.mxu1 %v8239_v41  ;;  %v10646_v38 = vld [vmem:[%s13022_s3 + $0x6ac] ss:$16 sps:$4 sm:$0xff]   ;;  %v10652_v41 = vld [vmem:[%s13022_s3 + $0x6a0] ss:$16 sps:$4 sm:$0xff]  }
 0x1b2   : > { %3431 = vmatprep.subr.bf16.mxu0 %v10395_v42  ;;  %3696 = vmatprep.subr.bf16.mxu1 %v10400_v18  ;;  %13151 = vst [vmem:[#allocation10_spill] sm:$0xff] %v10646_v38  ;;  %13152 = vst [vmem:[#allocation11_spill] sm:$0xff] %v10652_v41 }
 0x1b5   : > { %3432 = vmatpush1.bf16.msra.mxu0 %v10405_v45  ;;  %3697 = vmatpush1.bf16.msra.mxu1 %v10410_v46 }
 0x1b6   : > { %3433 = vmatprep.subr.bf16.mxu0 %v10417_v16  ;;  %3698 = vmatprep.subr.bf16.mxu1 %v10422_v14 }
 0x1b9   : > { %3434 = vmatpush1.bf16.msra.mxu0 %v10429_v17  ;;  %3699 = vmatpush1.bf16.msra.mxu1 %v10434_v49 }
 0x1ba   : > { %3435 = vmatprep.subr.bf16.mxu0 %v10441_v63  ;;  %3700 = vmatprep.subr.bf16.mxu1 %v10446_v21 }
 0x1bd   : > { %3436 = vmatpush1.bf16.msra.mxu0 %v10453_v22  ;;  %3701 = vmatpush1.bf16.msra.mxu1 %v10458_v0 }
 0x1be   : > { %3437 = vmatprep.subr.bf16.mxu0 %v10465_v4  ;;  %3702 = vmatprep.subr.bf16.mxu1 %v10470_v44 }
 0x1c1   : > { %3438 = vmatpush1.bf16.msra.mxu0 %v10477_v48  ;;  %3703 = vmatpush1.bf16.msra.mxu1 %v10482_v7 }
 0x1c2   : > { %3439 = vmatprep.subr.bf16.mxu0 %v10489_v10  ;;  %3704 = vmatprep.subr.bf16.mxu1 %v10494_v26 }
 0x1c5   : > { %3440 = vmatpush1.bf16.msra.mxu0 %v10501_v27  ;;  %3705 = vmatpush1.bf16.msra.mxu1 %v10506_v31 }
 0x1c6   : > { %3462 = vmatprep.subr.bf16.mxu0 %v10513_v32  ;;  %3727 = vmatprep.subr.bf16.mxu1 %v10518_v33 }
 0x1c8   : > { %3442 = vmatmul.mubr.bf16.vlgmr.msra.gmra.mrb[48].mxu0 %v9909_v53  ;;  %3707 = vmatmul.mubr.bf16.vlgmr.msra.gmra.mrb[48].mxu1 %v9909_v53 }
 0x1c9   : > { %3451 = vmatprep.mubr.bf16.mxu0 %v9966_v11  ;;  %3463 = vmatpush1.bf16.msra.mxu0 %v10525_v15 }
 0x1ca   : > { %3716 = vmatprep.mubr.bf16.mxu1 %v9966_v11  ;;  %3728 = vmatpush1.bf16.msra.mxu1 %v10531_v57 }
 0x1cb   : > { %3464 = vmatprep.subr.bf16.mxu0 %v10537_v24  ;;  %3729 = vmatprep.subr.bf16.mxu1 %v10542_v20 }
 0x1cd   : > { %3465 = vmatpush1.bf16.msra.mxu0 %v10551_v50 }
 0x1ce   : > { %3730 = vmatpush1.bf16.msra.mxu1 %v10558_v51  ;;  %3466 = vmatprep.subr.bf16.mxu0 %v10563_v52 }
 0x1cf   : > { %3731 = vmatprep.subr.bf16.mxu1 %v10570_v23 }
 0x1d0   : > { %3452 = vmatmul.mubr.bf16.gmra.mrb[52].mxu0 %v9958_v35  ;;  %3717 = vmatmul.mubr.bf16.gmra.mrb[52].mxu1 %v9958_v35 }
 0x1d1   : > { %3467 = vmatpush1.bf16.msra.mxu0 %v10576_v2  ;;  %3494 = vmatprep.mubr.bf16.mxu0 %v10254_v56 }
 0x1d2   : > { %3732 = vmatpush1.bf16.msra.mxu1 %v10583_v12  ;;  %3759 = vmatprep.mubr.bf16.mxu1 %v10254_v56 }
 0x1d3   : > { %3468 = vmatprep.subr.bf16.mxu0 %v10589_v54  ;;  %3733 = vmatprep.subr.bf16.mxu1 %v10594_v55 }
 0x1d5   : > { %3469 = vmatpush1.bf16.msra.mxu0 %v10603_v3 }
 0x1d6   : > { %3734 = vmatpush1.bf16.msra.mxu1 %v10610_v29  ;;  %3470 = vmatprep.subr.bf16.mxu0 %v10615_v34 }
 0x1d7   : > { %3735 = vmatprep.subr.bf16.mxu1 %v10622_v60 }
 0x1d9   : > { %3471 = vmatpush1.bf16.msra.mxu0 %v10628_v58 }
 0x1da   : > { %3736 = vmatpush1.bf16.msra.mxu1 %v10635_v62  ;;  %3472 = vmatprep.subr.bf16.mxu0 %v10640_v13 }
 0x1db   : > { %3737 = vmatprep.subr.bf16.mxu1 %v10646_v38  ;;  %v10688_v38 = vld [vmem:[%s13022_s3 + $0x6e4] ss:$16 sps:$4 sm:$0xff]  }
 0x1dc   : > { %13158 = vst [vmem:[#allocation17_spill] sm:$0xff] %v10688_v38 }
 0x1dd   : > { %3473 = vmatpush1.bf16.msra.mxu0 %v10652_v41  ;;  %v10694_v41 = vld [vmem:[%s13022_s3 + $0x6ec] ss:$16 sps:$4 sm:$0xff]  }
 0x1de   : > { %3738 = vmatpush1.bf16.msra.mxu1 %v10659_v37  ;;  %3474 = vmatprep.subr.bf16.mxu0 %v10664_v40  ;;  %13159 = vst [vmem:[#allocation18_spill] sm:$0xff] %v10694_v41  ;;  %v10700_v40 = vld [vmem:[%s13022_s3 + $0x6e0] ss:$16 sps:$4 sm:$0xff]   ;;  %v10712_v37 = vld [vmem:[%s13022_s3 + $0x704] ss:$16 sps:$4 sm:$0xff]  }
 0x1df   : > { %3739 = vmatprep.subr.bf16.mxu1 %v10670_v39  ;;  %13160 = vst [vmem:[#allocation19_spill] sm:$0xff] %v10700_v40  ;;  %v10707_v39 = vld [vmem:[%s13022_s3 + $0x6e8] ss:$16 sps:$4 sm:$0xff]   ;;  %13162 = vst [vmem:[#allocation21_spill] sm:$0xff] %v10712_v37 }
 0x1e0   : > { %13161 = vst [vmem:[#allocation20_spill] sm:$0xff] %v10707_v39 }
 0x1e1   : > { %3475 = vmatpush1.bf16.msra.mxu0 %v10676_v25  ;;  %v10718_v25 = vld [vmem:[%s13022_s3 + $0x70c] ss:$16 sps:$4 sm:$0xff]  }
 0x1e2   : > { %3740 = vmatpush1.bf16.msra.mxu1 %v10683_v30  ;;  %3476 = vmatprep.subr.bf16.mxu0 %v10688_v38  ;;  %13163 = vst [vmem:[#allocation22_spill] sm:$0xff] %v10718_v25  ;;  %v10724_v38 = vld [vmem:[%s13022_s3 + $0x700] ss:$16 sps:$4 sm:$0xff]   ;;  %v10736_v30 = vld [vmem:[%s13022_s3 + $0x724] ss:$16 sps:$4 sm:$0xff]  }
 0x1e3   : > { %3741 = vmatprep.subr.bf16.mxu1 %v10694_v41  ;;  %13164 = vst [vmem:[#allocation23_spill] sm:$0xff] %v10724_v38  ;;  %v10731_v41 = vld [vmem:[%s13022_s3 + $0x708] ss:$16 sps:$4 sm:$0xff]   ;;  %13166 = vst [vmem:[#allocation25_spill] sm:$0xff] %v10736_v30 }
 0x1e4   : > { %13165 = vst [vmem:[#allocation24_spill] sm:$0xff] %v10731_v41 }
 0x1e5   : > { %3477 = vmatpush1.bf16.msra.mxu0 %v10700_v40  ;;  %v10742_v40 = vld [vmem:[%s13022_s3 + $0x72c] ss:$16 sps:$4 sm:$0xff]  }
 0x1e6   : > { %3742 = vmatpush1.bf16.msra.mxu1 %v10707_v39  ;;  %3478 = vmatprep.subr.bf16.mxu0 %v10712_v37  ;;  %13167 = vst [vmem:[#allocation26_spill] sm:$0xff] %v10742_v40  ;;  %v10748_v37 = vld [vmem:[%s13022_s3 + $0x720] ss:$16 sps:$4 sm:$0xff]   ;;  %v10760_v39 = vld [vmem:[%s13022_s3 + $0x744] ss:$16 sps:$4 sm:$0xff]  }
 0x1e7   : > { %3743 = vmatprep.subr.bf16.mxu1 %v10718_v25  ;;  %13168 = vst [vmem:[#allocation27_spill] sm:$0xff] %v10748_v37  ;;  %v10755_v25 = vld [vmem:[%s13022_s3 + $0x728] ss:$16 sps:$4 sm:$0xff]   ;;  %13170 = vst [vmem:[#allocation29_spill] sm:$0xff] %v10760_v39 }
 0x1e8   : > { %13169 = vst [vmem:[#allocation28_spill] sm:$0xff] %v10755_v25 }
 0x1e9   : > { %3479 = vmatpush1.bf16.msra.mxu0 %v10724_v38  ;;  %v10766_v38 = vld [vmem:[%s13022_s3 + $0x74c] ss:$16 sps:$4 sm:$0xff]  }
 0x1ea   : > { %3744 = vmatpush1.bf16.msra.mxu1 %v10731_v41  ;;  %3480 = vmatprep.subr.bf16.mxu0 %v10736_v30  ;;  %13171 = vst [vmem:[#allocation30_spill] sm:$0xff] %v10766_v38  ;;  %v10772_v30 = vld [vmem:[%s13022_s3 + $0x740] ss:$16 sps:$4 sm:$0xff]   ;;  %v10784_v41 = vld [vmem:[%s13022_s3 + $0x764] ss:$16 sps:$4 sm:$0xff]  }
 0x1eb   : > { %3745 = vmatprep.subr.bf16.mxu1 %v10742_v40  ;;  %13172 = vst [vmem:[#allocation31_spill] sm:$0xff] %v10772_v30  ;;  %v10779_v40 = vld [vmem:[%s13022_s3 + $0x748] ss:$16 sps:$4 sm:$0xff]   ;;  %13174 = vst [vmem:[#allocation33_spill] sm:$0xff] %v10784_v41 }
 0x1ec   : > { %13173 = vst [vmem:[#allocation32_spill] sm:$0xff] %v10779_v40 }
 0x1ed   : > { %3481 = vmatpush1.bf16.msra.mxu0 %v10748_v37  ;;  %v10790_v37 = vld [vmem:[%s13022_s3 + $0x76c] ss:$16 sps:$4 sm:$0xff]  }
 0x1ee   : > { %3746 = vmatpush1.bf16.msra.mxu1 %v10755_v25  ;;  %3482 = vmatprep.subr.bf16.mxu0 %v10760_v39  ;;  %13175 = vst [vmem:[#allocation34_spill] sm:$0xff] %v10790_v37  ;;  %v10796_v39 = vld [vmem:[%s13022_s3 + $0x760] ss:$16 sps:$4 sm:$0xff]   ;;  %v10808_v25 = vld [vmem:[%s13022_s3 + $0x784] ss:$16 sps:$4 sm:$0xff]  }
 0x1ef   : > { %3747 = vmatprep.subr.bf16.mxu1 %v10766_v38  ;;  %13176 = vst [vmem:[#allocation35_spill] sm:$0xff] %v10796_v39  ;;  %v10803_v38 = vld [vmem:[%s13022_s3 + $0x768] ss:$16 sps:$4 sm:$0xff]   ;;  %13178 = vst [vmem:[#allocation37_spill] sm:$0xff] %v10808_v25 }
 0x1f0   : > { %13177 = vst [vmem:[#allocation36_spill] sm:$0xff] %v10803_v38 }
 0x1f1   : > { %3483 = vmatpush1.bf16.msra.mxu0 %v10772_v30  ;;  %v10814_v30 = vld [vmem:[%s13022_s3 + $0x78c] ss:$16 sps:$4 sm:$0xff]  }
 0x1f2   : > { %3748 = vmatpush1.bf16.msra.mxu1 %v10779_v40  ;;  %3484 = vmatprep.subr.bf16.mxu0 %v10784_v41  ;;  %13179 = vst [vmem:[#allocation38_spill] sm:$0xff] %v10814_v30  ;;  %v10820_v41 = vld [vmem:[%s13022_s3 + $0x780] ss:$16 sps:$4 sm:$0xff]   ;;  %v10832_v40 = vld [vmem:[%s13022_s3 + $0x7a4] ss:$16 sps:$4 sm:$0xff]  }
 0x1f3   : > { %3749 = vmatprep.subr.bf16.mxu1 %v10790_v37  ;;  %13180 = vst [vmem:[#allocation39_spill] sm:$0xff] %v10820_v41  ;;  %v10827_v37 = vld [vmem:[%s13022_s3 + $0x788] ss:$16 sps:$4 sm:$0xff]   ;;  %13182 = vst [vmem:[#allocation41_spill] sm:$0xff] %v10832_v40 }
 0x1f4   : > { %13181 = vst [vmem:[#allocation40_spill] sm:$0xff] %v10827_v37 }
 0x1f5   : > { %3485 = vmatpush1.bf16.msra.mxu0 %v10796_v39  ;;  %v10838_v39 = vld [vmem:[%s13022_s3 + $0x7ac] ss:$16 sps:$4 sm:$0xff]  }
 0x1f6   : > { %3750 = vmatpush1.bf16.msra.mxu1 %v10803_v38  ;;  %3486 = vmatprep.subr.bf16.mxu0 %v10808_v25  ;;  %13183 = vst [vmem:[#allocation42_spill] sm:$0xff] %v10838_v39  ;;  %v10844_v25 = vld [vmem:[%s13022_s3 + $0x7a0] ss:$16 sps:$4 sm:$0xff]   ;;  %v10856_v38 = vld [vmem:[%s13022_s3 + $0x7c4] ss:$16 sps:$4 sm:$0xff]  }
 0x1f7   : > { %3751 = vmatprep.subr.bf16.mxu1 %v10814_v30  ;;  %13184 = vst [vmem:[#allocation43_spill] sm:$0xff] %v10844_v25  ;;  %v10851_v30 = vld [vmem:[%s13022_s3 + $0x7a8] ss:$16 sps:$4 sm:$0xff]   ;;  %13186 = vst [vmem:[#allocation45_spill] sm:$0xff] %v10856_v38 }
 0x1f8   : > { %13185 = vst [vmem:[#allocation44_spill] sm:$0xff] %v10851_v30 }
 0x1f9   : > { %3487 = vmatpush1.bf16.msra.mxu0 %v10820_v41  ;;  %v10862_v41 = vld [vmem:[%s13022_s3 + $0x7cc] ss:$16 sps:$4 sm:$0xff]  }
 0x1fa   : > { %3752 = vmatpush1.bf16.msra.mxu1 %v10827_v37  ;;  %3488 = vmatprep.subr.bf16.mxu0 %v10832_v40  ;;  %13187 = vst [vmem:[#allocation46_spill] sm:$0xff] %v10862_v41  ;;  %v10868_v40 = vld [vmem:[%s13022_s3 + $0x7c0] ss:$16 sps:$4 sm:$0xff]   ;;  %v10880_v37 = vld [vmem:[%s13022_s3 + $0x7e4] ss:$16 sps:$4 sm:$0xff]  }
 0x1fb   : > { %3753 = vmatprep.subr.bf16.mxu1 %v10838_v39  ;;  %13188 = vst [vmem:[#allocation47_spill] sm:$0xff] %v10868_v40  ;;  %v10875_v39 = vld [vmem:[%s13022_s3 + $0x7c8] ss:$16 sps:$4 sm:$0xff]   ;;  %13190 = vst [vmem:[#allocation49_spill] sm:$0xff] %v10880_v37 }
 0x1fc   : > { %13189 = vst [vmem:[#allocation48_spill] sm:$0xff] %v10875_v39 }
 0x1fd   : > { %3489 = vmatpush1.bf16.msra.mxu0 %v10844_v25  ;;  %v10886_v25 = vld [vmem:[%s13022_s3 + $0x7ec] ss:$16 sps:$4 sm:$0xff]  }
 0x1fe   : > { %3754 = vmatpush1.bf16.msra.mxu1 %v10851_v30  ;;  %3490 = vmatprep.subr.bf16.mxu0 %v10856_v38  ;;  %13191 = vst [vmem:[#allocation50_spill] sm:$0xff] %v10886_v25  ;;  %v10892_v38 = vld [vmem:[%s13022_s3 + $0x7e0] ss:$16 sps:$4 sm:$0xff]   ;;  %v10904_v30 = vld [vmem:[%s13022_s3 + $0x804] ss:$16 sps:$4 sm:$0xff]  }
 0x1ff   : > { %3755 = vmatprep.subr.bf16.mxu1 %v10862_v41  ;;  %13192 = vst [vmem:[#allocation51_spill] sm:$0xff] %v10892_v38  ;;  %v10899_v41 = vld [vmem:[%s13022_s3 + $0x7e8] ss:$16 sps:$4 sm:$0xff]   ;;  %13194 = vst [vmem:[#allocation53_spill] sm:$0xff] %v10904_v30 }
 0x200   : > { %13193 = vst [vmem:[#allocation52_spill] sm:$0xff] %v10899_v41 }
 0x201   : > { %3491 = vmatpush1.bf16.msra.mxu0 %v10868_v40  ;;  %v10910_v40 = vld [vmem:[%s13022_s3 + $0x80c] ss:$16 sps:$4 sm:$0xff]  }
 0x202   : > { %3756 = vmatpush1.bf16.msra.mxu1 %v10875_v39  ;;  %3492 = vmatprep.subr.bf16.mxu0 %v10880_v37  ;;  %13195 = vst [vmem:[#allocation54_spill] sm:$0xff] %v10910_v40  ;;  %v10917_v37 = vld [vmem:[%s13022_s3 + $0x800] ss:$16 sps:$4 sm:$0xff]   ;;  %v10962_v39 = vld [vmem:[%s13022_s3 + $0x84c] ss:$16 sps:$4 sm:$0xff]  }
 0x203   : > { %3757 = vmatprep.subr.bf16.mxu1 %v10886_v25  ;;  %13196 = vst [vmem:[#allocation55_spill] sm:$0xff] %v10917_v37  ;;  %v10923_v25 = vld [vmem:[%s13022_s3 + $0x808] ss:$16 sps:$4 sm:$0xff]   ;;  %13203 = vst [vmem:[#allocation62_spill] sm:$0xff] %v10962_v39 }
 0x204   : > { %13197 = vst [vmem:[#allocation56_spill] sm:$0xff] %v10923_v25 }
 0x205   : > { %3493 = vmatpush1.bf16.msra.mxu0 %v10892_v38  ;;  %v10929_v38 = vld [vmem:[%s13022_s3 + $0x824] ss:$16 sps:$4 sm:$0xff]  }
 0x206   : > { %3758 = vmatpush1.bf16.msra.mxu1 %v10899_v41  ;;  %3515 = vmatprep.subr.bf16.mxu0 %v10904_v30  ;;  %13198 = vst [vmem:[#allocation57_spill] sm:$0xff] %v10929_v38  ;;  %v10935_v41 = vld [vmem:[%s13022_s3 + $0x82c] ss:$16 sps:$4 sm:$0xff]   ;;  %v10951_v30 = vld [vmem:[%s13022_s3 + $0x828] ss:$16 sps:$4 sm:$0xff]  }
 0x207   : > { %3780 = vmatprep.subr.bf16.mxu1 %v10910_v40  ;;  %13199 = vst [vmem:[#allocation58_spill] sm:$0xff] %v10935_v41  ;;  %v10944_v40 = vld [vmem:[%s13022_s3 + $0x820] ss:$16 sps:$4 sm:$0xff]   ;;  %13201 = vst [vmem:[#allocation60_spill] sm:$0xff] %v10951_v30 }
 0x208   : > { %3495 = vmatmul.mubr.bf16.vlgmr.msra.gmra.mrb[48].mxu0 %v10249_v19  ;;  %13200 = vst [vmem:[#allocation59_spill] sm:$0xff] %v10944_v40 }
 0x209   : > { %3760 = vmatmul.mubr.bf16.vlgmr.msra.gmra.mrb[48].mxu1 %v10249_v19  ;;  %3504 = vmatprep.mubr.bf16.mxu0 %v10308_v9 }
 0x20a   : > { %3516 = vmatpush1.bf16.msra.mxu0 %v10917_v37  ;;  %3769 = vmatprep.mubr.bf16.mxu1 %v10308_v9  ;;  %v10956_v37 = vld [vmem:[%s13022_s3 + $0x844] ss:$16 sps:$4 sm:$0xff]  }
 0x20b   : > { %3781 = vmatpush1.bf16.msra.mxu1 %v10923_v25  ;;  %3517 = vmatprep.subr.bf16.mxu0 %v10929_v38  ;;  %13202 = vst [vmem:[#allocation61_spill] sm:$0xff] %v10956_v37  ;;  %v10968_v38 = vld [vmem:[%s13022_s3 + $0x840] ss:$16 sps:$4 sm:$0xff]   ;;  %v10980_v25 = vld [vmem:[%s13022_s3 + $0x864] ss:$16 sps:$4 sm:$0xff]  }
 0x20c   : > { %3782 = vmatprep.subr.bf16.mxu1 %v10935_v41  ;;  %13204 = vst [vmem:[#allocation63_spill] sm:$0xff] %v10968_v38  ;;  %v10975_v41 = vld [vmem:[%s13022_s3 + $0x848] ss:$16 sps:$4 sm:$0xff]   ;;  %13206 = vst [vmem:[#allocation65_spill] sm:$0xff] %v10980_v25 }
 0x20d   : > { %13205 = vst [vmem:[#allocation64_spill] sm:$0xff] %v10975_v41 }
 0x20e   : > { %3518 = vmatpush1.bf16.msra.mxu0 %v10944_v40  ;;  %v11014_v40 = vld [vmem:[%s13022_s3 + $0x88c] ss:$16 sps:$4 sm:$0xff]  }
 0x20f   : > { %3783 = vmatpush1.bf16.msra.mxu1 %v10951_v30  ;;  %3519 = vmatprep.subr.bf16.mxu0 %v10956_v37  ;;  %v10987_v30 = vld [vmem:[%s13022_s3 + $0x86c] ss:$16 sps:$4 sm:$0xff]   ;;  %v10996_v37 = vld [vmem:[%s13022_s3 + $0x860] ss:$16 sps:$4 sm:$0xff]   ;;  %13211 = vst [vmem:[#allocation70_spill] sm:$0xff] %v11014_v40 }
 0x210   : > { %3505 = vmatmul.mubr.bf16.gmra.mrb[52].mxu0 %v10298_v6  ;;  %3784 = vmatprep.subr.bf16.mxu1 %v10962_v39  ;;  %13207 = vst [vmem:[#allocation66_spill] sm:$0xff] %v10987_v30  ;;  %13208 = vst [vmem:[#allocation67_spill] sm:$0xff] %v10996_v37  ;;  %v11003_v39 = vld [vmem:[%s13022_s3 + $0x868] ss:$16 sps:$4 sm:$0xff]  }
 0x211   : > { %3770 = vmatmul.mubr.bf16.gmra.mrb[52].mxu1 %v10298_v6  ;;  %3547 = vmatprep.mubr.bf16.mxu0 %v9927_v5  ;;  %13209 = vst [vmem:[#allocation68_spill] sm:$0xff] %v11003_v39 }
 0x212   : > { %3520 = vmatpush1.bf16.msra.mxu0 %v10968_v38  ;;  %3812 = vmatprep.mubr.bf16.mxu1 %v9927_v5  ;;  %v11008_v38 = vld [vmem:[%s13022_s3 + $0x884] ss:$16 sps:$4 sm:$0xff]  }
 0x213   : > { %3785 = vmatpush1.bf16.msra.mxu1 %v10975_v41  ;;  %3521 = vmatprep.subr.bf16.mxu0 %v10980_v25  ;;  %13210 = vst [vmem:[#allocation69_spill] sm:$0xff] %v11008_v38  ;;  %v11020_v25 = vld [vmem:[%s13022_s3 + $0x880] ss:$16 sps:$4 sm:$0xff]   ;;  %v11032_v41 = vld [vmem:[%s13022_s3 + $0x8a4] ss:$16 sps:$4 sm:$0xff]  }
 0x214   : > { %3786 = vmatprep.subr.bf16.mxu1 %v10987_v30  ;;  %13212 = vst [vmem:[#allocation71_spill] sm:$0xff] %v11020_v25  ;;  %v11027_v30 = vld [vmem:[%s13022_s3 + $0x888] ss:$16 sps:$4 sm:$0xff]   ;;  %13214 = vst [vmem:[#allocation73_spill] sm:$0xff] %v11032_v41 }
 0x215   : > { %13213 = vst [vmem:[#allocation72_spill] sm:$0xff] %v11027_v30 }
 0x216   : > { %3522 = vmatpush1.bf16.msra.mxu0 %v10996_v37  ;;  %v11038_v37 = vld [vmem:[%s13022_s3 + $0x8ac] ss:$16 sps:$4 sm:$0xff]  }
 0x217   : > { %3787 = vmatpush1.bf16.msra.mxu1 %v11003_v39  ;;  %3523 = vmatprep.subr.bf16.mxu0 %v11008_v38  ;;  %13215 = vst [vmem:[#allocation74_spill] sm:$0xff] %v11038_v37  ;;  %v11044_v38 = vld [vmem:[%s13022_s3 + $0x8a0] ss:$16 sps:$4 sm:$0xff]   ;;  %v11056_v39 = vld [vmem:[%s13022_s3 + $0x8c4] ss:$16 sps:$4 sm:$0xff]  }
 0x218   : > { %3788 = vmatprep.subr.bf16.mxu1 %v11014_v40  ;;  %13216 = vst [vmem:[#allocation75_spill] sm:$0xff] %v11044_v38  ;;  %v11051_v40 = vld [vmem:[%s13022_s3 + $0x8a8] ss:$16 sps:$4 sm:$0xff]   ;;  %13218 = vst [vmem:[#allocation77_spill] sm:$0xff] %v11056_v39 }
 0x219   : > { %13217 = vst [vmem:[#allocation76_spill] sm:$0xff] %v11051_v40 }
 0x21a   : > { %3524 = vmatpush1.bf16.msra.mxu0 %v11020_v25  ;;  %v11062_v25 = vld [vmem:[%s13022_s3 + $0x8cc] ss:$16 sps:$4 sm:$0xff]  }
 0x21b   : > { %3789 = vmatpush1.bf16.msra.mxu1 %v11027_v30  ;;  %3525 = vmatprep.subr.bf16.mxu0 %v11032_v41  ;;  %13219 = vst [vmem:[#allocation78_spill] sm:$0xff] %v11062_v25  ;;  %v11068_v41 = vld [vmem:[%s13022_s3 + $0x8c0] ss:$16 sps:$4 sm:$0xff]   ;;  %v11080_v30 = vld [vmem:[%s13022_s3 + $0x8e4] ss:$16 sps:$4 sm:$0xff]  }
 0x21c   : > { %3790 = vmatprep.subr.bf16.mxu1 %v11038_v37  ;;  %13220 = vst [vmem:[#allocation79_spill] sm:$0xff] %v11068_v41  ;;  %v11075_v37 = vld [vmem:[%s13022_s3 + $0x8c8] ss:$16 sps:$4 sm:$0xff]   ;;  %13222 = vst [vmem:[#allocation81_spill] sm:$0xff] %v11080_v30 }
 0x21d   : > { %13221 = vst [vmem:[#allocation80_spill] sm:$0xff] %v11075_v37 }
 0x21e   : > { %3526 = vmatpush1.bf16.msra.mxu0 %v11044_v38  ;;  %v11086_v38 = vld [vmem:[%s13022_s3 + $0x8ec] ss:$16 sps:$4 sm:$0xff]  }
 0x21f   : > { %3791 = vmatpush1.bf16.msra.mxu1 %v11051_v40  ;;  %3527 = vmatprep.subr.bf16.mxu0 %v11056_v39  ;;  %13223 = vst [vmem:[#allocation82_spill] sm:$0xff] %v11086_v38  ;;  %v11092_v39 = vld [vmem:[%s13022_s3 + $0x8e0] ss:$16 sps:$4 sm:$0xff]   ;;  %v11104_v40 = vld [vmem:[%s13022_s3 + $0x904] ss:$16 sps:$4 sm:$0xff]  }
 0x220   : > { %3792 = vmatprep.subr.bf16.mxu1 %v11062_v25  ;;  %13224 = vst [vmem:[#allocation83_spill] sm:$0xff] %v11092_v39  ;;  %v11099_v25 = vld [vmem:[%s13022_s3 + $0x8e8] ss:$16 sps:$4 sm:$0xff]   ;;  %13226 = vst [vmem:[#allocation85_spill] sm:$0xff] %v11104_v40 }
 0x221   : > { %13225 = vst [vmem:[#allocation84_spill] sm:$0xff] %v11099_v25 }
 0x222   : > { %3528 = vmatpush1.bf16.msra.mxu0 %v11068_v41  ;;  %v11110_v41 = vld [vmem:[%s13022_s3 + $0x90c] ss:$16 sps:$4 sm:$0xff]  }
 0x223   : > { %3793 = vmatpush1.bf16.msra.mxu1 %v11075_v37  ;;  %3529 = vmatprep.subr.bf16.mxu0 %v11080_v30  ;;  %13227 = vst [vmem:[#allocation86_spill] sm:$0xff] %v11110_v41  ;;  %v11116_v30 = vld [vmem:[%s13022_s3 + $0x900] ss:$16 sps:$4 sm:$0xff]   ;;  %v11128_v37 = vld [vmem:[%s13022_s3 + $0x924] ss:$16 sps:$4 sm:$0xff]  }
 0x224   : > { %3794 = vmatprep.subr.bf16.mxu1 %v11086_v38  ;;  %13228 = vst [vmem:[#allocation87_spill] sm:$0xff] %v11116_v30  ;;  %v11123_v38 = vld [vmem:[%s13022_s3 + $0x908] ss:$16 sps:$4 sm:$0xff]   ;;  %13230 = vst [vmem:[#allocation89_spill] sm:$0xff] %v11128_v37 }
 0x225   : > { %13229 = vst [vmem:[#allocation88_spill] sm:$0xff] %v11123_v38 }
 0x226   : > { %3530 = vmatpush1.bf16.msra.mxu0 %v11092_v39  ;;  %v11134_v39 = vld [vmem:[%s13022_s3 + $0x92c] ss:$16 sps:$4 sm:$0xff]  }
 0x227   : > { %3795 = vmatpush1.bf16.msra.mxu1 %v11099_v25  ;;  %3531 = vmatprep.subr.bf16.mxu0 %v11104_v40  ;;  %13231 = vst [vmem:[#allocation90_spill] sm:$0xff] %v11134_v39  ;;  %v11140_v40 = vld [vmem:[%s13022_s3 + $0x920] ss:$16 sps:$4 sm:$0xff]   ;;  %v11152_v25 = vld [vmem:[%s13022_s3 + $0x944] ss:$16 sps:$4 sm:$0xff]  }
 0x228   : > { %3796 = vmatprep.subr.bf16.mxu1 %v11110_v41  ;;  %13232 = vst [vmem:[#allocation91_spill] sm:$0xff] %v11140_v40  ;;  %v11147_v41 = vld [vmem:[%s13022_s3 + $0x928] ss:$16 sps:$4 sm:$0xff]   ;;  %13234 = vst [vmem:[#allocation93_spill] sm:$0xff] %v11152_v25 }
 0x229   : > { %13233 = vst [vmem:[#allocation92_spill] sm:$0xff] %v11147_v41 }
 0x22a   : > { %3532 = vmatpush1.bf16.msra.mxu0 %v11116_v30  ;;  %v11158_v30 = vld [vmem:[%s13022_s3 + $0x94c] ss:$16 sps:$4 sm:$0xff]  }
 0x22b   : > { %3797 = vmatpush1.bf16.msra.mxu1 %v11123_v38  ;;  %3533 = vmatprep.subr.bf16.mxu0 %v11128_v37  ;;  %13235 = vst [vmem:[#allocation94_spill] sm:$0xff] %v11158_v30  ;;  %v11164_v37 = vld [vmem:[%s13022_s3 + $0x940] ss:$16 sps:$4 sm:$0xff]   ;;  %v11176_v38 = vld [vmem:[%s13022_s3 + $0x964] ss:$16 sps:$4 sm:$0xff]  }
 0x22c   : > { %3798 = vmatprep.subr.bf16.mxu1 %v11134_v39  ;;  %13236 = vst [vmem:[#allocation95_spill] sm:$0xff] %v11164_v37  ;;  %v11171_v39 = vld [vmem:[%s13022_s3 + $0x948] ss:$16 sps:$4 sm:$0xff]   ;;  %13238 = vst [vmem:[#allocation97_spill] sm:$0xff] %v11176_v38 }
 0x22d   : > { %13237 = vst [vmem:[#allocation96_spill] sm:$0xff] %v11171_v39 }
 0x22e   : > { %3534 = vmatpush1.bf16.msra.mxu0 %v11140_v40  ;;  %v11182_v40 = vld [vmem:[%s13022_s3 + $0x96c] ss:$16 sps:$4 sm:$0xff]  }
 0x22f   : > { %3799 = vmatpush1.bf16.msra.mxu1 %v11147_v41  ;;  %3535 = vmatprep.subr.bf16.mxu0 %v11152_v25  ;;  %13239 = vst [vmem:[#allocation98_spill] sm:$0xff] %v11182_v40  ;;  %v11188_v25 = vld [vmem:[%s13022_s3 + $0x960] ss:$16 sps:$4 sm:$0xff]   ;;  %v11200_v41 = vld [vmem:[%s13022_s3 + $0x984] ss:$16 sps:$4 sm:$0xff]  }
 0x230   : > { %3800 = vmatprep.subr.bf16.mxu1 %v11158_v30  ;;  %13240 = vst [vmem:[#allocation99_spill] sm:$0xff] %v11188_v25  ;;  %v11195_v30 = vld [vmem:[%s13022_s3 + $0x968] ss:$16 sps:$4 sm:$0xff]   ;;  %13242 = vst [vmem:[#allocation101_spill] sm:$0xff] %v11200_v41 }
 0x231   : > { %13241 = vst [vmem:[#allocation100_spill] sm:$0xff] %v11195_v30 }
 0x232   : > { %3536 = vmatpush1.bf16.msra.mxu0 %v11164_v37  ;;  %v11206_v37 = vld [vmem:[%s13022_s3 + $0x98c] ss:$16 sps:$4 sm:$0xff]  }
 0x233   : > { %3801 = vmatpush1.bf16.msra.mxu1 %v11171_v39  ;;  %3537 = vmatprep.subr.bf16.mxu0 %v11176_v38  ;;  %13243 = vst [vmem:[#allocation102_spill] sm:$0xff] %v11206_v37  ;;  %v11212_v38 = vld [vmem:[%s13022_s3 + $0x980] ss:$16 sps:$4 sm:$0xff]   ;;  %v11224_v39 = vld [vmem:[%s13022_s3 + $0x9a4] ss:$16 sps:$4 sm:$0xff]  }
 0x234   : > { %3802 = vmatprep.subr.bf16.mxu1 %v11182_v40  ;;  %13244 = vst [vmem:[#allocation103_spill] sm:$0xff] %v11212_v38  ;;  %v11219_v40 = vld [vmem:[%s13022_s3 + $0x988] ss:$16 sps:$4 sm:$0xff]   ;;  %13246 = vst [vmem:[#allocation105_spill] sm:$0xff] %v11224_v39 }
 0x235   : > { %13245 = vst [vmem:[#allocation104_spill] sm:$0xff] %v11219_v40 }
 0x236   : > { %3538 = vmatpush1.bf16.msra.mxu0 %v11188_v25  ;;  %v11230_v25 = vld [vmem:[%s13022_s3 + $0x9ac] ss:$16 sps:$4 sm:$0xff]  }
 0x237   : > { %3803 = vmatpush1.bf16.msra.mxu1 %v11195_v30  ;;  %3539 = vmatprep.subr.bf16.mxu0 %v11200_v41  ;;  %13247 = vst [vmem:[#allocation106_spill] sm:$0xff] %v11230_v25  ;;  %v11236_v41 = vld [vmem:[%s13022_s3 + $0x9a0] ss:$16 sps:$4 sm:$0xff]   ;;  %v11248_v30 = vld [vmem:[%s13022_s3 + $0x9c4] ss:$16 sps:$4 sm:$0xff]  }
 0x238   : > { %3804 = vmatprep.subr.bf16.mxu1 %v11206_v37  ;;  %13248 = vst [vmem:[#allocation107_spill] sm:$0xff] %v11236_v41  ;;  %v11243_v37 = vld [vmem:[%s13022_s3 + $0x9a8] ss:$16 sps:$4 sm:$0xff]   ;;  %13249 = vst [vmem:[#allocation108_spill] sm:$0xff] %v11248_v30 }
 0x23a   : > { %3540 = vmatpush1.bf16.msra.mxu0 %v11212_v38  ;;  %v11254_v38 = vld [vmem:[%s13022_s3 + $0x9cc] ss:$16 sps:$4 sm:$0xff]  }
 0x23b   : > { %3805 = vmatpush1.bf16.msra.mxu1 %v11219_v40  ;;  %3541 = vmatprep.subr.bf16.mxu0 %v11224_v39  ;;  %13250 = vst [vmem:[#allocation109_spill] sm:$0xff] %v11254_v38  ;;  %v11260_v39 = vld [vmem:[%s13022_s3 + $0x9c0] ss:$16 sps:$4 sm:$0xff]   ;;  %v11272_v40 = vld [vmem:[%s13022_s3 + $0x9e4] ss:$16 sps:$4 sm:$0xff]  }
 0x23c   : > { %3806 = vmatprep.subr.bf16.mxu1 %v11230_v25  ;;  %13251 = vst [vmem:[#allocation110_spill] sm:$0xff] %v11260_v39  ;;  %v11267_v25 = vld [vmem:[%s13022_s3 + $0x9c8] ss:$16 sps:$4 sm:$0xff]   ;;  %13252 = vst [vmem:[#allocation111_spill] sm:$0xff] %v11272_v40 }
 0x23e   : > { %3542 = vmatpush1.bf16.msra.mxu0 %v11236_v41  ;;  %v11278_v41 = vld [vmem:[%s13022_s3 + $0x9ec] ss:$16 sps:$4 sm:$0xff]  }
 0x23f   : > { %3807 = vmatpush1.bf16.msra.mxu1 %v11243_v37  ;;  %3543 = vmatprep.subr.bf16.mxu0 %v11248_v30  ;;  %13253 = vst [vmem:[#allocation112_spill] sm:$0xff] %v11278_v41  ;;  %v11284_v30 = vld [vmem:[%s13022_s3 + $0x9e0] ss:$16 sps:$4 sm:$0xff]  }
 0x240   : > { %3808 = vmatprep.subr.bf16.mxu1 %v11254_v38  ;;  %13254 = vst [vmem:[#allocation113_spill] sm:$0xff] %v11284_v30  ;;  %v11291_v38 = vld [vmem:[%s13022_s3 + $0x9e8] ss:$16 sps:$4 sm:$0xff]  }
 0x241   : > { %13255 = vst [vmem:[#allocation114_spill] sm:$0xff] %v11291_v38 }
 0x242   : > { %3544 = vmatpush1.bf16.msra.mxu0 %v11260_v39  ;;  %v8884_v39 = vld [vmem:[%s13022_s3 + $0x4] ss:$16 sps:$4 sm:$0xff]  }
 0x243   : > { %3809 = vmatpush1.bf16.msra.mxu1 %v11267_v25  ;;  %3545 = vmatprep.subr.bf16.mxu0 %v11272_v40  ;;  %v8885_v40 = vld [vmem:[%s13022_s3 + $0xc] ss:$16 sps:$4 sm:$0xff]  }
 0x244   : > { %3810 = vmatprep.subr.bf16.mxu1 %v11278_v41  ;;  %v8890_v41 = vld [vmem:[%s13022_s3 + $0x20] ss:$16 sps:$4 sm:$0xff]  }
 0x246   : > { %3546 = vmatpush1.bf16.msra.mxu0 %v11284_v30  ;;  %v8889_v30 = vld [vmem:[%s13022_s3 + $0x2c] ss:$16 sps:$4 sm:$0xff]  }
 0x247   : > { %3811 = vmatpush1.bf16.msra.mxu1 %v11291_v38  ;;  %3843 = vmatprep.subr.bf16.mxu0 %v8884_v39  ;;  %v8886_v38 = vld [vmem:[%s13022_s3] ss:$16 sps:$4 sm:$0xff]   ;;  %v8887_v39 = vld [vmem:[%s13022_s3 + $0x8] ss:$16 sps:$4 sm:$0xff]  }
 0x248   : > { %4108 = vmatprep.subr.bf16.mxu1 %v8885_v40  ;;  %v8888_v40 = vld [vmem:[%s13022_s3 + $0x24] ss:$16 sps:$4 sm:$0xff]  }
 0x249   : > { %3548 = vmatmul.mubr.bf16.vlgmr.msra.gmra.mrb[48].mxu0 %v9919_v1 }
 0x24a   : > { %3813 = vmatmul.mubr.bf16.vlgmr.msra.gmra.mrb[48].mxu1 %v9919_v1  ;;  %3557 = vmatprep.mubr.bf16.mxu0 %v9982_v47 }
 0x24b   : > { %3822 = vmatprep.mubr.bf16.mxu1 %v9982_v47  ;;  %3844 = vmatpush1.bf16.msra.mxu0 %v8886_v38  ;;  %v8891_v38 = vld [vmem:[%s13022_s3 + $0x28] ss:$16 sps:$4 sm:$0xff]  }
 0x24c   : > { %4109 = vmatpush1.bf16.msra.mxu1 %v8887_v39  ;;  %3845 = vmatprep.subr.bf16.mxu0 %v8888_v40  ;;  %v8892_v39 = vld [vmem:[%s13022_s3 + $0x44] ss:$16 sps:$4 sm:$0xff]   ;;  %v8895_v40 = vld [vmem:[%s13022_s3 + $0x48] ss:$16 sps:$4 sm:$0xff]  }
 0x24d   : > { %4110 = vmatprep.subr.bf16.mxu1 %v8889_v30  ;;  %v8893_v30 = vld [vmem:[%s13022_s3 + $0x4c] ss:$16 sps:$4 sm:$0xff]  }
 0x24f   : > { %3846 = vmatpush1.bf16.msra.mxu0 %v8890_v41  ;;  %v8894_v41 = vld [vmem:[%s13022_s3 + $0x40] ss:$16 sps:$4 sm:$0xff]  }
 0x250   : > { %4111 = vmatpush1.bf16.msra.mxu1 %v8891_v38  ;;  %3847 = vmatprep.subr.bf16.mxu0 %v8892_v39  ;;  %v8896_v38 = vld [vmem:[%s13022_s3 + $0x64] ss:$16 sps:$4 sm:$0xff]   ;;  %v8897_v39 = vld [vmem:[%s13022_s3 + $0x6c] ss:$16 sps:$4 sm:$0xff]  }
 0x251   : > { %3558 = vmatmul.mubr.bf16.gmra.mrb[52].mxu0 %v9974_v43  ;;  %4112 = vmatprep.subr.bf16.mxu1 %v8893_v30  ;;  %v8898_v30 = vld [vmem:[%s13022_s3 + $0x60] ss:$16 sps:$4 sm:$0xff]  }
 0x252   : > { %3823 = vmatmul.mubr.bf16.gmra.mrb[52].mxu1 %v9974_v43  ;;  %3875 = vmatprep.mubr.bf16.mxu0 %v10209_v36 }
 0x253   : > { %3848 = vmatpush1.bf16.msra.mxu0 %v8894_v41  ;;  %4140 = vmatprep.mubr.bf16.mxu1 %v10209_v36  ;;  %v8899_v36 = vld [vmem:[%s13022_s3 + $0x68] ss:$16 sps:$4 sm:$0xff]   ;;  %v8900_v41 = vld [vmem:[%s13022_s3 + $0x84] ss:$16 sps:$4 sm:$0xff]  }
 0x254   : > { %4113 = vmatpush1.bf16.msra.mxu1 %v8895_v40  ;;  %3849 = vmatprep.subr.bf16.mxu0 %v8896_v38  ;;  %v8901_v40 = vld [vmem:[%s13022_s3 + $0x8c] ss:$16 sps:$4 sm:$0xff]   ;;  %v8902_v38 = vld [vmem:[%s13022_s3 + $0x80] ss:$16 sps:$4 sm:$0xff]  }
 0x255   : > { %4114 = vmatprep.subr.bf16.mxu1 %v8897_v39  ;;  %v8903_v39 = vld [vmem:[%s13022_s3 + $0x88] ss:$16 sps:$4 sm:$0xff]  }
 0x257   : > { %3850 = vmatpush1.bf16.msra.mxu0 %v8898_v30  ;;  %v8904_v30 = vld [vmem:[%s13022_s3 + $0xa4] ss:$16 sps:$4 sm:$0xff]  }
 0x258   : > { %4115 = vmatpush1.bf16.msra.mxu1 %v8899_v36  ;;  %3851 = vmatprep.subr.bf16.mxu0 %v8900_v41  ;;  %v8905_v36 = vld [vmem:[%s13022_s3 + $0xac] ss:$16 sps:$4 sm:$0xff]   ;;  %v8906_v41 = vld [vmem:[%s13022_s3 + $0xa0] ss:$16 sps:$4 sm:$0xff]  }
 0x259   : > { %4116 = vmatprep.subr.bf16.mxu1 %v8901_v40  ;;  %v8907_v40 = vld [vmem:[%s13022_s3 + $0xa8] ss:$16 sps:$4 sm:$0xff]  }
 0x25b   : > { %3852 = vmatpush1.bf16.msra.mxu0 %v8902_v38  ;;  %v8908_v38 = vld [vmem:[%s13022_s3 + $0xc4] ss:$16 sps:$4 sm:$0xff]  }
 0x25c   : > { %4117 = vmatpush1.bf16.msra.mxu1 %v8903_v39  ;;  %3853 = vmatprep.subr.bf16.mxu0 %v8904_v30  ;;  %v8909_v39 = vld [vmem:[%s13022_s3 + $0xcc] ss:$16 sps:$4 sm:$0xff]   ;;  %v8910_v30 = vld [vmem:[%s13022_s3 + $0xc0] ss:$16 sps:$4 sm:$0xff]  }
 0x25d   : > { %4118 = vmatprep.subr.bf16.mxu1 %v8905_v36  ;;  %v8911_v36 = vld [vmem:[%s13022_s3 + $0xc8] ss:$16 sps:$4 sm:$0xff]  }
 0x25f   : > { %3854 = vmatpush1.bf16.msra.mxu0 %v8906_v41  ;;  %v8912_v41 = vld [vmem:[%s13022_s3 + $0xe4] ss:$16 sps:$4 sm:$0xff]  }
 0x260   : > { %4119 = vmatpush1.bf16.msra.mxu1 %v8907_v40  ;;  %3855 = vmatprep.subr.bf16.mxu0 %v8908_v38  ;;  %v8913_v40 = vld [vmem:[%s13022_s3 + $0xec] ss:$16 sps:$4 sm:$0xff]   ;;  %v8914_v38 = vld [vmem:[%s13022_s3 + $0xe0] ss:$16 sps:$4 sm:$0xff]  }
 0x261   : > { %4120 = vmatprep.subr.bf16.mxu1 %v8909_v39  ;;  %v8915_v39 = vld [vmem:[%s13022_s3 + $0xe8] ss:$16 sps:$4 sm:$0xff]  }
 0x263   : > { %3856 = vmatpush1.bf16.msra.mxu0 %v8910_v30  ;;  %v8916_v30 = vld [vmem:[%s13022_s3 + $0x104] ss:$16 sps:$4 sm:$0xff]  }
 0x264   : > { %4121 = vmatpush1.bf16.msra.mxu1 %v8911_v36  ;;  %3857 = vmatprep.subr.bf16.mxu0 %v8912_v41  ;;  %v8917_v36 = vld [vmem:[%s13022_s3 + $0x10c] ss:$16 sps:$4 sm:$0xff]   ;;  %v8918_v41 = vld [vmem:[%s13022_s3 + $0x100] ss:$16 sps:$4 sm:$0xff]  }
 0x265   : > { %4122 = vmatprep.subr.bf16.mxu1 %v8913_v40  ;;  %v8919_v40 = vld [vmem:[%s13022_s3 + $0x108] ss:$16 sps:$4 sm:$0xff]  }
 0x267   : > { %3858 = vmatpush1.bf16.msra.mxu0 %v8914_v38  ;;  %v8920_v38 = vld [vmem:[%s13022_s3 + $0x124] ss:$16 sps:$4 sm:$0xff]  }
 0x268   : > { %4123 = vmatpush1.bf16.msra.mxu1 %v8915_v39  ;;  %3859 = vmatprep.subr.bf16.mxu0 %v8916_v30  ;;  %v8921_v39 = vld [vmem:[%s13022_s3 + $0x12c] ss:$16 sps:$4 sm:$0xff]   ;;  %v8922_v30 = vld [vmem:[%s13022_s3 + $0x120] ss:$16 sps:$4 sm:$0xff]  }
 0x269   : > { %4124 = vmatprep.subr.bf16.mxu1 %v8917_v36  ;;  %v8923_v36 = vld [vmem:[%s13022_s3 + $0x128] ss:$16 sps:$4 sm:$0xff]  }
 0x26b   : > { %3860 = vmatpush1.bf16.msra.mxu0 %v8918_v41  ;;  %v8924_v41 = vld [vmem:[%s13022_s3 + $0x144] ss:$16 sps:$4 sm:$0xff]  }
 0x26c   : > { %4125 = vmatpush1.bf16.msra.mxu1 %v8919_v40  ;;  %3861 = vmatprep.subr.bf16.mxu0 %v8920_v38  ;;  %v8925_v40 = vld [vmem:[%s13022_s3 + $0x14c] ss:$16 sps:$4 sm:$0xff]   ;;  %v8926_v38 = vld [vmem:[%s13022_s3 + $0x140] ss:$16 sps:$4 sm:$0xff]  }
 0x26d   : > { %4126 = vmatprep.subr.bf16.mxu1 %v8921_v39  ;;  %v8927_v39 = vld [vmem:[%s13022_s3 + $0x148] ss:$16 sps:$4 sm:$0xff]  }
 0x26f   : > { %3862 = vmatpush1.bf16.msra.mxu0 %v8922_v30  ;;  %v8928_v30 = vld [vmem:[%s13022_s3 + $0x164] ss:$16 sps:$4 sm:$0xff]  }
 0x270   : > { %4127 = vmatpush1.bf16.msra.mxu1 %v8923_v36  ;;  %3863 = vmatprep.subr.bf16.mxu0 %v8924_v41  ;;  %v8929_v36 = vld [vmem:[%s13022_s3 + $0x16c] ss:$16 sps:$4 sm:$0xff]   ;;  %v8930_v41 = vld [vmem:[%s13022_s3 + $0x160] ss:$16 sps:$4 sm:$0xff]  }
 0x271   : > { %4128 = vmatprep.subr.bf16.mxu1 %v8925_v40  ;;  %v8931_v40 = vld [vmem:[%s13022_s3 + $0x168] ss:$16 sps:$4 sm:$0xff]  }
 0x273   : > { %3864 = vmatpush1.bf16.msra.mxu0 %v8926_v38  ;;  %v8932_v38 = vld [vmem:[%s13022_s3 + $0x184] ss:$16 sps:$4 sm:$0xff]  }
 0x274   : > { %4129 = vmatpush1.bf16.msra.mxu1 %v8927_v39  ;;  %3865 = vmatprep.subr.bf16.mxu0 %v8928_v30  ;;  %v8933_v39 = vld [vmem:[%s13022_s3 + $0x18c] ss:$16 sps:$4 sm:$0xff]   ;;  %v8934_v30 = vld [vmem:[%s13022_s3 + $0x180] ss:$16 sps:$4 sm:$0xff]  }
 0x275   : > { %4130 = vmatprep.subr.bf16.mxu1 %v8929_v36  ;;  %v8935_v36 = vld [vmem:[%s13022_s3 + $0x188] ss:$16 sps:$4 sm:$0xff]  }
 0x277   : > { %3866 = vmatpush1.bf16.msra.mxu0 %v8930_v41  ;;  %v8936_v41 = vld [vmem:[%s13022_s3 + $0x1a4] ss:$16 sps:$4 sm:$0xff]  }
 0x278   : > { %4131 = vmatpush1.bf16.msra.mxu1 %v8931_v40  ;;  %3867 = vmatprep.subr.bf16.mxu0 %v8932_v38  ;;  %v8937_v40 = vld [vmem:[%s13022_s3 + $0x1ac] ss:$16 sps:$4 sm:$0xff]   ;;  %v8938_v38 = vld [vmem:[%s13022_s3 + $0x1a0] ss:$16 sps:$4 sm:$0xff]  }
 0x279   : > { %4132 = vmatprep.subr.bf16.mxu1 %v8933_v39  ;;  %v8939_v39 = vld [vmem:[%s13022_s3 + $0x1a8] ss:$16 sps:$4 sm:$0xff]  }
 0x27b   : > { %3868 = vmatpush1.bf16.msra.mxu0 %v8934_v30  ;;  %v8940_v30 = vld [vmem:[%s13022_s3 + $0x1c4] ss:$16 sps:$4 sm:$0xff]  }
 0x27c   : > { %4133 = vmatpush1.bf16.msra.mxu1 %v8935_v36  ;;  %3869 = vmatprep.subr.bf16.mxu0 %v8936_v41  ;;  %v8941_v36 = vld [vmem:[%s13022_s3 + $0x1cc] ss:$16 sps:$4 sm:$0xff]   ;;  %v8942_v41 = vld [vmem:[%s13022_s3 + $0x1c0] ss:$16 sps:$4 sm:$0xff]  }
 0x27d   : > { %4134 = vmatprep.subr.bf16.mxu1 %v8937_v40  ;;  %v8943_v40 = vld [vmem:[%s13022_s3 + $0x1c8] ss:$16 sps:$4 sm:$0xff]  }
 0x27f   : > { %3870 = vmatpush1.bf16.msra.mxu0 %v8938_v38  ;;  %v8944_v38 = vld [vmem:[%s13022_s3 + $0x1e4] ss:$16 sps:$4 sm:$0xff]  }
 0x280   : > { %4135 = vmatpush1.bf16.msra.mxu1 %v8939_v39  ;;  %3871 = vmatprep.subr.bf16.mxu0 %v8940_v30  ;;  %v8945_v39 = vld [vmem:[%s13022_s3 + $0x1ec] ss:$16 sps:$4 sm:$0xff]   ;;  %v8946_v30 = vld [vmem:[%s13022_s3 + $0x1e0] ss:$16 sps:$4 sm:$0xff]  }
 0x281   : > { %4136 = vmatprep.subr.bf16.mxu1 %v8941_v36  ;;  %v8947_v36 = vld [vmem:[%s13022_s3 + $0x1e8] ss:$16 sps:$4 sm:$0xff]  }
 0x283   : > { %3872 = vmatpush1.bf16.msra.mxu0 %v8942_v41  ;;  %v8948_v41 = vld [vmem:[%s13022_s3 + $0x204] ss:$16 sps:$4 sm:$0xff]  }
 0x284   : > { %4137 = vmatpush1.bf16.msra.mxu1 %v8943_v40  ;;  %3873 = vmatprep.subr.bf16.mxu0 %v8944_v38  ;;  %v8949_v40 = vld [vmem:[%s13022_s3 + $0x20c] ss:$16 sps:$4 sm:$0xff]   ;;  %v8950_v38 = vld [vmem:[%s13022_s3 + $0x200] ss:$16 sps:$4 sm:$0xff]  }
 0x285   : > { %4138 = vmatprep.subr.bf16.mxu1 %v8945_v39  ;;  %v8951_v39 = vld [vmem:[%s13022_s3 + $0x208] ss:$16 sps:$4 sm:$0xff]  }
 0x287   : > { %3874 = vmatpush1.bf16.msra.mxu0 %v8946_v30  ;;  %v8952_v30 = vld [vmem:[%s13022_s3 + $0x224] ss:$16 sps:$4 sm:$0xff]  }
 0x288   : > { %4139 = vmatpush1.bf16.msra.mxu1 %v8947_v36  ;;  %3896 = vmatprep.subr.bf16.mxu0 %v8948_v41  ;;  %v8954_v36 = vld [vmem:[%s13022_s3 + $0x220] ss:$16 sps:$4 sm:$0xff]   ;;  %v8955_v41 = vld [vmem:[%s13022_s3 + $0x228] ss:$16 sps:$4 sm:$0xff]  }
 0x289   : > { %4161 = vmatprep.subr.bf16.mxu1 %v8949_v40  ;;  %v8956_v40 = vld [vmem:[%s13022_s3 + $0x244] ss:$16 sps:$4 sm:$0xff]  }
 0x28a   : > { %3876 = vmatmul.mubr.bf16.vlgmr.msra.gmra.mrb[56].mxu0 %v10204_v8 }
 0x28b   : > { %4141 = vmatmul.mubr.bf16.vlgmr.msra.gmra.mrb[56].mxu1 %v10204_v8  ;;  %3885 = vmatprep.mubr.bf16.mxu0 %v10261_v61  ;;  %v8953_v8 = vld [vmem:[%s13022_s3 + $0x22c] ss:$16 sps:$4 sm:$0xff]  }
 0x28c   : > { %3897 = vmatpush1.bf16.msra.mxu0 %v8950_v38  ;;  %4150 = vmatprep.mubr.bf16.mxu1 %v10261_v61  ;;  %v8957_v38 = vld [vmem:[%s13022_s3 + $0x24c] ss:$16 sps:$4 sm:$0xff]  }
 0x28d   : > { %4162 = vmatpush1.bf16.msra.mxu1 %v8951_v39  ;;  %3898 = vmatprep.subr.bf16.mxu0 %v8952_v30  ;;  %v8958_v39 = vld [vmem:[%s13022_s3 + $0x240] ss:$16 sps:$4 sm:$0xff]   ;;  %v8959_v30 = vld [vmem:[%s13022_s3 + $0x248] ss:$16 sps:$4 sm:$0xff]  }
 0x28e   : > { %4163 = vmatprep.subr.bf16.mxu1 %v8953_v8  ;;  %v8960_v8 = vld [vmem:[%s13022_s3 + $0x264] ss:$16 sps:$4 sm:$0xff]  }
 0x290   : > { %3899 = vmatpush1.bf16.msra.mxu0 %v8954_v36  ;;  %v8961_v36 = vld [vmem:[%s13022_s3 + $0x26c] ss:$16 sps:$4 sm:$0xff]  }
 0x291   : > { %4164 = vmatpush1.bf16.msra.mxu1 %v8955_v41  ;;  %3900 = vmatprep.subr.bf16.mxu0 %v8956_v40  ;;  %v8962_v41 = vld [vmem:[%s13022_s3 + $0x260] ss:$16 sps:$4 sm:$0xff]   ;;  %v8964_v40 = vld [vmem:[%s13022_s3 + $0x284] ss:$16 sps:$4 sm:$0xff]  }
 0x292   : > { %3886 = vmatmul.mubr.bf16.gmra.mrb[60].mxu0 %v10256_v28  ;;  %4165 = vmatprep.subr.bf16.mxu1 %v8957_v38  ;;  %v8965_v38 = vld [vmem:[%s13022_s3 + $0x28c] ss:$16 sps:$4 sm:$0xff]  }
 0x293   : > { %4151 = vmatmul.mubr.bf16.gmra.mrb[60].mxu1 %v10256_v28  ;;  %3928 = vmatprep.mubr.bf16.mxu0 %v9914_v59 }
 0x294   : > { %3901 = vmatpush1.bf16.msra.mxu0 %v8958_v39  ;;  %4193 = vmatprep.mubr.bf16.mxu1 %v9914_v59  ;;  %v8963_v59 = vld [vmem:[%s13022_s3 + $0x268] ss:$16 sps:$4 sm:$0xff]   ;;  %v8966_v39 = vld [vmem:[%s13022_s3 + $0x280] ss:$16 sps:$4 sm:$0xff]  }
 0x295   : > { %4166 = vmatpush1.bf16.msra.mxu1 %v8959_v30  ;;  %3902 = vmatprep.subr.bf16.mxu0 %v8960_v8  ;;  %v8967_v30 = vld [vmem:[%s13022_s3 + $0x288] ss:$16 sps:$4 sm:$0xff]   ;;  %v8968_v8 = vld [vmem:[%s13022_s3 + $0x2a4] ss:$16 sps:$4 sm:$0xff]  }
 0x296   : > { %4167 = vmatprep.subr.bf16.mxu1 %v8961_v36  ;;  %v8969_v36 = vld [vmem:[%s13022_s3 + $0x2ac] ss:$16 sps:$4 sm:$0xff]  }
 0x298   : > { %3903 = vmatpush1.bf16.msra.mxu0 %v8962_v41  ;;  %v8970_v41 = vld [vmem:[%s13022_s3 + $0x2a0] ss:$16 sps:$4 sm:$0xff]  }
 0x299   : > { %4168 = vmatpush1.bf16.msra.mxu1 %v8963_v59  ;;  %3904 = vmatprep.subr.bf16.mxu0 %v8964_v40  ;;  %v8971_v59 = vld [vmem:[%s13022_s3 + $0x2a8] ss:$16 sps:$4 sm:$0xff]   ;;  %v8972_v40 = vld [vmem:[%s13022_s3 + $0x2c4] ss:$16 sps:$4 sm:$0xff]  }
 0x29a   : > { %4169 = vmatprep.subr.bf16.mxu1 %v8965_v38  ;;  %v8973_v38 = vld [vmem:[%s13022_s3 + $0x2cc] ss:$16 sps:$4 sm:$0xff]  }
 0x29c   : > { %3905 = vmatpush1.bf16.msra.mxu0 %v8966_v39  ;;  %v8974_v39 = vld [vmem:[%s13022_s3 + $0x2c0] ss:$16 sps:$4 sm:$0xff]  }
 0x29d   : > { %4170 = vmatpush1.bf16.msra.mxu1 %v8967_v30  ;;  %3906 = vmatprep.subr.bf16.mxu0 %v8968_v8  ;;  %v8975_v30 = vld [vmem:[%s13022_s3 + $0x2c8] ss:$16 sps:$4 sm:$0xff]   ;;  %v8976_v8 = vld [vmem:[%s13022_s3 + $0x2e4] ss:$16 sps:$4 sm:$0xff]  }
 0x29e   : > { %4171 = vmatprep.subr.bf16.mxu1 %v8969_v36  ;;  %v8977_v36 = vld [vmem:[%s13022_s3 + $0x2ec] ss:$16 sps:$4 sm:$0xff]  }
 0x2a0   : > { %3907 = vmatpush1.bf16.msra.mxu0 %v8970_v41  ;;  %v8978_v41 = vld [vmem:[%s13022_s3 + $0x2e0] ss:$16 sps:$4 sm:$0xff]  }
 0x2a1   : > { %4172 = vmatpush1.bf16.msra.mxu1 %v8971_v59  ;;  %3908 = vmatprep.subr.bf16.mxu0 %v8972_v40  ;;  %v8979_v59 = vld [vmem:[%s13022_s3 + $0x2e8] ss:$16 sps:$4 sm:$0xff]   ;;  %v8980_v40 = vld [vmem:[%s13022_s3 + $0x304] ss:$16 sps:$4 sm:$0xff]  }
 0x2a2   : > { %4173 = vmatprep.subr.bf16.mxu1 %v8973_v38  ;;  %v8981_v38 = vld [vmem:[%s13022_s3 + $0x30c] ss:$16 sps:$4 sm:$0xff]  }
 0x2a4   : > { %3909 = vmatpush1.bf16.msra.mxu0 %v8974_v39  ;;  %v8982_v39 = vld [vmem:[%s13022_s3 + $0x300] ss:$16 sps:$4 sm:$0xff]  }
 0x2a5   : > { %4174 = vmatpush1.bf16.msra.mxu1 %v8975_v30  ;;  %3910 = vmatprep.subr.bf16.mxu0 %v8976_v8  ;;  %v8983_v30 = vld [vmem:[%s13022_s3 + $0x308] ss:$16 sps:$4 sm:$0xff]   ;;  %v8984_v8 = vld [vmem:[%s13022_s3 + $0x324] ss:$16 sps:$4 sm:$0xff]  }
 0x2a6   : > { %4175 = vmatprep.subr.bf16.mxu1 %v8977_v36  ;;  %v8985_v36 = vld [vmem:[%s13022_s3 + $0x32c] ss:$16 sps:$4 sm:$0xff]  }
 0x2a8   : > { %3911 = vmatpush1.bf16.msra.mxu0 %v8978_v41  ;;  %v8986_v41 = vld [vmem:[%s13022_s3 + $0x320] ss:$16 sps:$4 sm:$0xff]  }
 0x2a9   : > { %4176 = vmatpush1.bf16.msra.mxu1 %v8979_v59  ;;  %3912 = vmatprep.subr.bf16.mxu0 %v8980_v40  ;;  %v8987_v59 = vld [vmem:[%s13022_s3 + $0x328] ss:$16 sps:$4 sm:$0xff]   ;;  %v8988_v40 = vld [vmem:[%s13022_s3 + $0x344] ss:$16 sps:$4 sm:$0xff]  }
 0x2aa   : > { %4177 = vmatprep.subr.bf16.mxu1 %v8981_v38  ;;  %v8989_v38 = vld [vmem:[%s13022_s3 + $0x34c] ss:$16 sps:$4 sm:$0xff]  }
 0x2ac   : > { %3913 = vmatpush1.bf16.msra.mxu0 %v8982_v39  ;;  %v8990_v39 = vld [vmem:[%s13022_s3 + $0x340] ss:$16 sps:$4 sm:$0xff]  }
 0x2ad   : > { %4178 = vmatpush1.bf16.msra.mxu1 %v8983_v30  ;;  %3914 = vmatprep.subr.bf16.mxu0 %v8984_v8  ;;  %v8991_v30 = vld [vmem:[%s13022_s3 + $0x348] ss:$16 sps:$4 sm:$0xff]   ;;  %v8992_v8 = vld [vmem:[%s13022_s3 + $0x364] ss:$16 sps:$4 sm:$0xff]  }
 0x2ae   : > { %4179 = vmatprep.subr.bf16.mxu1 %v8985_v36  ;;  %v8993_v36 = vld [vmem:[%s13022_s3 + $0x36c] ss:$16 sps:$4 sm:$0xff]  }
 0x2b0   : > { %3915 = vmatpush1.bf16.msra.mxu0 %v8986_v41  ;;  %v8994_v41 = vld [vmem:[%s13022_s3 + $0x360] ss:$16 sps:$4 sm:$0xff]  }
 0x2b1   : > { %4180 = vmatpush1.bf16.msra.mxu1 %v8987_v59  ;;  %3916 = vmatprep.subr.bf16.mxu0 %v8988_v40  ;;  %v8995_v59 = vld [vmem:[%s13022_s3 + $0x368] ss:$16 sps:$4 sm:$0xff]   ;;  %v8996_v40 = vld [vmem:[%s13022_s3 + $0x384] ss:$16 sps:$4 sm:$0xff]  }
 0x2b2   : > { %4181 = vmatprep.subr.bf16.mxu1 %v8989_v38  ;;  %v8997_v38 = vld [vmem:[%s13022_s3 + $0x38c] ss:$16 sps:$4 sm:$0xff]  }
 0x2b4   : > { %3917 = vmatpush1.bf16.msra.mxu0 %v8990_v39  ;;  %v8998_v39 = vld [vmem:[%s13022_s3 + $0x380] ss:$16 sps:$4 sm:$0xff]  }
 0x2b5   : > { %4182 = vmatpush1.bf16.msra.mxu1 %v8991_v30  ;;  %3918 = vmatprep.subr.bf16.mxu0 %v8992_v8  ;;  %v8999_v30 = vld [vmem:[%s13022_s3 + $0x388] ss:$16 sps:$4 sm:$0xff]   ;;  %v9000_v8 = vld [vmem:[%s13022_s3 + $0x3a4] ss:$16 sps:$4 sm:$0xff]  }
 0x2b6   : > { %4183 = vmatprep.subr.bf16.mxu1 %v8993_v36  ;;  %v9001_v36 = vld [vmem:[%s13022_s3 + $0x3ac] ss:$16 sps:$4 sm:$0xff]  }
 0x2b8   : > { %3919 = vmatpush1.bf16.msra.mxu0 %v8994_v41  ;;  %v9002_v41 = vld [vmem:[%s13022_s3 + $0x3a0] ss:$16 sps:$4 sm:$0xff]  }
 0x2b9   : > { %4184 = vmatpush1.bf16.msra.mxu1 %v8995_v59  ;;  %3920 = vmatprep.subr.bf16.mxu0 %v8996_v40  ;;  %v9003_v59 = vld [vmem:[%s13022_s3 + $0x3a8] ss:$16 sps:$4 sm:$0xff]   ;;  %v9004_v40 = vld [vmem:[%s13022_s3 + $0x3c4] ss:$16 sps:$4 sm:$0xff]  }
 0x2ba   : > { %4185 = vmatprep.subr.bf16.mxu1 %v8997_v38  ;;  %v9005_v38 = vld [vmem:[%s13022_s3 + $0x3cc] ss:$16 sps:$4 sm:$0xff]  }
 0x2bc   : > { %3921 = vmatpush1.bf16.msra.mxu0 %v8998_v39  ;;  %v9006_v39 = vld [vmem:[%s13022_s3 + $0x3c0] ss:$16 sps:$4 sm:$0xff]  }
 0x2bd   : > { %4186 = vmatpush1.bf16.msra.mxu1 %v8999_v30  ;;  %3922 = vmatprep.subr.bf16.mxu0 %v9000_v8  ;;  %v9007_v30 = vld [vmem:[%s13022_s3 + $0x3c8] ss:$16 sps:$4 sm:$0xff]   ;;  %v9008_v8 = vld [vmem:[%s13022_s3 + $0x3e4] ss:$16 sps:$4 sm:$0xff]  }
 0x2be   : > { %4187 = vmatprep.subr.bf16.mxu1 %v9001_v36  ;;  %v9009_v36 = vld [vmem:[%s13022_s3 + $0x3ec] ss:$16 sps:$4 sm:$0xff]  }
 0x2c0   : > { %3923 = vmatpush1.bf16.msra.mxu0 %v9002_v41  ;;  %v9010_v41 = vld [vmem:[%s13022_s3 + $0x3e0] ss:$16 sps:$4 sm:$0xff]  }
 0x2c1   : > { %4188 = vmatpush1.bf16.msra.mxu1 %v9003_v59  ;;  %3924 = vmatprep.subr.bf16.mxu0 %v9004_v40  ;;  %v9011_v59 = vld [vmem:[%s13022_s3 + $0x3e8] ss:$16 sps:$4 sm:$0xff]   ;;  %v9012_v40 = vld [vmem:[%s13022_s3 + $0x404] ss:$16 sps:$4 sm:$0xff]  }
 0x2c2   : > { %4189 = vmatprep.subr.bf16.mxu1 %v9005_v38  ;;  %v9013_v38 = vld [vmem:[%s13022_s3 + $0x40c] ss:$16 sps:$4 sm:$0xff]  }
 0x2c4   : > { %3925 = vmatpush1.bf16.msra.mxu0 %v9006_v39  ;;  %v9014_v39 = vld [vmem:[%s13022_s3 + $0x400] ss:$16 sps:$4 sm:$0xff]  }
 0x2c5   : > { %4190 = vmatpush1.bf16.msra.mxu1 %v9007_v30  ;;  %3926 = vmatprep.subr.bf16.mxu0 %v9008_v8  ;;  %v9015_v30 = vld [vmem:[%s13022_s3 + $0x408] ss:$16 sps:$4 sm:$0xff]   ;;  %v9016_v8 = vld [vmem:[%s13022_s3 + $0x424] ss:$16 sps:$4 sm:$0xff]  }
 0x2c6   : > { %4191 = vmatprep.subr.bf16.mxu1 %v9009_v36  ;;  %v9018_v36 = vld [vmem:[%s13022_s3 + $0x420] ss:$16 sps:$4 sm:$0xff]  }
 0x2c8   : > { %3927 = vmatpush1.bf16.msra.mxu0 %v9010_v41  ;;  %v9020_v41 = vld [vmem:[%s13022_s3 + $0x444] ss:$16 sps:$4 sm:$0xff]  }
 0x2c9   : > { %4192 = vmatpush1.bf16.msra.mxu1 %v9011_v59  ;;  %3949 = vmatprep.subr.bf16.mxu0 %v9012_v40  ;;  %v9021_v59 = vld [vmem:[%s13022_s3 + $0x44c] ss:$16 sps:$4 sm:$0xff]   ;;  %v9022_v40 = vld [vmem:[%s13022_s3 + $0x440] ss:$16 sps:$4 sm:$0xff]  }
 0x2ca   : > { %4214 = vmatprep.subr.bf16.mxu1 %v9013_v38  ;;  %v9023_v38 = vld [vmem:[%s13022_s3 + $0x448] ss:$16 sps:$4 sm:$0xff]  }
 0x2cb   : > { %3929 = vmatmul.mubr.bf16.vlgmr.msra.gmra.mrb[56].mxu0 %v9909_v53 }
 0x2cc   : > { %4194 = vmatmul.mubr.bf16.vlgmr.msra.gmra.mrb[56].mxu1 %v9909_v53  ;;  %3938 = vmatprep.mubr.bf16.mxu0 %v9966_v11  ;;  %v9017_v53 = vld [vmem:[%s13022_s3 + $0x42c] ss:$16 sps:$4 sm:$0xff]  }
 0x2cd   : > { %3950 = vmatpush1.bf16.msra.mxu0 %v9014_v39  ;;  %4203 = vmatprep.mubr.bf16.mxu1 %v9966_v11  ;;  %v9019_v11 = vld [vmem:[%s13022_s3 + $0x428] ss:$16 sps:$4 sm:$0xff]   ;;  %v9024_v39 = vld [vmem:[%s13022_s3 + $0x464] ss:$16 sps:$4 sm:$0xff]  }
 0x2ce   : > { %4215 = vmatpush1.bf16.msra.mxu1 %v9015_v30  ;;  %3951 = vmatprep.subr.bf16.mxu0 %v9016_v8  ;;  %v9026_v30 = vld [vmem:[%s13022_s3 + $0x460] ss:$16 sps:$4 sm:$0xff]   ;;  %v9028_v8 = vld [vmem:[%s13022_s3 + $0x484] ss:$16 sps:$4 sm:$0xff]  }
 0x2cf   : > { %4216 = vmatprep.subr.bf16.mxu1 %v9017_v53  ;;  %v9029_v53 = vld [vmem:[%s13022_s3 + $0x48c] ss:$16 sps:$4 sm:$0xff]  }
 0x2d1   : > { %3952 = vmatpush1.bf16.msra.mxu0 %v9018_v36  ;;  %v9030_v36 = vld [vmem:[%s13022_s3 + $0x480] ss:$16 sps:$4 sm:$0xff]  }
 0x2d2   : > { %4217 = vmatpush1.bf16.msra.mxu1 %v9019_v11  ;;  %3953 = vmatprep.subr.bf16.mxu0 %v9020_v41  ;;  %v9031_v11 = vld [vmem:[%s13022_s3 + $0x488] ss:$16 sps:$4 sm:$0xff]   ;;  %v9032_v41 = vld [vmem:[%s13022_s3 + $0x4a4] ss:$16 sps:$4 sm:$0xff]  }
 0x2d3   : > { %3939 = vmatmul.mubr.bf16.gmra.mrb[60].mxu0 %v9958_v35  ;;  %4218 = vmatprep.subr.bf16.mxu1 %v9021_v59  ;;  %v9033_v59 = vld [vmem:[%s13022_s3 + $0x4ac] ss:$16 sps:$4 sm:$0xff]  }
 0x2d4   : > { %4204 = vmatmul.mubr.bf16.gmra.mrb[60].mxu1 %v9958_v35  ;;  %3981 = vmatprep.mubr.bf16.mxu0 %v10254_v56  ;;  %v9025_v35 = vld [vmem:[%s13022_s3 + $0x46c] ss:$16 sps:$4 sm:$0xff]  }
 0x2d5   : > { %3954 = vmatpush1.bf16.msra.mxu0 %v9022_v40  ;;  %4246 = vmatprep.mubr.bf16.mxu1 %v10254_v56  ;;  %v9027_v56 = vld [vmem:[%s13022_s3 + $0x468] ss:$16 sps:$4 sm:$0xff]   ;;  %v9034_v40 = vld [vmem:[%s13022_s3 + $0x4a0] ss:$16 sps:$4 sm:$0xff]  }
 0x2d6   : > { %4219 = vmatpush1.bf16.msra.mxu1 %v9023_v38  ;;  %3955 = vmatprep.subr.bf16.mxu0 %v9024_v39  ;;  %v9035_v38 = vld [vmem:[%s13022_s3 + $0x4a8] ss:$16 sps:$4 sm:$0xff]   ;;  %v9036_v39 = vld [vmem:[%s13022_s3 + $0x4c4] ss:$16 sps:$4 sm:$0xff]  }
 0x2d7   : > { %4220 = vmatprep.subr.bf16.mxu1 %v9025_v35  ;;  %v9037_v35 = vld [vmem:[%s13022_s3 + $0x4cc] ss:$16 sps:$4 sm:$0xff]  }
 0x2d9   : > { %3956 = vmatpush1.bf16.msra.mxu0 %v9026_v30  ;;  %v9038_v30 = vld [vmem:[%s13022_s3 + $0x4c0] ss:$16 sps:$4 sm:$0xff]  }
 0x2da   : > { %4221 = vmatpush1.bf16.msra.mxu1 %v9027_v56  ;;  %3957 = vmatprep.subr.bf16.mxu0 %v9028_v8  ;;  %v9039_v56 = vld [vmem:[%s13022_s3 + $0x4c8] ss:$16 sps:$4 sm:$0xff]   ;;  %v9040_v8 = vld [vmem:[%s13022_s3 + $0x4e4] ss:$16 sps:$4 sm:$0xff]  }
 0x2db   : > { %4222 = vmatprep.subr.bf16.mxu1 %v9029_v53  ;;  %v9041_v53 = vld [vmem:[%s13022_s3 + $0x4ec] ss:$16 sps:$4 sm:$0xff]  }
 0x2dd   : > { %3958 = vmatpush1.bf16.msra.mxu0 %v9030_v36  ;;  %v9042_v36 = vld [vmem:[%s13022_s3 + $0x4e0] ss:$16 sps:$4 sm:$0xff]  }
 0x2de   : > { %4223 = vmatpush1.bf16.msra.mxu1 %v9031_v11  ;;  %3959 = vmatprep.subr.bf16.mxu0 %v9032_v41  ;;  %v9043_v11 = vld [vmem:[%s13022_s3 + $0x4e8] ss:$16 sps:$4 sm:$0xff]   ;;  %v9044_v41 = vld [vmem:[%s13022_s3 + $0x504] ss:$16 sps:$4 sm:$0xff]  }
 0x2df   : > { %4224 = vmatprep.subr.bf16.mxu1 %v9033_v59  ;;  %v9045_v59 = vld [vmem:[%s13022_s3 + $0x50c] ss:$16 sps:$4 sm:$0xff]  }
 0x2e1   : > { %3960 = vmatpush1.bf16.msra.mxu0 %v9034_v40  ;;  %v9046_v40 = vld [vmem:[%s13022_s3 + $0x500] ss:$16 sps:$4 sm:$0xff]  }
 0x2e2   : > { %4225 = vmatpush1.bf16.msra.mxu1 %v9035_v38  ;;  %3961 = vmatprep.subr.bf16.mxu0 %v9036_v39  ;;  %v9047_v38 = vld [vmem:[%s13022_s3 + $0x508] ss:$16 sps:$4 sm:$0xff]   ;;  %v9048_v39 = vld [vmem:[%s13022_s3 + $0x524] ss:$16 sps:$4 sm:$0xff]  }
 0x2e3   : > { %4226 = vmatprep.subr.bf16.mxu1 %v9037_v35  ;;  %v9049_v35 = vld [vmem:[%s13022_s3 + $0x52c] ss:$16 sps:$4 sm:$0xff]  }
 0x2e5   : > { %3962 = vmatpush1.bf16.msra.mxu0 %v9038_v30  ;;  %v9050_v30 = vld [vmem:[%s13022_s3 + $0x520] ss:$16 sps:$4 sm:$0xff]  }
 0x2e6   : > { %4227 = vmatpush1.bf16.msra.mxu1 %v9039_v56  ;;  %3963 = vmatprep.subr.bf16.mxu0 %v9040_v8  ;;  %v9051_v56 = vld [vmem:[%s13022_s3 + $0x528] ss:$16 sps:$4 sm:$0xff]   ;;  %v9052_v8 = vld [vmem:[%s13022_s3 + $0x544] ss:$16 sps:$4 sm:$0xff]  }
 0x2e7   : > { %4228 = vmatprep.subr.bf16.mxu1 %v9041_v53  ;;  %v9053_v53 = vld [vmem:[%s13022_s3 + $0x54c] ss:$16 sps:$4 sm:$0xff]  }
 0x2e9   : > { %3964 = vmatpush1.bf16.msra.mxu0 %v9042_v36  ;;  %v9054_v36 = vld [vmem:[%s13022_s3 + $0x540] ss:$16 sps:$4 sm:$0xff]  }
 0x2ea   : > { %4229 = vmatpush1.bf16.msra.mxu1 %v9043_v11  ;;  %3965 = vmatprep.subr.bf16.mxu0 %v9044_v41  ;;  %v9055_v11 = vld [vmem:[%s13022_s3 + $0x548] ss:$16 sps:$4 sm:$0xff]   ;;  %v13277_v41 = vld [vmem:[#allocation31_spill] sm:$0xff] }
 0x2eb   : > { %4230 = vmatprep.subr.bf16.mxu1 %v9045_v59  ;;  %v13278_v59 = vld [vmem:[#allocation32_spill] sm:$0xff] }
 0x2ed   : > { %3966 = vmatpush1.bf16.msra.mxu0 %v9046_v40  ;;  %v13279_v40 = vld [vmem:[#allocation33_spill] sm:$0xff] }
 0x2ee   : > { %4231 = vmatpush1.bf16.msra.mxu1 %v9047_v38  ;;  %3967 = vmatprep.subr.bf16.mxu0 %v9048_v39  ;;  %v13280_v38 = vld [vmem:[#allocation34_spill] sm:$0xff]  ;;  %v13281_v39 = vld [vmem:[#allocation35_spill] sm:$0xff] }
 0x2ef   : > { %4232 = vmatprep.subr.bf16.mxu1 %v9049_v35  ;;  %v13282_v35 = vld [vmem:[#allocation36_spill] sm:$0xff] }
 0x2f1   : > { %3968 = vmatpush1.bf16.msra.mxu0 %v9050_v30  ;;  %v13283_v30 = vld [vmem:[#allocation37_spill] sm:$0xff] }
 0x2f2   : > { %4233 = vmatpush1.bf16.msra.mxu1 %v9051_v56  ;;  %3969 = vmatprep.subr.bf16.mxu0 %v9052_v8  ;;  %v13284_v56 = vld [vmem:[#allocation38_spill] sm:$0xff]  ;;  %v13285_v8 = vld [vmem:[#allocation39_spill] sm:$0xff] }
 0x2f3   : > { %4234 = vmatprep.subr.bf16.mxu1 %v9053_v53  ;;  %v13286_v53 = vld [vmem:[#allocation40_spill] sm:$0xff] }
 0x2f5   : > { %3970 = vmatpush1.bf16.msra.mxu0 %v9054_v36  ;;  %v13287_v36 = vld [vmem:[#allocation41_spill] sm:$0xff] }
 0x2f6   : > { %4235 = vmatpush1.bf16.msra.mxu1 %v9055_v11  ;;  %3971 = vmatprep.subr.bf16.mxu0 %v10395_v42  ;;  %v13288_v11 = vld [vmem:[#allocation42_spill] sm:$0xff] }
 0x2f7   : > { %4236 = vmatprep.subr.bf16.mxu1 %v10400_v18 }
 0x2f9   : > { %3972 = vmatpush1.bf16.msra.mxu0 %v10405_v45 }
 0x2fa   : > { %4237 = vmatpush1.bf16.msra.mxu1 %v10410_v46  ;;  %3973 = vmatprep.subr.bf16.mxu0 %v10417_v16 }
 0x2fb   : > { %4238 = vmatprep.subr.bf16.mxu1 %v10422_v14  ;;  %v13256_v14 = vld [vmem:[#allocation10_spill] sm:$0xff] }
 0x2fd   : > { %3974 = vmatpush1.bf16.msra.mxu0 %v10429_v17 }
 0x2fe   : > { %4239 = vmatpush1.bf16.msra.mxu1 %v10434_v49  ;;  %3975 = vmatprep.subr.bf16.mxu0 %v10441_v63 }
 0x2ff   : > { %4240 = vmatprep.subr.bf16.mxu1 %v10446_v21  ;;  %v13257_v21 = vld [vmem:[#allocation11_spill] sm:$0xff] }
 0x301   : > { %3976 = vmatpush1.bf16.msra.mxu0 %v10453_v22  ;;  %v13258_v22 = vld [vmem:[#allocation12_spill] sm:$0xff] }
 0x302   : > { %4241 = vmatpush1.bf16.msra.mxu1 %v10458_v0  ;;  %3977 = vmatprep.subr.bf16.mxu0 %v10465_v4  ;;  %v13259_v0 = vld [vmem:[#allocation13_spill] sm:$0xff]  ;;  %v13260_v4 = vld [vmem:[#allocation14_spill] sm:$0xff] }
 0x303   : > { %4242 = vmatprep.subr.bf16.mxu1 %v10470_v44 }
 0x305   : > { %3978 = vmatpush1.bf16.msra.mxu0 %v10477_v48 }
 0x306   : > { %4243 = vmatpush1.bf16.msra.mxu1 %v10482_v7  ;;  %3979 = vmatprep.subr.bf16.mxu0 %v10489_v10  ;;  %v13261_v10 = vld [vmem:[#allocation15_spill] sm:$0xff] }
 0x307   : > { %4244 = vmatprep.subr.bf16.mxu1 %v10494_v26 }
 0x309   : > { %3980 = vmatpush1.bf16.msra.mxu0 %v10501_v27 }
 0x30a   : > { %4245 = vmatpush1.bf16.msra.mxu1 %v10506_v31  ;;  %4002 = vmatprep.subr.bf16.mxu0 %v10513_v32  ;;  %v13262_v32 = vld [vmem:[#allocation16_spill] sm:$0xff] }
 0x30b   : > { %4267 = vmatprep.subr.bf16.mxu1 %v10518_v33 }
 0x30c   : > { %3982 = vmatmul.mubr.bf16.vlgmr.msra.gmra.mrb[56].mxu0 %v10249_v19 }
 0x30d   : > { %4247 = vmatmul.mubr.bf16.vlgmr.msra.gmra.mrb[56].mxu1 %v10249_v19  ;;  %3991 = vmatprep.mubr.bf16.mxu0 %v10308_v9 }
 0x30e   : > { %4003 = vmatpush1.bf16.msra.mxu0 %v10525_v15  ;;  %4256 = vmatprep.mubr.bf16.mxu1 %v10308_v9  ;;  %v13263_v15 = vld [vmem:[#allocation17_spill] sm:$0xff] }
 0x30f   : > { %4268 = vmatpush1.bf16.msra.mxu1 %v10531_v57  ;;  %4004 = vmatprep.subr.bf16.mxu0 %v10537_v24 }
 0x310   : > { %4269 = vmatprep.subr.bf16.mxu1 %v10542_v20  ;;  %v13264_v20 = vld [vmem:[#allocation18_spill] sm:$0xff] }
 0x312   : > { %4005 = vmatpush1.bf16.msra.mxu0 %v10551_v50 }
 0x313   : > { %4270 = vmatpush1.bf16.msra.mxu1 %v10558_v51  ;;  %4006 = vmatprep.subr.bf16.mxu0 %v10563_v52 }
 0x314   : > { %3992 = vmatmul.mubr.bf16.gmra.mrb[60].mxu0 %v10298_v6  ;;  %4271 = vmatprep.subr.bf16.mxu1 %v10570_v23  ;;  %v13265_v23 = vld [vmem:[#allocation19_spill] sm:$0xff] }
 0x315   : > { %4257 = vmatmul.mubr.bf16.gmra.mrb[60].mxu1 %v10298_v6  ;;  %4034 = vmatprep.mubr.bf16.mxu0 %v9927_v5 }
 0x316   : > { %4007 = vmatpush1.bf16.msra.mxu0 %v10576_v2  ;;  %4299 = vmatprep.mubr.bf16.mxu1 %v9927_v5  ;;  %v13266_v2 = vld [vmem:[#allocation20_spill] sm:$0xff] }
 0x317   : > { %4272 = vmatpush1.bf16.msra.mxu1 %v10583_v12  ;;  %4008 = vmatprep.subr.bf16.mxu0 %v10589_v54  ;;  %v13267_v12 = vld [vmem:[#allocation21_spill] sm:$0xff]  ;;  %v13268_v54 = vld [vmem:[#allocation22_spill] sm:$0xff] }
 0x318   : > { %4273 = vmatprep.subr.bf16.mxu1 %v10594_v55  ;;  %v13269_v55 = vld [vmem:[#allocation23_spill] sm:$0xff] }
 0x31a   : > { %4009 = vmatpush1.bf16.msra.mxu0 %v10603_v3  ;;  %v13270_v3 = vld [vmem:[#allocation24_spill] sm:$0xff] }
 0x31b   : > { %4274 = vmatpush1.bf16.msra.mxu1 %v10610_v29  ;;  %4010 = vmatprep.subr.bf16.mxu0 %v10615_v34  ;;  %v13271_v29 = vld [vmem:[#allocation25_spill] sm:$0xff]  ;;  %v13272_v34 = vld [vmem:[#allocation26_spill] sm:$0xff] }
 0x31c   : > { %4275 = vmatprep.subr.bf16.mxu1 %v10622_v60  ;;  %v11882_v19 = vpop.f32.mrb[48].mxu0  ;;  %v13273_v60 = vld [vmem:[#allocation27_spill] sm:$0xff] }
 0x31d   : > { %v11884_v6 = vpop.f32.mrb[48].mxu1  ;;  %v11886_v9 = vpop.f32.mrb[49].mxu0 }
 0x31e   : > { %4011 = vmatpush1.bf16.msra.mxu0 %v10628_v58  ;;  %v3833_v5 = vmax.f32 %v11882_v19, %v11884_v6  ;;  %v11891_v42 = vpop.f32.mrb[49].mxu1  ;;  %v11893_v18 = vpop.f32.mrb[50].mxu0  ;;  %v13274_v58 = vld [vmem:[#allocation28_spill] sm:$0xff] }
 0x31f   : > { %4276 = vmatpush1.bf16.msra.mxu1 %v10635_v62  ;;  %v3834_v45 = vmax.f32 %v11886_v9, %v11891_v42  ;;  %4012 = vmatprep.subr.bf16.mxu0 %v10640_v13  ;;  %v11899_v46 = vpop.f32.mrb[50].mxu1  ;;  %v11901_v16 = vpop.f32.mrb[51].mxu0  ;;  %v13275_v62 = vld [vmem:[#allocation29_spill] sm:$0xff]  ;;  %v13276_v13 = vld [vmem:[#allocation30_spill] sm:$0xff] }
 0x320   : > { %4277 = vmatprep.subr.bf16.mxu1 %v13256_v14  ;;  %v3835_v17 = vmax.f32 %v11893_v18, %v11899_v46  ;;  %v11906_v49 = vpop.f32.mrb[51].mxu1  ;;  %v13289_v14 = vld [vmem:[#allocation43_spill] sm:$0xff] }
 0x321   : > { %v3836_v63 = vmax.f32 %v11901_v16, %v11906_v49 }
 0x322   : > { %4013 = vmatpush1.bf16.msra.mxu0 %v13257_v21  ;;  %v13290_v21 = vld [vmem:[#allocation44_spill] sm:$0xff] }
 0x323   : > { %4278 = vmatpush1.bf16.msra.mxu1 %v13258_v22  ;;  %4014 = vmatprep.subr.bf16.mxu0 %v13259_v0  ;;  %v13291_v22 = vld [vmem:[#allocation45_spill] sm:$0xff]  ;;  %v13292_v0 = vld [vmem:[#allocation46_spill] sm:$0xff] }
 0x324   : > { %4279 = vmatprep.subr.bf16.mxu1 %v13260_v4  ;;  %v11914_v44 = vpop.f32.mrb[52].mxu0  ;;  %v13293_v4 = vld [vmem:[#allocation47_spill] sm:$0xff] }
 0x325   : > { %v11916_v48 = vpop.f32.mrb[52].mxu1  ;;  %v11918_v7 = vpop.f32.mrb[53].mxu0 }
 0x326   : > { %4015 = vmatpush1.bf16.msra.mxu0 %v13261_v10  ;;  %v3837_v26 = vmax.f32 %v11914_v44, %v11916_v48  ;;  %v11923_v27 = vpop.f32.mrb[53].mxu1  ;;  %v11925_v31 = vpop.f32.mrb[54].mxu0  ;;  %v13294_v10 = vld [vmem:[#allocation48_spill] sm:$0xff] }
 0x327   : > { %4280 = vmatpush1.bf16.msra.mxu1 %v13262_v32  ;;  %v3838_v33 = vmax.f32 %v11918_v7, %v11923_v27  ;;  %4016 = vmatprep.subr.bf16.mxu0 %v13263_v15  ;;  %v11931_v57 = vpop.f32.mrb[54].mxu1  ;;  %v11933_v24 = vpop.f32.mrb[55].mxu0  ;;  %v13295_v32 = vld [vmem:[#allocation49_spill] sm:$0xff]  ;;  %v13296_v15 = vld [vmem:[#allocation50_spill] sm:$0xff] }
 0x328   : > { %4281 = vmatprep.subr.bf16.mxu1 %v13264_v20  ;;  %v3839_v50 = vmax.f32 %v11925_v31, %v11931_v57  ;;  %v11938_v51 = vpop.f32.mrb[55].mxu1  ;;  %v13297_v20 = vld [vmem:[#allocation51_spill] sm:$0xff] }
 0x329   : > { %v3840_v52 = vmax.f32 %v11933_v24, %v11938_v51  ;;  %v8568_v27 = vld [vmem:[%s13024_s5 + $0x24] ss:$16 sps:$4 sm:$0xff]   ;;  %v8566_v24 = vld [vmem:[%s13024_s5 + $0x20] ss:$16 sps:$4 sm:$0xff]  }
 0x32a   : > { %4017 = vmatpush1.bf16.msra.mxu0 %v13265_v23  ;;  %v13298_v23 = vld [vmem:[#allocation52_spill] sm:$0xff]  ;;  %v8574_v51 = vld [vmem:[%s13024_s5 + $0x44] ss:$16 sps:$4 sm:$0xff]  }
 0x32b   : > { %4282 = vmatpush1.bf16.msra.mxu1 %v13266_v2  ;;  %4018 = vmatprep.subr.bf16.mxu0 %v13267_v12  ;;  %v13299_v2 = vld [vmem:[#allocation53_spill] sm:$0xff]  ;;  %v13300_v12 = vld [vmem:[#allocation54_spill] sm:$0xff] }
 0x32c   : > { %4283 = vmatprep.subr.bf16.mxu1 %v13268_v54  ;;  %v13301_v54 = vld [vmem:[#allocation55_spill] sm:$0xff] }
 0x32e   : > { %4019 = vmatpush1.bf16.msra.mxu0 %v13269_v55  ;;  %v13302_v55 = vld [vmem:[#allocation56_spill] sm:$0xff] }
 0x32f   : > { %4284 = vmatpush1.bf16.msra.mxu1 %v13270_v3  ;;  %4020 = vmatprep.subr.bf16.mxu0 %v13271_v29  ;;  %v13303_v3 = vld [vmem:[#allocation57_spill] sm:$0xff]  ;;  %v13304_v29 = vld [vmem:[#allocation58_spill] sm:$0xff] }
 0x330   : > { %4285 = vmatprep.subr.bf16.mxu1 %v13272_v34  ;;  %v13305_v34 = vld [vmem:[#allocation59_spill] sm:$0xff] }
 0x332   : > { %4021 = vmatpush1.bf16.msra.mxu0 %v13273_v60  ;;  %v13306_v60 = vld [vmem:[#allocation60_spill] sm:$0xff] }
 0x333   : > { %4286 = vmatpush1.bf16.msra.mxu1 %v13274_v58  ;;  %4022 = vmatprep.subr.bf16.mxu0 %v13275_v62  ;;  %v13307_v58 = vld [vmem:[#allocation61_spill] sm:$0xff]  ;;  %v13310_v62 = vld [vmem:[#allocation64_spill] sm:$0xff] }
 0x334   : > { %4287 = vmatprep.subr.bf16.mxu1 %v13276_v13  ;;  %v13311_v13 = vld [vmem:[#allocation65_spill] sm:$0xff] }
 0x336   : > { %4023 = vmatpush1.bf16.msra.mxu0 %v13277_v41  ;;  %v13312_v41 = vld [vmem:[#allocation66_spill] sm:$0xff] }
 0x337   : > { %4288 = vmatpush1.bf16.msra.mxu1 %v13278_v59  ;;  %4024 = vmatprep.subr.bf16.mxu0 %v13279_v40  ;;  %v13313_v59 = vld [vmem:[#allocation67_spill] sm:$0xff]  ;;  %v13314_v40 = vld [vmem:[#allocation68_spill] sm:$0xff] }
 0x338   : > { %4289 = vmatprep.subr.bf16.mxu1 %v13280_v38  ;;  %v13315_v38 = vld [vmem:[#allocation69_spill] sm:$0xff] }
 0x33a   : > { %4025 = vmatpush1.bf16.msra.mxu0 %v13281_v39  ;;  %v13316_v39 = vld [vmem:[#allocation70_spill] sm:$0xff] }
 0x33b   : > { %4290 = vmatpush1.bf16.msra.mxu1 %v13282_v35  ;;  %4026 = vmatprep.subr.bf16.mxu0 %v13283_v30  ;;  %v13318_v35 = vld [vmem:[#allocation72_spill] sm:$0xff]  ;;  %v13319_v30 = vld [vmem:[#allocation73_spill] sm:$0xff] }
 0x33c   : > { %4291 = vmatprep.subr.bf16.mxu1 %v13284_v56  ;;  %v13321_v56 = vld [vmem:[#allocation75_spill] sm:$0xff] }
 0x33e   : > { %4027 = vmatpush1.bf16.msra.mxu0 %v13285_v8  ;;  %v13322_v8 = vld [vmem:[#allocation76_spill] sm:$0xff] }
 0x33f   : > { %4292 = vmatpush1.bf16.msra.mxu1 %v13286_v53  ;;  %4028 = vmatprep.subr.bf16.mxu0 %v13287_v36  ;;  %v13323_v53 = vld [vmem:[#allocation77_spill] sm:$0xff]  ;;  %v13324_v36 = vld [vmem:[#allocation78_spill] sm:$0xff] }
 0x340   : > { %4293 = vmatprep.subr.bf16.mxu1 %v13288_v11  ;;  %v13325_v11 = vld [vmem:[#allocation79_spill] sm:$0xff] }
 0x342   : > { %4029 = vmatpush1.bf16.msra.mxu0 %v13289_v14  ;;  %v13326_v14 = vld [vmem:[#allocation80_spill] sm:$0xff] }
 0x343   : > { %4294 = vmatpush1.bf16.msra.mxu1 %v13290_v21  ;;  %4030 = vmatprep.subr.bf16.mxu0 %v13291_v22  ;;  %v13327_v21 = vld [vmem:[#allocation81_spill] sm:$0xff]  ;;  %v13328_v22 = vld [vmem:[#allocation82_spill] sm:$0xff] }
 0x344   : > { %4295 = vmatprep.subr.bf16.mxu1 %v13292_v0  ;;  %v13329_v0 = vld [vmem:[#allocation83_spill] sm:$0xff] }
 0x346   : > { %4031 = vmatpush1.bf16.msra.mxu0 %v13293_v4  ;;  %v13330_v4 = vld [vmem:[#allocation84_spill] sm:$0xff] }
 0x347   : > { %4296 = vmatpush1.bf16.msra.mxu1 %v13294_v10  ;;  %4032 = vmatprep.subr.bf16.mxu0 %v13295_v32  ;;  %v13331_v10 = vld [vmem:[#allocation85_spill] sm:$0xff]  ;;  %v13332_v32 = vld [vmem:[#allocation86_spill] sm:$0xff] }
 0x348   : > { %4297 = vmatprep.subr.bf16.mxu1 %v13296_v15  ;;  %v13333_v15 = vld [vmem:[#allocation87_spill] sm:$0xff] }
 0x34a   : > { %4033 = vmatpush1.bf16.msra.mxu0 %v13297_v20  ;;  %v13334_v20 = vld [vmem:[#allocation88_spill] sm:$0xff] }
 0x34b   : > { %4298 = vmatpush1.bf16.msra.mxu1 %v13298_v23  ;;  %4055 = vmatprep.subr.bf16.mxu0 %v13299_v2  ;;  %v13335_v23 = vld [vmem:[#allocation89_spill] sm:$0xff]  ;;  %v13336_v2 = vld [vmem:[#allocation90_spill] sm:$0xff] }
 0x34c   : > { %4320 = vmatprep.subr.bf16.mxu1 %v13300_v12  ;;  %v13337_v12 = vld [vmem:[#allocation91_spill] sm:$0xff] }
 0x34d   : > { %4035 = vmatmul.mubr.bf16.vlgmr.msra.gmra.mrb[56].mxu0 %v9919_v1 }
 0x34e   : > { %4300 = vmatmul.mubr.bf16.vlgmr.msra.gmra.mrb[56].mxu1 %v9919_v1  ;;  %4044 = vmatprep.mubr.bf16.mxu0 %v9982_v47  ;;  %v13308_v1 = vld [vmem:[#allocation62_spill] sm:$0xff] }
 0x34f   : > { %4056 = vmatpush1.bf16.msra.mxu0 %v13301_v54  ;;  %4309 = vmatprep.mubr.bf16.mxu1 %v9982_v47  ;;  %v13309_v47 = vld [vmem:[#allocation63_spill] sm:$0xff]  ;;  %v13338_v54 = vld [vmem:[#allocation92_spill] sm:$0xff] }
 0x350   : > { %4321 = vmatpush1.bf16.msra.mxu1 %v13302_v55  ;;  %4057 = vmatprep.subr.bf16.mxu0 %v13303_v3  ;;  %v13339_v55 = vld [vmem:[#allocation93_spill] sm:$0xff]  ;;  %v13340_v3 = vld [vmem:[#allocation94_spill] sm:$0xff] }
 0x351   : > { %4322 = vmatprep.subr.bf16.mxu1 %v13304_v29  ;;  %v13341_v29 = vld [vmem:[#allocation95_spill] sm:$0xff] }
 0x353   : > { %4058 = vmatpush1.bf16.msra.mxu0 %v13305_v34  ;;  %v13342_v34 = vld [vmem:[#allocation96_spill] sm:$0xff] }
 0x354   : > { %4323 = vmatpush1.bf16.msra.mxu1 %v13306_v60  ;;  %4059 = vmatprep.subr.bf16.mxu0 %v13307_v58  ;;  %v13343_v60 = vld [vmem:[#allocation97_spill] sm:$0xff]  ;;  %v13344_v58 = vld [vmem:[#allocation98_spill] sm:$0xff] }
 0x355   : > { %4045 = vmatmul.mubr.bf16.gmra.mrb[60].mxu0 %v9974_v43  ;;  %4324 = vmatprep.subr.bf16.mxu1 %v13308_v1  ;;  %v13345_v1 = vld [vmem:[#allocation99_spill] sm:$0xff] }
 0x356   : > { %4310 = vmatmul.mubr.bf16.gmra.mrb[60].mxu1 %v9974_v43  ;;  %4087 = vmatprep.mubr.bf16.mxu0 %v10261_v61  ;;  %v13317_v43 = vld [vmem:[#allocation71_spill] sm:$0xff] }
 0x357   : > { %4060 = vmatpush1.bf16.msra.mxu0 %v13309_v47  ;;  %4352 = vmatprep.mubr.bf16.mxu1 %v10261_v61  ;;  %v13320_v61 = vld [vmem:[#allocation74_spill] sm:$0xff]  ;;  %v13346_v47 = vld [vmem:[#allocation100_spill] sm:$0xff] }
 0x358   : > { %4325 = vmatpush1.bf16.msra.mxu1 %v13310_v62  ;;  %4061 = vmatprep.subr.bf16.mxu0 %v13311_v13  ;;  %v13347_v62 = vld [vmem:[#allocation101_spill] sm:$0xff]  ;;  %v13348_v13 = vld [vmem:[#allocation102_spill] sm:$0xff] }
 0x359   : > { %4326 = vmatprep.subr.bf16.mxu1 %v13312_v41  ;;  %v13349_v41 = vld [vmem:[#allocation103_spill] sm:$0xff] }
 0x35b   : > { %4062 = vmatpush1.bf16.msra.mxu0 %v13313_v59  ;;  %v13350_v59 = vld [vmem:[#allocation104_spill] sm:$0xff] }
 0x35c   : > { %4327 = vmatpush1.bf16.msra.mxu1 %v13314_v40  ;;  %4063 = vmatprep.subr.bf16.mxu0 %v13315_v38  ;;  %v13351_v40 = vld [vmem:[#allocation105_spill] sm:$0xff]  ;;  %v13352_v38 = vld [vmem:[#allocation106_spill] sm:$0xff] }
 0x35d   : > { %4328 = vmatprep.subr.bf16.mxu1 %v13316_v39  ;;  %v13353_v39 = vld [vmem:[#allocation107_spill] sm:$0xff] }
 0x35f   : > { %4064 = vmatpush1.bf16.msra.mxu0 %v13317_v43  ;;  %v13354_v43 = vld [vmem:[#allocation108_spill] sm:$0xff] }
 0x360   : > { %4329 = vmatpush1.bf16.msra.mxu1 %v13318_v35  ;;  %4065 = vmatprep.subr.bf16.mxu0 %v13319_v30  ;;  %v13355_v35 = vld [vmem:[#allocation109_spill] sm:$0xff]  ;;  %v13356_v30 = vld [vmem:[#allocation110_spill] sm:$0xff] }
 0x361   : > { %4330 = vmatprep.subr.bf16.mxu1 %v13320_v61  ;;  %v13357_v61 = vld [vmem:[#allocation111_spill] sm:$0xff] }
 0x363   : > { %4066 = vmatpush1.bf16.msra.mxu0 %v13321_v56  ;;  %v8466_v56 = vld [vmem:[%s13024_s5 + $0x204] ss:$16 sps:$4 sm:$0xff]  }
 0x364   : > { %4331 = vmatpush1.bf16.msra.mxu1 %v13322_v8  ;;  %4067 = vmatprep.subr.bf16.mxu0 %v13323_v53  ;;  %v13358_v8 = vld [vmem:[#allocation112_spill] sm:$0xff]  ;;  %v13359_v53 = vld [vmem:[#allocation113_spill] sm:$0xff] }
 0x365   : > { %4332 = vmatprep.subr.bf16.mxu1 %v13324_v36  ;;  %v13360_v36 = vld [vmem:[#allocation114_spill] sm:$0xff] }
 0x367   : > { %4068 = vmatpush1.bf16.msra.mxu0 %v13325_v11  ;;  %v8467_v11 = vld [vmem:[%s13024_s5 + $0x208] ss:$16 sps:$4 sm:$0xff]  }
 0x368   : > { %4333 = vmatpush1.bf16.msra.mxu1 %v13326_v14  ;;  %4069 = vmatprep.subr.bf16.mxu0 %v13327_v21  ;;  %v8472_v14 = vld [vmem:[%s13024_s5 + $0x224] ss:$16 sps:$4 sm:$0xff]   ;;  %v8475_v21 = vld [vmem:[%s13024_s5 + $0x22c] ss:$16 sps:$4 sm:$0xff]  }
 0x369   : > { %4334 = vmatprep.subr.bf16.mxu1 %v13328_v22  ;;  %v13361_v22 = vld [vmem:[#allocation9_spill] sm:$0xff] }
 0x36b   : > { %4070 = vmatpush1.bf16.msra.mxu0 %v13329_v0  ;;  %v8470_v0 = vld [vmem:[%s13024_s5 + $0x220] ss:$16 sps:$4 sm:$0xff]  }
 0x36c   : > { %4335 = vmatpush1.bf16.msra.mxu1 %v13330_v4  ;;  %4071 = vmatprep.subr.bf16.mxu0 %v13331_v10  ;;  %v8473_v4 = vld [vmem:[%s13024_s5 + $0x228] ss:$16 sps:$4 sm:$0xff]   ;;  %v8478_v10 = vld [vmem:[%s13024_s5 + $0x244] ss:$16 sps:$4 sm:$0xff]  }
 0x36d   : > { %4336 = vmatprep.subr.bf16.mxu1 %v13332_v32  ;;  %v8476_v32 = vld [vmem:[%s13024_s5 + $0x240] ss:$16 sps:$4 sm:$0xff]  }
 0x36f   : > { %4072 = vmatpush1.bf16.msra.mxu0 %v13333_v15  ;;  %v8479_v15 = vld [vmem:[%s13024_s5 + $0x248] ss:$16 sps:$4 sm:$0xff]  }
 0x370   : > { %4337 = vmatpush1.bf16.msra.mxu1 %v13334_v20  ;;  %4073 = vmatprep.subr.bf16.mxu0 %v13335_v23  ;;  %v8484_v20 = vld [vmem:[%s13024_s5 + $0x264] ss:$16 sps:$4 sm:$0xff]   ;;  %v13362_v23 = vld [vmem:[#allocation8_spill] sm:$0xff] }
 0x371   : > { %4338 = vmatprep.subr.bf16.mxu1 %v13336_v2  ;;  %v8487_v2 = vld [vmem:[%s13024_s5 + $0x26c] ss:$16 sps:$4 sm:$0xff]  }
 0x373   : > { %4074 = vmatpush1.bf16.msra.mxu0 %v13337_v12  ;;  %v8482_v12 = vld [vmem:[%s13024_s5 + $0x260] ss:$16 sps:$4 sm:$0xff]  }
 0x374   : > { %4339 = vmatpush1.bf16.msra.mxu1 %v13338_v54  ;;  %4075 = vmatprep.subr.bf16.mxu0 %v13339_v55  ;;  %v8485_v54 = vld [vmem:[%s13024_s5 + $0x268] ss:$16 sps:$4 sm:$0xff]   ;;  %v8490_v55 = vld [vmem:[%s13024_s5 + $0x284] ss:$16 sps:$4 sm:$0xff]  }
 0x375   : > { %4340 = vmatprep.subr.bf16.mxu1 %v13340_v3  ;;  %v8493_v3 = vld [vmem:[%s13024_s5 + $0x28c] ss:$16 sps:$4 sm:$0xff]  }
 0x377   : > { %4076 = vmatpush1.bf16.msra.mxu0 %v13341_v29  ;;  %v8488_v29 = vld [vmem:[%s13024_s5 + $0x280] ss:$16 sps:$4 sm:$0xff]  }
 0x378   : > { %4341 = vmatpush1.bf16.msra.mxu1 %v13342_v34  ;;  %4077 = vmatprep.subr.bf16.mxu0 %v13343_v60  ;;  %v8491_v34 = vld [vmem:[%s13024_s5 + $0x288] ss:$16 sps:$4 sm:$0xff]   ;;  %v8496_v60 = vld [vmem:[%s13024_s5 + $0x2a4] ss:$16 sps:$4 sm:$0xff]  }
 0x379   : > { %4342 = vmatprep.subr.bf16.mxu1 %v13344_v58  ;;  %v8499_v58 = vld [vmem:[%s13024_s5 + $0x2ac] ss:$16 sps:$4 sm:$0xff]  }
 0x37b   : > { %4078 = vmatpush1.bf16.msra.mxu0 %v13345_v1  ;;  %v8494_v1 = vld [vmem:[%s13024_s5 + $0x2a0] ss:$16 sps:$4 sm:$0xff]  }
 0x37c   : > { %4343 = vmatpush1.bf16.msra.mxu1 %v13346_v47  ;;  %4079 = vmatprep.subr.bf16.mxu0 %v13347_v62  ;;  %v8497_v47 = vld [vmem:[%s13024_s5 + $0x2a8] ss:$16 sps:$4 sm:$0xff]   ;;  %v8502_v62 = vld [vmem:[%s13024_s5 + $0x2c4] ss:$16 sps:$4 sm:$0xff]  }
 0x37d   : > { %4344 = vmatprep.subr.bf16.mxu1 %v13348_v13  ;;  %v8505_v13 = vld [vmem:[%s13024_s5 + $0x2cc] ss:$16 sps:$4 sm:$0xff]  }
 0x37f   : > { %4080 = vmatpush1.bf16.msra.mxu0 %v13349_v41  ;;  %v8500_v41 = vld [vmem:[%s13024_s5 + $0x2c0] ss:$16 sps:$4 sm:$0xff]  }
 0x380   : > { %4345 = vmatpush1.bf16.msra.mxu1 %v13350_v59  ;;  %4081 = vmatprep.subr.bf16.mxu0 %v13351_v40  ;;  %v8503_v59 = vld [vmem:[%s13024_s5 + $0x2c8] ss:$16 sps:$4 sm:$0xff]   ;;  %v8508_v40 = vld [vmem:[%s13024_s5 + $0x2e4] ss:$16 sps:$4 sm:$0xff]  }
 0x381   : > { %4346 = vmatprep.subr.bf16.mxu1 %v13352_v38  ;;  %v8511_v38 = vld [vmem:[%s13024_s5 + $0x2ec] ss:$16 sps:$4 sm:$0xff]  }
 0x383   : > { %4082 = vmatpush1.bf16.msra.mxu0 %v13353_v39  ;;  %v8506_v39 = vld [vmem:[%s13024_s5 + $0x2e0] ss:$16 sps:$4 sm:$0xff]  }
 0x384   : > { %4347 = vmatpush1.bf16.msra.mxu1 %v11243_v37  ;;  %4083 = vmatprep.subr.bf16.mxu0 %v13354_v43  ;;  %v8469_v37 = vld [vmem:[%s13024_s5 + $0x20c] ss:$16 sps:$4 sm:$0xff]   ;;  %v8509_v43 = vld [vmem:[%s13024_s5 + $0x2e8] ss:$16 sps:$4 sm:$0xff]  }
 0x385   : > { %4348 = vmatprep.subr.bf16.mxu1 %v13355_v35  ;;  %v8514_v35 = vld [vmem:[%s13024_s5 + $0x304] ss:$16 sps:$4 sm:$0xff]  }
 0x387   : > { %4084 = vmatpush1.bf16.msra.mxu0 %v13356_v30  ;;  %v8517_v30 = vld [vmem:[%s13024_s5 + $0x30c] ss:$16 sps:$4 sm:$0xff]  }
 0x388   : > { %4349 = vmatpush1.bf16.msra.mxu1 %v11267_v25  ;;  %4085 = vmatprep.subr.bf16.mxu0 %v13357_v61  ;;  %v8464_v25 = vld [vmem:[%s13024_s5 + $0x200] ss:$16 sps:$4 sm:$0xff]  }
 0x389   : > { %4350 = vmatprep.subr.bf16.mxu1 %v13358_v8  ;;  %v8512_v61 = vld [vmem:[%s13024_s5 + $0x300] ss:$16 sps:$4 sm:$0xff]   ;;  %v8520_v8 = vld [vmem:[%s13024_s5 + $0x324] ss:$16 sps:$4 sm:$0xff]  }
 0x38b   : > { %4086 = vmatpush1.bf16.msra.mxu0 %v13359_v53  ;;  %v8518_v53 = vld [vmem:[%s13024_s5 + $0x320] ss:$16 sps:$4 sm:$0xff]  }
 0x38c   : > { %4351 = vmatpush1.bf16.msra.mxu1 %v13360_v36  ;;  %4870 = vmatprep.subr.bf16.mxu0 %v8466_v56  ;;  %v8515_v56 = vld [vmem:[%s13024_s5 + $0x308] ss:$16 sps:$4 sm:$0xff]  }
 0x38d   : > { %4911 = vmatprep.subr.bf16.mxu1 %v8469_v37  ;;  %v8523_v37 = vld [vmem:[%s13024_s5 + $0x32c] ss:$16 sps:$4 sm:$0xff]   ;;  %v8521_v36 = vld [vmem:[%s13024_s5 + $0x328] ss:$16 sps:$4 sm:$0xff]  }
 0x38e   : > { %4088 = vmatmul.mubr.bf16.vlgmr.msra.gmra.mrb[56].mxu0 %v10256_v28 }
 0x38f   : > { %4353 = vmatmul.mubr.bf16.vlgmr.msra.gmra.mrb[56].mxu1 %v10256_v28  ;;  %4097 = vmatprep.mubr.bf16.mxu0 %v13361_v22  ;;  %v8481_v28 = vld [vmem:[%s13024_s5 + $0x24c] ss:$16 sps:$4 sm:$0xff]  }
 0x390   : > { %4362 = vmatprep.mubr.bf16.mxu1 %v13361_v22  ;;  %4871 = vmatpush1.bf16.msra.mxu0 %v8464_v25  ;;  %v8526_v25 = vld [vmem:[%s13024_s5 + $0x344] ss:$16 sps:$4 sm:$0xff]  }
 0x391   : > { %4912 = vmatpush1.bf16.msra.mxu1 %v8467_v11  ;;  %4872 = vmatprep.subr.bf16.mxu0 %v8472_v14  ;;  %v8529_v11 = vld [vmem:[%s13024_s5 + $0x34c] ss:$16 sps:$4 sm:$0xff]   ;;  %v8524_v14 = vld [vmem:[%s13024_s5 + $0x340] ss:$16 sps:$4 sm:$0xff]   ;;  %v8532_v22 = vld [vmem:[%s13024_s5 + $0x364] ss:$16 sps:$4 sm:$0xff]  }
 0x392   : > { %4913 = vmatprep.subr.bf16.mxu1 %v8475_v21  ;;  %v8527_v21 = vld [vmem:[%s13024_s5 + $0x348] ss:$16 sps:$4 sm:$0xff]  }
 0x394   : > { %4873 = vmatpush1.bf16.msra.mxu0 %v8470_v0  ;;  %v8535_v0 = vld [vmem:[%s13024_s5 + $0x36c] ss:$16 sps:$4 sm:$0xff]  }
 0x395   : > { %4914 = vmatpush1.bf16.msra.mxu1 %v8473_v4  ;;  %4874 = vmatprep.subr.bf16.mxu0 %v8478_v10  ;;  %v8530_v4 = vld [vmem:[%s13024_s5 + $0x360] ss:$16 sps:$4 sm:$0xff]   ;;  %v8533_v10 = vld [vmem:[%s13024_s5 + $0x368] ss:$16 sps:$4 sm:$0xff]  }
 0x396   : > { %4098 = vmatmul.mubr.bf16.gmra.mrb[60].mxu0 %v13362_v23  ;;  %4915 = vmatprep.subr.bf16.mxu1 %v8481_v28  ;;  %v8538_v28 = vld [vmem:[%s13024_s5 + $0x384] ss:$16 sps:$4 sm:$0xff]  }
 0x397   : > { %4363 = vmatmul.mubr.bf16.gmra.mrb[60].mxu1 %v13362_v23  ;;  %v8544_v23 = vld [vmem:[%s13024_s5 + $0x3a4] ss:$16 sps:$4 sm:$0xff]  }
 0x398   : > { %4875 = vmatpush1.bf16.msra.mxu0 %v8476_v32  ;;  %v8541_v32 = vld [vmem:[%s13024_s5 + $0x38c] ss:$16 sps:$4 sm:$0xff]  }
 0x399   : > { %4916 = vmatpush1.bf16.msra.mxu1 %v8479_v15  ;;  %4876 = vmatprep.subr.bf16.mxu0 %v8484_v20  ;;  %v8536_v15 = vld [vmem:[%s13024_s5 + $0x380] ss:$16 sps:$4 sm:$0xff]   ;;  %v8539_v20 = vld [vmem:[%s13024_s5 + $0x388] ss:$16 sps:$4 sm:$0xff]  }
 0x39a   : > { %4917 = vmatprep.subr.bf16.mxu1 %v8487_v2  ;;  %v8547_v2 = vld [vmem:[%s13024_s5 + $0x3ac] ss:$16 sps:$4 sm:$0xff]  }
 0x39c   : > { %4877 = vmatpush1.bf16.msra.mxu0 %v8482_v12  ;;  %v8542_v12 = vld [vmem:[%s13024_s5 + $0x3a0] ss:$16 sps:$4 sm:$0xff]  }
 0x39d   : > { %4918 = vmatpush1.bf16.msra.mxu1 %v8485_v54  ;;  %4878 = vmatprep.subr.bf16.mxu0 %v8490_v55  ;;  %v8545_v54 = vld [vmem:[%s13024_s5 + $0x3a8] ss:$16 sps:$4 sm:$0xff]   ;;  %v8550_v55 = vld [vmem:[%s13024_s5 + $0x3c4] ss:$16 sps:$4 sm:$0xff]  }
 0x39e   : > { %4919 = vmatprep.subr.bf16.mxu1 %v8493_v3  ;;  %v8553_v3 = vld [vmem:[%s13024_s5 + $0x3cc] ss:$16 sps:$4 sm:$0xff]  }
 0x3a0   : > { %4879 = vmatpush1.bf16.msra.mxu0 %v8488_v29  ;;  %v8548_v29 = vld [vmem:[%s13024_s5 + $0x3c0] ss:$16 sps:$4 sm:$0xff]  }
 0x3a1   : > { %4920 = vmatpush1.bf16.msra.mxu1 %v8491_v34  ;;  %4880 = vmatprep.subr.bf16.mxu0 %v8496_v60  ;;  %v8551_v34 = vld [vmem:[%s13024_s5 + $0x3c8] ss:$16 sps:$4 sm:$0xff]   ;;  %v8556_v60 = vld [vmem:[%s13024_s5 + $0x3e4] ss:$16 sps:$4 sm:$0xff]  }
 0x3a2   : > { %4921 = vmatprep.subr.bf16.mxu1 %v8499_v58  ;;  %v8559_v58 = vld [vmem:[%s13024_s5 + $0x3ec] ss:$16 sps:$4 sm:$0xff]  }
 0x3a4   : > { %4881 = vmatpush1.bf16.msra.mxu0 %v8494_v1  ;;  %v8554_v1 = vld [vmem:[%s13024_s5 + $0x3e0] ss:$16 sps:$4 sm:$0xff]  }
 0x3a5   : > { %4922 = vmatpush1.bf16.msra.mxu1 %v8497_v47  ;;  %4882 = vmatprep.subr.bf16.mxu0 %v8502_v62  ;;  %v8557_v47 = vld [vmem:[%s13024_s5 + $0x3e8] ss:$16 sps:$4 sm:$0xff]   ;;  %v8562_v62 = vld [vmem:[%s13024_s5 + $0x4] ss:$16 sps:$4 sm:$0xff]  }
 0x3a6   : > { %4923 = vmatprep.subr.bf16.mxu1 %v8505_v13  ;;  %v8565_v13 = vld [vmem:[%s13024_s5 + $0xc] ss:$16 sps:$4 sm:$0xff]  }
 0x3a8   : > { %4883 = vmatpush1.bf16.msra.mxu0 %v8500_v41  ;;  %v4389_v41 = vld [vmem:[%s13023_s4] sm:$0x3] }
 0x3a9   : > { %4924 = vmatpush1.bf16.msra.mxu1 %v8503_v59  ;;  %4884 = vmatprep.subr.bf16.mxu0 %v8508_v40 }
 0x3aa   : > { %4925 = vmatprep.subr.bf16.mxu1 %v8511_v38 }
 0x3ac   : > { %4885 = vmatpush1.bf16.msra.mxu0 %v8506_v39 }
 0x3ad   : > { %4926 = vmatpush1.bf16.msra.mxu1 %v8509_v43  ;;  %4886 = vmatprep.subr.bf16.mxu0 %v8514_v35  ;;  %v13363_v43 = vld [vmem:[#allocation6_spill] sm:$0xff] }
 0x3ae   : > { %4927 = vmatprep.subr.bf16.mxu1 %v8517_v30  ;;  %v4394_v35 = vrot.slane %v4389_v41, %v13363_v43 }
 0x3b0   : > { %4887 = vmatpush1.bf16.msra.mxu0 %v8512_v61 }
 0x3b1   : > { %4928 = vmatpush1.bf16.msra.mxu1 %v8515_v56  ;;  %4888 = vmatprep.subr.bf16.mxu0 %v8520_v8 }
 0x3b2   : > { %4929 = vmatprep.subr.bf16.mxu1 %v8523_v37 }
 0x3b4   : > { %4889 = vmatpush1.bf16.msra.mxu0 %v8518_v53 }
 0x3b5   : > { %4930 = vmatpush1.bf16.msra.mxu1 %v8521_v36  ;;  %4890 = vmatprep.subr.bf16.mxu0 %v8526_v25  ;;  %v13364_v36 = vld [vmem:[#allocation7_spill] sm:$0xff] }
 0x3b6   : > { %4931 = vmatprep.subr.bf16.mxu1 %v8529_v11  ;;  %v4398_v25 = vrot.slane %v4389_v41, %v13364_v36  ;;  %v8581_v41 = vld [vmem:[%s13024_s5 + $0x68] ss:$16 sps:$4 sm:$0xff]  }
 0x3b8   : > { %4891 = vmatpush1.bf16.msra.mxu0 %v8524_v14 }
 0x3b9   : > { %4932 = vmatpush1.bf16.msra.mxu1 %v8527_v21  ;;  %4892 = vmatprep.subr.bf16.mxu0 %v8532_v22 }
 0x3ba   : > { %4933 = vmatprep.subr.bf16.mxu1 %v8535_v0 }
 0x3bc   : > { %4893 = vmatpush1.bf16.msra.mxu0 %v8530_v4 }
 0x3bd   : > { %4934 = vmatpush1.bf16.msra.mxu1 %v8533_v10  ;;  %4894 = vmatprep.subr.bf16.mxu0 %v8538_v28 }
 0x3be   : > { %4935 = vmatprep.subr.bf16.mxu1 %v8541_v32 }
 0x3c0   : > { %4895 = vmatpush1.bf16.msra.mxu0 %v8536_v15 }
 0x3c1   : > { %4936 = vmatpush1.bf16.msra.mxu1 %v8539_v20  ;;  %4896 = vmatprep.subr.bf16.mxu0 %v8544_v23 }
 0x3c2   : > { %4937 = vmatprep.subr.bf16.mxu1 %v8547_v2 }
 0x3c4   : > { %4897 = vmatpush1.bf16.msra.mxu0 %v8542_v12 }
 0x3c5   : > { %4938 = vmatpush1.bf16.msra.mxu1 %v8545_v54  ;;  %4898 = vmatprep.subr.bf16.mxu0 %v8550_v55 }
 0x3c6   : > { %4939 = vmatprep.subr.bf16.mxu1 %v8553_v3  ;;  %v8560_v3 = vld [vmem:[%s13024_s5] ss:$16 sps:$4 sm:$0xff]  }
 0x3c8   : > { %4899 = vmatpush1.bf16.msra.mxu0 %v8548_v29  ;;  %v8563_v29 = vld [vmem:[%s13024_s5 + $0x8] ss:$16 sps:$4 sm:$0xff]  }
 0x3c9   : > { %4940 = vmatpush1.bf16.msra.mxu1 %v8551_v34  ;;  %4900 = vmatprep.subr.bf16.mxu0 %v8556_v60 }
 0x3ca   : > { %4941 = vmatprep.subr.bf16.mxu1 %v8559_v58  ;;  %v8572_v58 = vld [vmem:[%s13024_s5 + $0x40] ss:$16 sps:$4 sm:$0xff]  }
 0x3cc   : > { %4901 = vmatpush1.bf16.msra.mxu0 %v8554_v1  ;;  %v8575_v1 = vld [vmem:[%s13024_s5 + $0x48] ss:$16 sps:$4 sm:$0xff]  }
 0x3cd   : > { %4942 = vmatpush1.bf16.msra.mxu1 %v8557_v47  ;;  %5272 = vmatprep.subr.bf16.mxu0 %v8562_v62  ;;  %v8580_v47 = vld [vmem:[%s13024_s5 + $0x64] ss:$16 sps:$4 sm:$0xff]   ;;  %v8583_v62 = vld [vmem:[%s13024_s5 + $0x6c] ss:$16 sps:$4 sm:$0xff]  }
 0x3ce   : > { %5313 = vmatprep.subr.bf16.mxu1 %v8565_v13  ;;  %v8578_v13 = vld [vmem:[%s13024_s5 + $0x60] ss:$16 sps:$4 sm:$0xff]  }
 0x461   : > { %v4089_v59 = vpop.f32.mrb[56].mxu0 }
 0x462   : > { %v4354_v40 = vpop.f32.mrb[56].mxu1  ;;  %v4091_v38 = vpop.f32.mrb[57].mxu0 }
 0x463   : > { %v4373_v39 = vmax.f32 %v4089_v59, %v4354_v40  ;;  %v4356_v30 = vpop.f32.mrb[57].mxu1  ;;  %v4093_v61 = vpop.f32.mrb[58].mxu0  ;;  %v8586_v59 = vld [vmem:[%s13024_s5 + $0x84] ss:$16 sps:$4 sm:$0xff]   ;;  %v8589_v40 = vld [vmem:[%s13024_s5 + $0x8c] ss:$16 sps:$4 sm:$0xff]  }
 0x464   : > { %v4374_v56 = vmax.f32 %v4091_v38, %v4356_v30  ;;  %v4358_v8 = vpop.f32.mrb[58].mxu1  ;;  %v4095_v37 = vpop.f32.mrb[59].mxu0  ;;  %v8584_v38 = vld [vmem:[%s13024_s5 + $0x80] ss:$16 sps:$4 sm:$0xff]   ;;  %v8595_v30 = vld [vmem:[%s13024_s5 + $0xac] ss:$16 sps:$4 sm:$0xff]  }
 0x465   : > { %v4381_v53 = vmax.f32 %v3833_v5, %v4373_v39  ;;  %v4375_v11 = vmax.f32 %v4093_v61, %v4358_v8  ;;  %v4360_v14 = vpop.f32.mrb[59].mxu1  ;;  %v8587_v39 = vld [vmem:[%s13024_s5 + $0x88] ss:$16 sps:$4 sm:$0xff]   ;;  %v8590_v61 = vld [vmem:[%s13024_s5 + $0xa0] ss:$16 sps:$4 sm:$0xff]  }
 0x466   : > { %v4382_v21 = vmax.f32 %v3834_v45, %v4374_v56  ;;  %v4376_v22 = vmax.f32 %v4095_v37, %v4360_v14  ;;  %v8593_v56 = vld [vmem:[%s13024_s5 + $0xa8] ss:$16 sps:$4 sm:$0xff]   ;;  %v8598_v8 = vld [vmem:[%s13024_s5 + $0xc4] ss:$16 sps:$4 sm:$0xff]   ;;  %v8601_v37 = vld [vmem:[%s13024_s5 + $0xcc] ss:$16 sps:$4 sm:$0xff]  }
 0x467   : > { %v12263_v0 = vadd.f32 %v4394_v35, %v4381_v53  ;;  %v4383_v4 = vmax.f32 %v3835_v17, %v4375_v11  ;;  %v8596_v53 = vld [vmem:[%s13024_s5 + $0xc0] ss:$16 sps:$4 sm:$0xff]   ;;  %v8604_v11 = vld [vmem:[%s13024_s5 + $0xe4] ss:$16 sps:$4 sm:$0xff]   ;;  %v8607_v14 = vld [vmem:[%s13024_s5 + $0xec] ss:$16 sps:$4 sm:$0xff]  }
 0x468   : > { %v4384_v19 = vmax.f32 %v3836_v63, %v4376_v22  ;;  %v4402_v6 = vadd.f32 %v4398_v25, %v4382_v21  ;;  %v8602_v21 = vld [vmem:[%s13024_s5 + $0xe0] ss:$16 sps:$4 sm:$0xff]   ;;  %v8605_v22 = vld [vmem:[%s13024_s5 + $0xe8] ss:$16 sps:$4 sm:$0xff]  }
 0x469   : > { %v4403_v5 = vadd.f32 %v4394_v35, %v4383_v4  ;;  %v4099_v10 = vpop.f32.mrb[60].mxu0  ;;  %v8610_v4 = vld [vmem:[%s13024_s5 + $0x104] ss:$16 sps:$4 sm:$0xff]  }
 0x46a   : > { %v4404_v28 = vadd.f32 %v4398_v25, %v4384_v19  ;;  %v4364_v32 = vpop.f32.mrb[60].mxu1  ;;  %v4101_v15 = vpop.f32.mrb[61].mxu0  ;;  %v4410_v17 = vmax.f32 %v4402_v6, 0.0  ;;  %v8613_v19 = vld [vmem:[%s13024_s5 + $0x10c] ss:$16 sps:$4 sm:$0xff]  }
 0x46b   : > { %v4411_v20 = vmax.f32 %v4403_v5, 0.0  ;;  %v4377_v9 = vmax.f32 %v4099_v10, %v4364_v32  ;;  %v4366_v42 = vpop.f32.mrb[61].mxu1  ;;  %v4103_v45 = vpop.f32.mrb[62].mxu0  ;;  %v8608_v6 = vld [vmem:[%s13024_s5 + $0x100] ss:$16 sps:$4 sm:$0xff]  }
 0x46c   : > { %v4378_v23 = vmax.f32 %v4101_v15, %v4366_v42  ;;  %v4368_v2 = vpop.f32.mrb[62].mxu1  ;;  %v4105_v12 = vpop.f32.mrb[63].mxu0  ;;  %v4412_v54 = vmax.f32 %v4404_v28, 0.0  ;;  %v4418_v31 = vpack.c.bf16 %v4410_v17, %v4410_v17  ;;  %v8611_v5 = vld [vmem:[%s13024_s5 + $0x108] ss:$16 sps:$4 sm:$0xff]  }
 0x46d   : > { %v4385_v18 = vmax.f32 %v3837_v26, %v4377_v9  ;;  %v4379_v46 = vmax.f32 %v4103_v45, %v4368_v2  ;;  %v4370_v16 = vpop.f32.mrb[63].mxu1  ;;  %v4483_v34 = vpack.c.bf16 %v4411_v20, %v4411_v20  ;;  %v8616_v10 = vld [vmem:[%s13024_s5 + $0x124] ss:$16 sps:$4 sm:$0xff]   ;;  %v8619_v28 = vld [vmem:[%s13024_s5 + $0x12c] ss:$16 sps:$4 sm:$0xff]  }
 0x46e   : > { %v4386_v49 = vmax.f32 %v3838_v33, %v4378_v23  ;;  %v4380_v63 = vmax.f32 %v4105_v12, %v4370_v16  ;;  %v4484_v55 = vpack.c.bf16 %v4412_v54, %v4412_v54  ;;  %v8571_v33 = vld [vmem:[%s13024_s5 + $0x2c] ss:$16 sps:$4 sm:$0xff]   ;;  %v8614_v32 = vld [vmem:[%s13024_s5 + $0x120] ss:$16 sps:$4 sm:$0xff]   ;;  %v8617_v15 = vld [vmem:[%s13024_s5 + $0x128] ss:$16 sps:$4 sm:$0xff]  }
 0x46f   : > { %v12283_v44 = vadd.f32 %v4394_v35, %v4385_v18  ;;  %v4387_v48 = vmax.f32 %v3839_v50, %v4379_v46  ;;  %v8569_v50 = vld [vmem:[%s13024_s5 + $0x28] ss:$16 sps:$4 sm:$0xff]   ;;  %v8622_v20 = vld [vmem:[%s13024_s5 + $0x144] ss:$16 sps:$4 sm:$0xff]   ;;  %v8625_v9 = vld [vmem:[%s13024_s5 + $0x14c] ss:$16 sps:$4 sm:$0xff]  }
 0x470   : > { %v12288_v26 = vadd.f32 %v4398_v25, %v4386_v49  ;;  %v4388_v7 = vmax.f32 %v3840_v52, %v4380_v63  ;;  %4902 = vmatprep.mubr.bf16.mxu0 %v4484_v55  ;;  %4943 = vmatprep.mubr.bf16.mxu1 %v4484_v55  ;;  %v8577_v52 = vld [vmem:[%s13024_s5 + $0x4c] ss:$16 sps:$4 sm:$0xff]   ;;  %v8620_v42 = vld [vmem:[%s13024_s5 + $0x140] ss:$16 sps:$4 sm:$0xff]   ;;  %v8623_v45 = vld [vmem:[%s13024_s5 + $0x148] ss:$16 sps:$4 sm:$0xff]  }
 0x471   : > { %v12299_v60 = vadd.f32 %v4394_v35, %v4387_v48  ;;  %4903 = vmatmul.mubr.bf16.vlgmr.msra.gmra.mrb[64].mxu0 %v4483_v34  ;;  %4944 = vmatmul.mubr.bf16.vlgmr.msra.gmra.mrb[64].mxu1 %v4483_v34  ;;  %v8592_v35 = vld [vmem:[%s13024_s5 + $0xa4] ss:$16 sps:$4 sm:$0xff]   ;;  %v8631_v2 = vld [vmem:[%s13024_s5 + $0x16c] ss:$16 sps:$4 sm:$0xff]   ;;  %v8626_v12 = vld [vmem:[%s13024_s5 + $0x160] ss:$16 sps:$4 sm:$0xff]  }
 0x472   : > { %v12301_v57 = vadd.f32 %v4398_v25, %v4388_v7  ;;  %5273 = vmatpush1.bf16.msra.mxu0 %v8560_v3  ;;  %5314 = vmatpush1.bf16.msra.mxu1 %v8563_v29  ;;  %v8599_v25 = vld [vmem:[%s13024_s5 + $0xc8] ss:$16 sps:$4 sm:$0xff]   ;;  %v8628_v23 = vld [vmem:[%s13024_s5 + $0x164] ss:$16 sps:$4 sm:$0xff]   ;;  %v8637_v46 = vld [vmem:[%s13024_s5 + $0x18c] ss:$16 sps:$4 sm:$0xff]  }
 0x473   : > { %5304 = vmatprep.mubr.bf16.mxu0 %v4418_v31  ;;  %5345 = vmatprep.mubr.bf16.mxu1 %v4418_v31  ;;  %v8629_v54 = vld [vmem:[%s13024_s5 + $0x168] ss:$16 sps:$4 sm:$0xff]   ;;  %v8634_v18 = vld [vmem:[%s13024_s5 + $0x184] ss:$16 sps:$4 sm:$0xff]   ;;  %v8632_v16 = vld [vmem:[%s13024_s5 + $0x180] ss:$16 sps:$4 sm:$0xff]  }
 0x474   : > { %5274 = vmatprep.subr.bf16.mxu0 %v8568_v27  ;;  %5315 = vmatprep.subr.bf16.mxu1 %v8571_v33  ;;  %v8635_v17 = vld [vmem:[%s13024_s5 + $0x188] ss:$16 sps:$4 sm:$0xff]   ;;  %v8640_v49 = vld [vmem:[%s13024_s5 + $0x1a4] ss:$16 sps:$4 sm:$0xff]   ;;  %v8643_v63 = vld [vmem:[%s13024_s5 + $0x1ac] ss:$16 sps:$4 sm:$0xff]  }
 0x475   : > { %v8638_v55 = vld [vmem:[%s13024_s5 + $0x1a0] ss:$16 sps:$4 sm:$0xff]   ;;  %v8641_v3 = vld [vmem:[%s13024_s5 + $0x1a8] ss:$16 sps:$4 sm:$0xff]   ;;  %v8646_v29 = vld [vmem:[%s13024_s5 + $0x1c4] ss:$16 sps:$4 sm:$0xff]  }
 0x476   : > { %5275 = vmatpush1.bf16.msra.mxu0 %v8566_v24  ;;  %5316 = vmatpush1.bf16.msra.mxu1 %v8569_v50  ;;  %v8649_v34 = vld [vmem:[%s13024_s5 + $0x1cc] ss:$16 sps:$4 sm:$0xff]   ;;  %v8644_v48 = vld [vmem:[%s13024_s5 + $0x1c0] ss:$16 sps:$4 sm:$0xff]   ;;  %v8647_v7 = vld [vmem:[%s13024_s5 + $0x1c8] ss:$16 sps:$4 sm:$0xff]  }
 0x477   : > { %5276 = vmatprep.subr.bf16.mxu0 %v8574_v51  ;;  %5317 = vmatprep.subr.bf16.mxu1 %v8577_v52  ;;  %v8652_v27 = vld [vmem:[%s13024_s5 + $0x1e4] ss:$16 sps:$4 sm:$0xff]   ;;  %v8655_v33 = vld [vmem:[%s13024_s5 + $0x1ec] ss:$16 sps:$4 sm:$0xff]   ;;  %v8650_v31 = vld [vmem:[%s13024_s5 + $0x1e0] ss:$16 sps:$4 sm:$0xff]  }
 0x478   : > { %v8653_v24 = vld [vmem:[%s13024_s5 + $0x1e8] ss:$16 sps:$4 sm:$0xff]   ;;  %v4409_v50 = vmax.f32 %v12263_v0, 0.0  ;;  %v8658_v51 = vld [vmem:[%s13024_s5 + $0x404] ss:$16 sps:$4 sm:$0xff]  }
 0x479   : > { %v8661_v52 = vld [vmem:[%s13024_s5 + $0x40c] ss:$16 sps:$4 sm:$0xff]   ;;  %v8659_v0 = vld [vmem:[%s13024_s5 + $0x408] ss:$16 sps:$4 sm:$0xff]  }
 0x47a   : > { %5277 = vmatpush1.bf16.msra.mxu0 %v8572_v58  ;;  %5318 = vmatpush1.bf16.msra.mxu1 %v8575_v1  ;;  %v4414_v58 = vmax.f32 %v12288_v26, 0.0  ;;  %v8656_v1 = vld [vmem:[%s13024_s5 + $0x400] ss:$16 sps:$4 sm:$0xff]   ;;  %v8667_v26 = vld [vmem:[%s13024_s5 + $0x42c] ss:$16 sps:$4 sm:$0xff]  }
 0x47b   : > { %5278 = vmatprep.subr.bf16.mxu0 %v8580_v47  ;;  %5319 = vmatprep.subr.bf16.mxu1 %v8583_v62  ;;  %v4417_v47 = vpack.c.bf16 %v4409_v50, %v4409_v50  ;;  %v8737_v50 = vld [vmem:[%s13024_s5 + $0x5a8] ss:$16 sps:$4 sm:$0xff]  }
 0x47c   : > { %v5355_v62 = vpack.c.bf16 %v4414_v58, %v4414_v58  ;;  %v8740_v58 = vld [vmem:[%s13024_s5 + $0x5c0] ss:$16 sps:$4 sm:$0xff]  }
 0x47e   : > { %5279 = vmatpush1.bf16.msra.mxu0 %v8578_v13  ;;  %5320 = vmatpush1.bf16.msra.mxu1 %v8581_v41  ;;  %v8664_v13 = vld [vmem:[%s13024_s5 + $0x424] ss:$16 sps:$4 sm:$0xff]   ;;  %v8662_v41 = vld [vmem:[%s13024_s5 + $0x420] ss:$16 sps:$4 sm:$0xff]  }
 0x47f   : > { %5280 = vmatprep.subr.bf16.mxu0 %v8586_v59  ;;  %5321 = vmatprep.subr.bf16.mxu1 %v8589_v40  ;;  %v8665_v59 = vld [vmem:[%s13024_s5 + $0x428] ss:$16 sps:$4 sm:$0xff]   ;;  %v8670_v40 = vld [vmem:[%s13024_s5 + $0x444] ss:$16 sps:$4 sm:$0xff]  }
 0x482   : > { %5281 = vmatpush1.bf16.msra.mxu0 %v8584_v38  ;;  %5322 = vmatpush1.bf16.msra.mxu1 %v8587_v39  ;;  %v8673_v38 = vld [vmem:[%s13024_s5 + $0x44c] ss:$16 sps:$4 sm:$0xff]   ;;  %v8668_v39 = vld [vmem:[%s13024_s5 + $0x440] ss:$16 sps:$4 sm:$0xff]  }
 0x483   : > { %5282 = vmatprep.subr.bf16.mxu0 %v8592_v35  ;;  %5323 = vmatprep.subr.bf16.mxu1 %v8595_v30  ;;  %v8671_v35 = vld [vmem:[%s13024_s5 + $0x448] ss:$16 sps:$4 sm:$0xff]   ;;  %v8676_v30 = vld [vmem:[%s13024_s5 + $0x464] ss:$16 sps:$4 sm:$0xff]  }
 0x486   : > { %5283 = vmatpush1.bf16.msra.mxu0 %v8590_v61  ;;  %5324 = vmatpush1.bf16.msra.mxu1 %v8593_v56  ;;  %v8679_v61 = vld [vmem:[%s13024_s5 + $0x46c] ss:$16 sps:$4 sm:$0xff]   ;;  %v8674_v56 = vld [vmem:[%s13024_s5 + $0x460] ss:$16 sps:$4 sm:$0xff]  }
 0x487   : > { %5284 = vmatprep.subr.bf16.mxu0 %v8598_v8  ;;  %5325 = vmatprep.subr.bf16.mxu1 %v8601_v37  ;;  %v8677_v8 = vld [vmem:[%s13024_s5 + $0x468] ss:$16 sps:$4 sm:$0xff]   ;;  %v8682_v37 = vld [vmem:[%s13024_s5 + $0x484] ss:$16 sps:$4 sm:$0xff]  }
 0x48a   : > { %5285 = vmatpush1.bf16.msra.mxu0 %v8596_v53  ;;  %5326 = vmatpush1.bf16.msra.mxu1 %v8599_v25  ;;  %v8685_v53 = vld [vmem:[%s13024_s5 + $0x48c] ss:$16 sps:$4 sm:$0xff]   ;;  %v8680_v25 = vld [vmem:[%s13024_s5 + $0x480] ss:$16 sps:$4 sm:$0xff]  }
 0x48b   : > { %5286 = vmatprep.subr.bf16.mxu0 %v8604_v11  ;;  %5327 = vmatprep.subr.bf16.mxu1 %v8607_v14  ;;  %v8683_v11 = vld [vmem:[%s13024_s5 + $0x488] ss:$16 sps:$4 sm:$0xff]   ;;  %v8688_v14 = vld [vmem:[%s13024_s5 + $0x4a4] ss:$16 sps:$4 sm:$0xff]  }
 0x48e   : > { %5287 = vmatpush1.bf16.msra.mxu0 %v8602_v21  ;;  %5328 = vmatpush1.bf16.msra.mxu1 %v8605_v22  ;;  %v8691_v21 = vld [vmem:[%s13024_s5 + $0x4ac] ss:$16 sps:$4 sm:$0xff]   ;;  %v8686_v22 = vld [vmem:[%s13024_s5 + $0x4a0] ss:$16 sps:$4 sm:$0xff]  }
 0x48f   : > { %5288 = vmatprep.subr.bf16.mxu0 %v8610_v4  ;;  %5329 = vmatprep.subr.bf16.mxu1 %v8613_v19  ;;  %v8689_v4 = vld [vmem:[%s13024_s5 + $0x4a8] ss:$16 sps:$4 sm:$0xff]   ;;  %v8694_v19 = vld [vmem:[%s13024_s5 + $0x4c4] ss:$16 sps:$4 sm:$0xff]  }
 0x492   : > { %5289 = vmatpush1.bf16.msra.mxu0 %v8608_v6  ;;  %5330 = vmatpush1.bf16.msra.mxu1 %v8611_v5  ;;  %v8697_v6 = vld [vmem:[%s13024_s5 + $0x4cc] ss:$16 sps:$4 sm:$0xff]   ;;  %v8692_v5 = vld [vmem:[%s13024_s5 + $0x4c0] ss:$16 sps:$4 sm:$0xff]  }
 0x493   : > { %5290 = vmatprep.subr.bf16.mxu0 %v8616_v10  ;;  %5331 = vmatprep.subr.bf16.mxu1 %v8619_v28  ;;  %v8695_v10 = vld [vmem:[%s13024_s5 + $0x4c8] ss:$16 sps:$4 sm:$0xff]   ;;  %v8700_v28 = vld [vmem:[%s13024_s5 + $0x4e4] ss:$16 sps:$4 sm:$0xff]  }
 0x496   : > { %5291 = vmatpush1.bf16.msra.mxu0 %v8614_v32  ;;  %5332 = vmatpush1.bf16.msra.mxu1 %v8617_v15  ;;  %v8703_v32 = vld [vmem:[%s13024_s5 + $0x4ec] ss:$16 sps:$4 sm:$0xff]   ;;  %v8698_v15 = vld [vmem:[%s13024_s5 + $0x4e0] ss:$16 sps:$4 sm:$0xff]  }
 0x497   : > { %5292 = vmatprep.subr.bf16.mxu0 %v8622_v20  ;;  %5333 = vmatprep.subr.bf16.mxu1 %v8625_v9  ;;  %v8701_v20 = vld [vmem:[%s13024_s5 + $0x4e8] ss:$16 sps:$4 sm:$0xff]   ;;  %v8706_v9 = vld [vmem:[%s13024_s5 + $0x504] ss:$16 sps:$4 sm:$0xff]  }
 0x49a   : > { %5293 = vmatpush1.bf16.msra.mxu0 %v8620_v42  ;;  %5334 = vmatpush1.bf16.msra.mxu1 %v8623_v45  ;;  %v8709_v42 = vld [vmem:[%s13024_s5 + $0x50c] ss:$16 sps:$4 sm:$0xff]   ;;  %v8704_v45 = vld [vmem:[%s13024_s5 + $0x500] ss:$16 sps:$4 sm:$0xff]  }
 0x49b   : > { %5294 = vmatprep.subr.bf16.mxu0 %v8628_v23  ;;  %5335 = vmatprep.subr.bf16.mxu1 %v8631_v2  ;;  %v8707_v23 = vld [vmem:[%s13024_s5 + $0x508] ss:$16 sps:$4 sm:$0xff]   ;;  %v8712_v2 = vld [vmem:[%s13024_s5 + $0x524] ss:$16 sps:$4 sm:$0xff]  }
 0x49e   : > { %5295 = vmatpush1.bf16.msra.mxu0 %v8626_v12  ;;  %5336 = vmatpush1.bf16.msra.mxu1 %v8629_v54  ;;  %v8715_v12 = vld [vmem:[%s13024_s5 + $0x52c] ss:$16 sps:$4 sm:$0xff]   ;;  %v8710_v54 = vld [vmem:[%s13024_s5 + $0x520] ss:$16 sps:$4 sm:$0xff]  }
 0x49f   : > { %5296 = vmatprep.subr.bf16.mxu0 %v8634_v18  ;;  %5337 = vmatprep.subr.bf16.mxu1 %v8637_v46  ;;  %v8713_v18 = vld [vmem:[%s13024_s5 + $0x528] ss:$16 sps:$4 sm:$0xff]   ;;  %v8718_v46 = vld [vmem:[%s13024_s5 + $0x544] ss:$16 sps:$4 sm:$0xff]  }
 0x4a2   : > { %5297 = vmatpush1.bf16.msra.mxu0 %v8632_v16  ;;  %5338 = vmatpush1.bf16.msra.mxu1 %v8635_v17  ;;  %v8721_v16 = vld [vmem:[%s13024_s5 + $0x54c] ss:$16 sps:$4 sm:$0xff]   ;;  %v8716_v17 = vld [vmem:[%s13024_s5 + $0x540] ss:$16 sps:$4 sm:$0xff]  }
 0x4a3   : > { %5298 = vmatprep.subr.bf16.mxu0 %v8640_v49  ;;  %5339 = vmatprep.subr.bf16.mxu1 %v8643_v63  ;;  %v8719_v49 = vld [vmem:[%s13024_s5 + $0x548] ss:$16 sps:$4 sm:$0xff]   ;;  %v8724_v63 = vld [vmem:[%s13024_s5 + $0x564] ss:$16 sps:$4 sm:$0xff]  }
 0x4a6   : > { %5299 = vmatpush1.bf16.msra.mxu0 %v8638_v55  ;;  %5340 = vmatpush1.bf16.msra.mxu1 %v8641_v3  ;;  %v8727_v55 = vld [vmem:[%s13024_s5 + $0x56c] ss:$16 sps:$4 sm:$0xff]   ;;  %v8722_v3 = vld [vmem:[%s13024_s5 + $0x560] ss:$16 sps:$4 sm:$0xff]  }
 0x4a7   : > { %5300 = vmatprep.subr.bf16.mxu0 %v8646_v29  ;;  %5341 = vmatprep.subr.bf16.mxu1 %v8649_v34  ;;  %v8725_v29 = vld [vmem:[%s13024_s5 + $0x568] ss:$16 sps:$4 sm:$0xff]   ;;  %v8730_v34 = vld [vmem:[%s13024_s5 + $0x584] ss:$16 sps:$4 sm:$0xff]  }
 0x4aa   : > { %5301 = vmatpush1.bf16.msra.mxu0 %v8644_v48  ;;  %5342 = vmatpush1.bf16.msra.mxu1 %v8647_v7  ;;  %v8733_v48 = vld [vmem:[%s13024_s5 + $0x58c] ss:$16 sps:$4 sm:$0xff]   ;;  %v8728_v7 = vld [vmem:[%s13024_s5 + $0x580] ss:$16 sps:$4 sm:$0xff]  }
 0x4ab   : > { %5302 = vmatprep.subr.bf16.mxu0 %v8652_v27  ;;  %5343 = vmatprep.subr.bf16.mxu1 %v8655_v33  ;;  %v8731_v27 = vld [vmem:[%s13024_s5 + $0x588] ss:$16 sps:$4 sm:$0xff]   ;;  %v8736_v33 = vld [vmem:[%s13024_s5 + $0x5a4] ss:$16 sps:$4 sm:$0xff]  }
 0x4ae   : > { %5303 = vmatpush1.bf16.msra.mxu0 %v8650_v31  ;;  %5344 = vmatpush1.bf16.msra.mxu1 %v8653_v24  ;;  %v8739_v31 = vld [vmem:[%s13024_s5 + $0x5ac] ss:$16 sps:$4 sm:$0xff]   ;;  %v8734_v24 = vld [vmem:[%s13024_s5 + $0x5a0] ss:$16 sps:$4 sm:$0xff]  }
 0x4af   : > { %5741 = vmatprep.subr.bf16.mxu0 %v8658_v51  ;;  %5782 = vmatprep.subr.bf16.mxu1 %v8661_v52  ;;  %v8742_v51 = vld [vmem:[%s13024_s5 + $0x5c4] ss:$16 sps:$4 sm:$0xff]   ;;  %v8745_v52 = vld [vmem:[%s13024_s5 + $0x5cc] ss:$16 sps:$4 sm:$0xff]  }
 0x4b1   : > { %5305 = vmatmul.mubr.bf16.vlgmr.msra.gmra.mrb[68].mxu0 %v4417_v47  ;;  %5346 = vmatmul.mubr.bf16.vlgmr.msra.gmra.mrb[68].mxu1 %v4417_v47  ;;  %v8748_v47 = vld [vmem:[%s13024_s5 + $0x5e4] ss:$16 sps:$4 sm:$0xff]  }
 0x4b2   : > { %5742 = vmatpush1.bf16.msra.mxu0 %v8656_v1  ;;  %5773 = vmatprep.mubr.bf16.mxu0 %v5355_v62  ;;  %v8743_v1 = vld [vmem:[%s13024_s5 + $0x5c8] ss:$16 sps:$4 sm:$0xff]  }
 0x4b3   : > { %5783 = vmatpush1.bf16.msra.mxu1 %v8659_v0  ;;  %5814 = vmatprep.mubr.bf16.mxu1 %v5355_v62  ;;  %v8751_v0 = vld [vmem:[%s13024_s5 + $0x5ec] ss:$16 sps:$4 sm:$0xff]   ;;  %v8746_v62 = vld [vmem:[%s13024_s5 + $0x5e0] ss:$16 sps:$4 sm:$0xff]  }
 0x4b4   : > { %5743 = vmatprep.subr.bf16.mxu0 %v8664_v13  ;;  %5784 = vmatprep.subr.bf16.mxu1 %v8667_v26  ;;  %v4413_v13 = vmax.f32 %v12283_v44, 0.0  ;;  %v8749_v26 = vld [vmem:[%s13024_s5 + $0x5e8] ss:$16 sps:$4 sm:$0xff]   ;;  %v8752_v44 = vld [vmem:[%s13024_s5 + $0x600] ss:$16 sps:$4 sm:$0xff]  }
 0x4b6   : > { %5744 = vmatpush1.bf16.msra.mxu0 %v8662_v41  ;;  %v8754_v41 = vld [vmem:[%s13024_s5 + $0x604] ss:$16 sps:$4 sm:$0xff]  }
 0x4b7   : > { %5785 = vmatpush1.bf16.msra.mxu1 %v8665_v59  ;;  %5745 = vmatprep.subr.bf16.mxu0 %v8670_v40  ;;  %v8757_v59 = vld [vmem:[%s13024_s5 + $0x60c] ss:$16 sps:$4 sm:$0xff]   ;;  %v4416_v40 = vmax.f32 %v12301_v57, 0.0 }
 0x4b8   : > { %5786 = vmatprep.subr.bf16.mxu1 %v8673_v38  ;;  %v5354_v38 = vpack.c.bf16 %v4413_v13, %v4413_v13  ;;  %v8763_v57 = vld [vmem:[%s13024_s5 + $0x62c] ss:$16 sps:$4 sm:$0xff]   ;;  %v8838_v13 = vld [vmem:[%s13024_s5 + $0x7c4] ss:$16 sps:$4 sm:$0xff]  }
 0x4ba   : > { %5746 = vmatpush1.bf16.msra.mxu0 %v8668_v39  ;;  %v8755_v39 = vld [vmem:[%s13024_s5 + $0x608] ss:$16 sps:$4 sm:$0xff]  }
 0x4bb   : > { %5787 = vmatpush1.bf16.msra.mxu1 %v8671_v35  ;;  %5747 = vmatprep.subr.bf16.mxu0 %v8676_v30  ;;  %v8760_v35 = vld [vmem:[%s13024_s5 + $0x624] ss:$16 sps:$4 sm:$0xff]   ;;  %v5828_v30 = vpack.c.bf16 %v4416_v40, %v4416_v40 }
 0x4bc   : > { %5788 = vmatprep.subr.bf16.mxu1 %v8679_v61  ;;  %v8758_v61 = vld [vmem:[%s13024_s5 + $0x620] ss:$16 sps:$4 sm:$0xff]   ;;  %v8844_v40 = vld [vmem:[%s13024_s5 + $0x7e4] ss:$16 sps:$4 sm:$0xff]  }
 0x4be   : > { %5748 = vmatpush1.bf16.msra.mxu0 %v8674_v56  ;;  %v8761_v56 = vld [vmem:[%s13024_s5 + $0x628] ss:$16 sps:$4 sm:$0xff]  }
 0x4bf   : > { %5789 = vmatpush1.bf16.msra.mxu1 %v8677_v8  ;;  %5749 = vmatprep.subr.bf16.mxu0 %v8682_v37  ;;  %v8766_v8 = vld [vmem:[%s13024_s5 + $0x644] ss:$16 sps:$4 sm:$0xff]   ;;  %v8769_v37 = vld [vmem:[%s13024_s5 + $0x64c] ss:$16 sps:$4 sm:$0xff]  }
 0x4c0   : > { %5790 = vmatprep.subr.bf16.mxu1 %v8685_v53  ;;  %v8764_v53 = vld [vmem:[%s13024_s5 + $0x640] ss:$16 sps:$4 sm:$0xff]  }
 0x4c2   : > { %5750 = vmatpush1.bf16.msra.mxu0 %v8680_v25  ;;  %v8767_v25 = vld [vmem:[%s13024_s5 + $0x648] ss:$16 sps:$4 sm:$0xff]  }
 0x4c3   : > { %5791 = vmatpush1.bf16.msra.mxu1 %v8683_v11  ;;  %5751 = vmatprep.subr.bf16.mxu0 %v8688_v14  ;;  %v8772_v11 = vld [vmem:[%s13024_s5 + $0x664] ss:$16 sps:$4 sm:$0xff]   ;;  %v8775_v14 = vld [vmem:[%s13024_s5 + $0x66c] ss:$16 sps:$4 sm:$0xff]  }
 0x4c4   : > { %5792 = vmatprep.subr.bf16.mxu1 %v8691_v21  ;;  %v8770_v21 = vld [vmem:[%s13024_s5 + $0x660] ss:$16 sps:$4 sm:$0xff]  }
 0x4c6   : > { %5752 = vmatpush1.bf16.msra.mxu0 %v8686_v22  ;;  %v8773_v22 = vld [vmem:[%s13024_s5 + $0x668] ss:$16 sps:$4 sm:$0xff]  }
 0x4c7   : > { %5793 = vmatpush1.bf16.msra.mxu1 %v8689_v4  ;;  %5753 = vmatprep.subr.bf16.mxu0 %v8694_v19  ;;  %v8778_v4 = vld [vmem:[%s13024_s5 + $0x684] ss:$16 sps:$4 sm:$0xff]   ;;  %v8781_v19 = vld [vmem:[%s13024_s5 + $0x68c] ss:$16 sps:$4 sm:$0xff]  }
 0x4c8   : > { %5794 = vmatprep.subr.bf16.mxu1 %v8697_v6  ;;  %v8776_v6 = vld [vmem:[%s13024_s5 + $0x680] ss:$16 sps:$4 sm:$0xff]  }
 0x4ca   : > { %5754 = vmatpush1.bf16.msra.mxu0 %v8692_v5  ;;  %v8779_v5 = vld [vmem:[%s13024_s5 + $0x688] ss:$16 sps:$4 sm:$0xff]  }
 0x4cb   : > { %5795 = vmatpush1.bf16.msra.mxu1 %v8695_v10  ;;  %5755 = vmatprep.subr.bf16.mxu0 %v8700_v28  ;;  %v8784_v10 = vld [vmem:[%s13024_s5 + $0x6a4] ss:$16 sps:$4 sm:$0xff]   ;;  %v8787_v28 = vld [vmem:[%s13024_s5 + $0x6ac] ss:$16 sps:$4 sm:$0xff]  }
 0x4cc   : > { %5796 = vmatprep.subr.bf16.mxu1 %v8703_v32  ;;  %v8782_v32 = vld [vmem:[%s13024_s5 + $0x6a0] ss:$16 sps:$4 sm:$0xff]  }
 0x4ce   : > { %5756 = vmatpush1.bf16.msra.mxu0 %v8698_v15  ;;  %v8785_v15 = vld [vmem:[%s13024_s5 + $0x6a8] ss:$16 sps:$4 sm:$0xff]  }
 0x4cf   : > { %5797 = vmatpush1.bf16.msra.mxu1 %v8701_v20  ;;  %5757 = vmatprep.subr.bf16.mxu0 %v8706_v9  ;;  %v8790_v20 = vld [vmem:[%s13024_s5 + $0x6c4] ss:$16 sps:$4 sm:$0xff]   ;;  %v8793_v9 = vld [vmem:[%s13024_s5 + $0x6cc] ss:$16 sps:$4 sm:$0xff]  }
 0x4d0   : > { %5798 = vmatprep.subr.bf16.mxu1 %v8709_v42  ;;  %v8788_v42 = vld [vmem:[%s13024_s5 + $0x6c0] ss:$16 sps:$4 sm:$0xff]  }
 0x4d2   : > { %5758 = vmatpush1.bf16.msra.mxu0 %v8704_v45  ;;  %v8791_v45 = vld [vmem:[%s13024_s5 + $0x6c8] ss:$16 sps:$4 sm:$0xff]  }
 0x4d3   : > { %5799 = vmatpush1.bf16.msra.mxu1 %v8707_v23  ;;  %5759 = vmatprep.subr.bf16.mxu0 %v8712_v2  ;;  %v8796_v23 = vld [vmem:[%s13024_s5 + $0x6e4] ss:$16 sps:$4 sm:$0xff]   ;;  %v8799_v2 = vld [vmem:[%s13024_s5 + $0x6ec] ss:$16 sps:$4 sm:$0xff]  }
 0x4d4   : > { %5800 = vmatprep.subr.bf16.mxu1 %v8715_v12  ;;  %v8794_v12 = vld [vmem:[%s13024_s5 + $0x6e0] ss:$16 sps:$4 sm:$0xff]  }
 0x4d6   : > { %5760 = vmatpush1.bf16.msra.mxu0 %v8710_v54  ;;  %v8797_v54 = vld [vmem:[%s13024_s5 + $0x6e8] ss:$16 sps:$4 sm:$0xff]  }
 0x4d7   : > { %5801 = vmatpush1.bf16.msra.mxu1 %v8713_v18  ;;  %5761 = vmatprep.subr.bf16.mxu0 %v8718_v46  ;;  %v8802_v18 = vld [vmem:[%s13024_s5 + $0x704] ss:$16 sps:$4 sm:$0xff]   ;;  %v8805_v46 = vld [vmem:[%s13024_s5 + $0x70c] ss:$16 sps:$4 sm:$0xff]  }
 0x4d8   : > { %5802 = vmatprep.subr.bf16.mxu1 %v8721_v16  ;;  %v8800_v16 = vld [vmem:[%s13024_s5 + $0x700] ss:$16 sps:$4 sm:$0xff]  }
 0x4da   : > { %5762 = vmatpush1.bf16.msra.mxu0 %v8716_v17  ;;  %v8803_v17 = vld [vmem:[%s13024_s5 + $0x708] ss:$16 sps:$4 sm:$0xff]  }
 0x4db   : > { %5803 = vmatpush1.bf16.msra.mxu1 %v8719_v49  ;;  %5763 = vmatprep.subr.bf16.mxu0 %v8724_v63  ;;  %v8808_v49 = vld [vmem:[%s13024_s5 + $0x724] ss:$16 sps:$4 sm:$0xff]   ;;  %v8811_v63 = vld [vmem:[%s13024_s5 + $0x72c] ss:$16 sps:$4 sm:$0xff]  }
 0x4dc   : > { %5804 = vmatprep.subr.bf16.mxu1 %v8727_v55  ;;  %v8806_v55 = vld [vmem:[%s13024_s5 + $0x720] ss:$16 sps:$4 sm:$0xff]  }
 0x4de   : > { %5764 = vmatpush1.bf16.msra.mxu0 %v8722_v3  ;;  %v8809_v3 = vld [vmem:[%s13024_s5 + $0x728] ss:$16 sps:$4 sm:$0xff]  }
 0x4df   : > { %5805 = vmatpush1.bf16.msra.mxu1 %v8725_v29  ;;  %5765 = vmatprep.subr.bf16.mxu0 %v8730_v34  ;;  %v8814_v29 = vld [vmem:[%s13024_s5 + $0x744] ss:$16 sps:$4 sm:$0xff]   ;;  %v8817_v34 = vld [vmem:[%s13024_s5 + $0x74c] ss:$16 sps:$4 sm:$0xff]  }
 0x4e0   : > { %5806 = vmatprep.subr.bf16.mxu1 %v8733_v48  ;;  %v8812_v48 = vld [vmem:[%s13024_s5 + $0x740] ss:$16 sps:$4 sm:$0xff]  }
 0x4e2   : > { %5766 = vmatpush1.bf16.msra.mxu0 %v8728_v7  ;;  %v8815_v7 = vld [vmem:[%s13024_s5 + $0x748] ss:$16 sps:$4 sm:$0xff]  }
 0x4e3   : > { %5807 = vmatpush1.bf16.msra.mxu1 %v8731_v27  ;;  %5767 = vmatprep.subr.bf16.mxu0 %v8736_v33  ;;  %v8820_v27 = vld [vmem:[%s13024_s5 + $0x764] ss:$16 sps:$4 sm:$0xff]   ;;  %v8823_v33 = vld [vmem:[%s13024_s5 + $0x76c] ss:$16 sps:$4 sm:$0xff]  }
 0x4e4   : > { %5808 = vmatprep.subr.bf16.mxu1 %v8739_v31  ;;  %v8818_v31 = vld [vmem:[%s13024_s5 + $0x760] ss:$16 sps:$4 sm:$0xff]  }
 0x4e6   : > { %5768 = vmatpush1.bf16.msra.mxu0 %v8734_v24  ;;  %v8821_v24 = vld [vmem:[%s13024_s5 + $0x768] ss:$16 sps:$4 sm:$0xff]  }
 0x4e7   : > { %5809 = vmatpush1.bf16.msra.mxu1 %v8737_v50  ;;  %5769 = vmatprep.subr.bf16.mxu0 %v8742_v51  ;;  %v8826_v50 = vld [vmem:[%s13024_s5 + $0x784] ss:$16 sps:$4 sm:$0xff]   ;;  %v8829_v51 = vld [vmem:[%s13024_s5 + $0x78c] ss:$16 sps:$4 sm:$0xff]  }
 0x4e8   : > { %5810 = vmatprep.subr.bf16.mxu1 %v8745_v52  ;;  %v8824_v52 = vld [vmem:[%s13024_s5 + $0x780] ss:$16 sps:$4 sm:$0xff]  }
 0x4ea   : > { %5770 = vmatpush1.bf16.msra.mxu0 %v8740_v58  ;;  %v8827_v58 = vld [vmem:[%s13024_s5 + $0x788] ss:$16 sps:$4 sm:$0xff]  }
 0x4eb   : > { %5811 = vmatpush1.bf16.msra.mxu1 %v8743_v1  ;;  %5771 = vmatprep.subr.bf16.mxu0 %v8748_v47  ;;  %v8832_v1 = vld [vmem:[%s13024_s5 + $0x7a4] ss:$16 sps:$4 sm:$0xff]   ;;  %v8835_v47 = vld [vmem:[%s13024_s5 + $0x7ac] ss:$16 sps:$4 sm:$0xff]  }
 0x4ec   : > { %5812 = vmatprep.subr.bf16.mxu1 %v8751_v0  ;;  %v8830_v0 = vld [vmem:[%s13024_s5 + $0x7a0] ss:$16 sps:$4 sm:$0xff]  }
 0x4ee   : > { %5772 = vmatpush1.bf16.msra.mxu0 %v8746_v62  ;;  %v8833_v62 = vld [vmem:[%s13024_s5 + $0x7a8] ss:$16 sps:$4 sm:$0xff]  }
 0x4ef   : > { %5813 = vmatpush1.bf16.msra.mxu1 %v8749_v26  ;;  %6214 = vmatprep.subr.bf16.mxu0 %v8754_v41  ;;  %v8841_v26 = vld [vmem:[%s13024_s5 + $0x7cc] ss:$16 sps:$4 sm:$0xff]   ;;  %v8836_v41 = vld [vmem:[%s13024_s5 + $0x7c0] ss:$16 sps:$4 sm:$0xff]  }
 0x4f0   : > { %6255 = vmatprep.subr.bf16.mxu1 %v8757_v59  ;;  %v8839_v59 = vld [vmem:[%s13024_s5 + $0x7c8] ss:$16 sps:$4 sm:$0xff]  }
 0x4f1   : > { %5774 = vmatmul.mubr.bf16.vlgmr.msra.gmra.mrb[72].mxu0 %v5354_v38 }
 0x4f2   : > { %5815 = vmatmul.mubr.bf16.vlgmr.msra.gmra.mrb[72].mxu1 %v5354_v38  ;;  %6215 = vmatpush1.bf16.msra.mxu0 %v8752_v44  ;;  %v8847_v44 = vld [vmem:[%s13024_s5 + $0x7ec] ss:$16 sps:$4 sm:$0xff]   ;;  %v8842_v38 = vld [vmem:[%s13024_s5 + $0x7e0] ss:$16 sps:$4 sm:$0xff]  }
 0x4f3   : > { %6246 = vmatprep.mubr.bf16.mxu0 %v5828_v30  ;;  %6256 = vmatpush1.bf16.msra.mxu1 %v8755_v39  ;;  %v4415_v39 = vmax.f32 %v12299_v60, 0.0 }
 0x4f4   : > { %6287 = vmatprep.mubr.bf16.mxu1 %v5828_v30  ;;  %6216 = vmatprep.subr.bf16.mxu0 %v8760_v35  ;;  %v8845_v35 = vld [vmem:[%s13024_s5 + $0x7e8] ss:$16 sps:$4 sm:$0xff]  }
 0x4f5   : > { %6257 = vmatprep.subr.bf16.mxu1 %v8763_v57  ;;  %v5827_v30 = vpack.c.bf16 %v4415_v39, %v4415_v39 }
 0x4f6   : > { %6217 = vmatpush1.bf16.msra.mxu0 %v8758_v61 }
 0x4f7   : > { %6258 = vmatpush1.bf16.msra.mxu1 %v8761_v56  ;;  %6218 = vmatprep.subr.bf16.mxu0 %v8766_v8 }
 0x4f8   : > { %6259 = vmatprep.subr.bf16.mxu1 %v8769_v37 }
 0x4fa   : > { %6219 = vmatpush1.bf16.msra.mxu0 %v8764_v53 }
 0x4fb   : > { %6260 = vmatpush1.bf16.msra.mxu1 %v8767_v25  ;;  %6220 = vmatprep.subr.bf16.mxu0 %v8772_v11  ;;  %v8848_v11 = vld [vmem:[%s13026_s7 + $0x40] sm:$0xff]  }
 0x4fc   : > { %6261 = vmatprep.subr.bf16.mxu1 %v8775_v14  ;;  %v8849_v14 = vld [vmem:[%s13026_s7 + $0xc0] sm:$0xff]  }
 0x4fe   : > { %6221 = vmatpush1.bf16.msra.mxu0 %v8770_v21  ;;  %v8850_v21 = vld [vmem:[%s13026_s7] sm:$0xff]  }
 0x4ff   : > { %6262 = vmatpush1.bf16.msra.mxu1 %v8773_v22  ;;  %6222 = vmatprep.subr.bf16.mxu0 %v8778_v4  ;;  %v8851_v22 = vld [vmem:[%s13026_s7 + $0x80] sm:$0xff]   ;;  %v8852_v4 = vld [vmem:[%s13026_s7 + $0x48] sm:$0xff]  }
 0x500   : > { %6263 = vmatprep.subr.bf16.mxu1 %v8781_v19  ;;  %v8853_v19 = vld [vmem:[%s13026_s7 + $0xc8] sm:$0xff]  }
 0x502   : > { %6223 = vmatpush1.bf16.msra.mxu0 %v8776_v6  ;;  %v8854_v6 = vld [vmem:[%s13026_s7 + $0x8] sm:$0xff]  }
 0x503   : > { %6264 = vmatpush1.bf16.msra.mxu1 %v8779_v5  ;;  %6224 = vmatprep.subr.bf16.mxu0 %v8784_v10  ;;  %v8855_v5 = vld [vmem:[%s13026_s7 + $0x88] sm:$0xff]   ;;  %v8856_v10 = vld [vmem:[%s13026_s7 + $0x50] sm:$0xff]  }
 0x504   : > { %6265 = vmatprep.subr.bf16.mxu1 %v8787_v28  ;;  %v8857_v28 = vld [vmem:[%s13026_s7 + $0xd0] sm:$0xff]  }
 0x506   : > { %6225 = vmatpush1.bf16.msra.mxu0 %v8782_v32  ;;  %v8858_v32 = vld [vmem:[%s13026_s7 + $0x10] sm:$0xff]  }
 0x507   : > { %6266 = vmatpush1.bf16.msra.mxu1 %v8785_v15  ;;  %6226 = vmatprep.subr.bf16.mxu0 %v8790_v20  ;;  %v8859_v15 = vld [vmem:[%s13026_s7 + $0x90] sm:$0xff]   ;;  %v8860_v20 = vld [vmem:[%s13026_s7 + $0x58] sm:$0xff]  }
 0x508   : > { %6267 = vmatprep.subr.bf16.mxu1 %v8793_v9  ;;  %v8861_v9 = vld [vmem:[%s13026_s7 + $0xd8] sm:$0xff]  }
 0x50a   : > { %6227 = vmatpush1.bf16.msra.mxu0 %v8788_v42  ;;  %v8862_v42 = vld [vmem:[%s13026_s7 + $0x18] sm:$0xff]  }
 0x50b   : > { %6268 = vmatpush1.bf16.msra.mxu1 %v8791_v45  ;;  %6228 = vmatprep.subr.bf16.mxu0 %v8796_v23  ;;  %v8863_v45 = vld [vmem:[%s13026_s7 + $0x98] sm:$0xff]   ;;  %v8864_v23 = vld [vmem:[%s13026_s7 + $0x60] sm:$0xff]  }
 0x50c   : > { %6269 = vmatprep.subr.bf16.mxu1 %v8799_v2  ;;  %v8865_v2 = vld [vmem:[%s13026_s7 + $0xe0] sm:$0xff]  }
 0x50e   : > { %6229 = vmatpush1.bf16.msra.mxu0 %v8794_v12  ;;  %v8866_v12 = vld [vmem:[%s13026_s7 + $0x20] sm:$0xff]  }
 0x50f   : > { %6270 = vmatpush1.bf16.msra.mxu1 %v8797_v54  ;;  %6230 = vmatprep.subr.bf16.mxu0 %v8802_v18  ;;  %v8867_v54 = vld [vmem:[%s13026_s7 + $0xa0] sm:$0xff]   ;;  %v8868_v18 = vld [vmem:[%s13026_s7 + $0x68] sm:$0xff]  }
 0x510   : > { %6271 = vmatprep.subr.bf16.mxu1 %v8805_v46  ;;  %v8869_v46 = vld [vmem:[%s13026_s7 + $0xe8] sm:$0xff]  }
 0x512   : > { %6231 = vmatpush1.bf16.msra.mxu0 %v8800_v16 }
 0x513   : > { %6272 = vmatpush1.bf16.msra.mxu1 %v8803_v17  ;;  %6232 = vmatprep.subr.bf16.mxu0 %v8808_v49  ;;  %v8870_v49 = vld [vmem:[%s13026_s7 + $0x28] sm:$0xff]  }
 0x514   : > { %6273 = vmatprep.subr.bf16.mxu1 %v8811_v63  ;;  %v8871_v63 = vld [vmem:[%s13026_s7 + $0xa8] sm:$0xff]  }
 0x516   : > { %6233 = vmatpush1.bf16.msra.mxu0 %v8806_v55 }
 0x517   : > { %6274 = vmatpush1.bf16.msra.mxu1 %v8809_v3  ;;  %6234 = vmatprep.subr.bf16.mxu0 %v8814_v29 }
 0x518   : > { %6275 = vmatprep.subr.bf16.mxu1 %v8817_v34 }
 0x51a   : > { %6235 = vmatpush1.bf16.msra.mxu0 %v8812_v48 }
 0x51b   : > { %6276 = vmatpush1.bf16.msra.mxu1 %v8815_v7  ;;  %6236 = vmatprep.subr.bf16.mxu0 %v8820_v27 }
 0x51c   : > { %6277 = vmatprep.subr.bf16.mxu1 %v8823_v33 }
 0x51e   : > { %6237 = vmatpush1.bf16.msra.mxu0 %v8818_v31 }
 0x51f   : > { %6278 = vmatpush1.bf16.msra.mxu1 %v8821_v24  ;;  %6238 = vmatprep.subr.bf16.mxu0 %v8826_v50  ;;  %v8872_v50 = vld [vmem:[%s13026_s7 + $0x70] sm:$0xff]  }
 0x520   : > { %6279 = vmatprep.subr.bf16.mxu1 %v8829_v51  ;;  %v8873_v51 = vld [vmem:[%s13026_s7 + $0xf0] sm:$0xff]  }
 0x522   : > { %6239 = vmatpush1.bf16.msra.mxu0 %v8824_v52  ;;  %v8874_v52 = vld [vmem:[%s13026_s7 + $0x30] sm:$0xff]  }
 0x523   : > { %6280 = vmatpush1.bf16.msra.mxu1 %v8827_v58  ;;  %6240 = vmatprep.subr.bf16.mxu0 %v8832_v1  ;;  %v8875_v58 = vld [vmem:[%s13026_s7 + $0xb0] sm:$0xff]   ;;  %v8876_v1 = vld [vmem:[%s13026_s7 + $0x78] sm:$0xff]  }
 0x524   : > { %6281 = vmatprep.subr.bf16.mxu1 %v8835_v47  ;;  %v8877_v47 = vld [vmem:[%s13026_s7 + $0xf8] sm:$0xff]  }
 0x526   : > { %6241 = vmatpush1.bf16.msra.mxu0 %v8830_v0  ;;  %v8878_v0 = vld [vmem:[%s13026_s7 + $0x38] sm:$0xff]  }
 0x527   : > { %6282 = vmatpush1.bf16.msra.mxu1 %v8833_v62  ;;  %6242 = vmatprep.subr.bf16.mxu0 %v8838_v13  ;;  %v8879_v62 = vld [vmem:[%s13026_s7 + $0xb8] sm:$0xff]  }
 0x528   : > { %6283 = vmatprep.subr.bf16.mxu1 %v8841_v26 }
 0x52a   : > { %6243 = vmatpush1.bf16.msra.mxu0 %v8836_v41 }
 0x52b   : > { %6284 = vmatpush1.bf16.msra.mxu1 %v8839_v59  ;;  %6244 = vmatprep.subr.bf16.mxu0 %v8844_v40 }
 0x52c   : > { %6285 = vmatprep.subr.bf16.mxu1 %v8847_v44 }
 0x52e   : > { %6245 = vmatpush1.bf16.msra.mxu0 %v8842_v38 }
 0x52f   : > { %6286 = vmatpush1.bf16.msra.mxu1 %v8845_v35  ;;  %7682 = vmatprep.subr.bf16.mxu0 %v8848_v11 }
 0x530   : > { %7704 = vmatprep.subr.bf16.mxu1 %v8849_v14 }
 0x531   : > { %6247 = vmatmul.mubr.bf16.vlgmr.msra.gmra.mrb[76].mxu0 %v5827_v30 }
 0x532   : > { %6288 = vmatmul.mubr.bf16.vlgmr.msra.gmra.mrb[76].mxu1 %v5827_v30  ;;  %7683 = vmatpush3.bf16.msra.mxu0 %v8850_v21 }
 0x533   : > { %7705 = vmatpush3.bf16.msra.mxu1 %v8851_v22  ;;  %7684 = vmatprep.subr.bf16.mxu0 %v8852_v4 }
 0x534   : > { %7706 = vmatprep.subr.bf16.mxu1 %v8853_v19 }
 0x536   : > { %7685 = vmatpush3.bf16.msra.mxu0 %v8854_v6 }
 0x537   : > { %7707 = vmatpush3.bf16.msra.mxu1 %v8855_v5  ;;  %7686 = vmatprep.subr.bf16.mxu0 %v8856_v10 }
 0x538   : > { %7708 = vmatprep.subr.bf16.mxu1 %v8857_v28 }
 0x53a   : > { %7687 = vmatpush3.bf16.msra.mxu0 %v8858_v32 }
 0x53b   : > { %7709 = vmatpush3.bf16.msra.mxu1 %v8859_v15  ;;  %7688 = vmatprep.subr.bf16.mxu0 %v8860_v20 }
 0x53c   : > { %7710 = vmatprep.subr.bf16.mxu1 %v8861_v9 }
 0x53e   : > { %7689 = vmatpush3.bf16.msra.mxu0 %v8862_v42 }
 0x53f   : > { %7711 = vmatpush3.bf16.msra.mxu1 %v8863_v45  ;;  %7690 = vmatprep.subr.bf16.mxu0 %v8864_v23 }
 0x540   : > { %7712 = vmatprep.subr.bf16.mxu1 %v8865_v2 }
 0x542   : > { %7691 = vmatpush3.bf16.msra.mxu0 %v8866_v12 }
 0x543   : > { %7713 = vmatpush3.bf16.msra.mxu1 %v8867_v54  ;;  %7692 = vmatprep.subr.bf16.mxu0 %v8868_v18 }
 0x544   : > { %v4904_v57 = vpop.f32.mrb[64].mxu0  ;;  %v4945_v61 = vpop.f32.mrb[64].mxu1  ;;  %7714 = vmatprep.subr.bf16.mxu1 %v8869_v46 }
 0x545   : > { %v4906_v56 = vpop.f32.mrb[65].mxu0  ;;  %v4947_v8 = vpop.f32.mrb[65].mxu1 }
 0x546   : > { %v4908_v37 = vpop.f32.mrb[66].mxu0  ;;  %v4949_v53 = vpop.f32.mrb[66].mxu1  ;;  %7693 = vmatpush3.bf16.msra.mxu0 %v8870_v49 }
 0x547   : > { %v4909_v25 = vpop.f32.mrb[67].mxu0  ;;  %v4950_v60 = vpop.f32.mrb[67].mxu1  ;;  %7715 = vmatpush3.bf16.msra.mxu1 %v8871_v63  ;;  %7694 = vmatprep.subr.bf16.mxu0 %v8872_v50 }
 0x548   : > { %7716 = vmatprep.subr.bf16.mxu1 %v8873_v51 }
 0x54a   : > { %7695 = vmatpush3.bf16.msra.mxu0 %v8874_v52 }
 0x54b   : > { %7717 = vmatpush3.bf16.msra.mxu1 %v8875_v58  ;;  %7696 = vmatprep.subr.bf16.mxu0 %v8876_v1 }
 0x54c   : > { %7718 = vmatprep.subr.bf16.mxu1 %v8877_v47 }
 0x54e   : > { %7697 = vmatpush3.bf16.msra.mxu0 %v8878_v0 }
 0x54f   : > { %7719 = vmatpush3.bf16.msra.mxu1 %v8879_v62 }
 0x584   : > { %v5306_v16 = vpop.f32.mrb[68].mxu0  ;;  %v5347_v17 = vpop.f32.mrb[68].mxu1 }
 0x585   : > { %v5307_v55 = vadd.f32 %v5306_v16, %v4904_v57  ;;  %v5348_v3 = vadd.f32 %v5347_v17, %v4945_v61  ;;  %v5308_v29 = vpop.f32.mrb[69].mxu0  ;;  %v5349_v34 = vpop.f32.mrb[69].mxu1 }
 0x586   : > { %v5309_v48 = vadd.f32 %v5308_v29, %v4906_v56  ;;  %v5350_v7 = vadd.f32 %v5349_v34, %v4947_v8  ;;  %v5310_v27 = vpop.f32.mrb[70].mxu0  ;;  %v5351_v33 = vpop.f32.mrb[70].mxu1  ;;  %v6300_v56 = vld [vmem:[%s13025_s6] sm:$0xf]  ;;  %v13365_v8 = vld [vmem:[#allocation5_spill] sm:$0xff] }
 0x587   : > { %v5311_v31 = vpop.f32.mrb[71].mxu0  ;;  %v5352_v24 = vpop.f32.mrb[71].mxu1  ;;  %v6312_v37 = vsub.s32 2, %v13365_v8  ;;  %v6316_v53 = vsub.s32 3, %v13365_v8  ;;  %v6305_v25 = vrot.slane %v6300_v56, %v13363_v43  ;;  %v6309_v14 = vrot.slane %v6300_v56, %v13364_v36 }
 0x589   : > { %v6313_v11 = vrot.slane %v6300_v56, %v6312_v37  ;;  %v6317_v19 = vrot.slane %v6300_v56, %v6316_v53 }
 0x5c4   : > { %v5775_v13 = vpop.f32.mrb[72].mxu0 }
 0x5c5   : > { %v5823_v26 = vadd.f32 %v5775_v13, %v5307_v55  ;;  %v5816_v41 = vpop.f32.mrb[72].mxu1  ;;  %v5777_v59 = vpop.f32.mrb[73].mxu0  ;;  %v7645_v55 = vld [vmem:[%s13027_s8] ss:$0 sm:$0xff] }
 0x5c6   : > { %v5825_v40 = vadd.f32 %v5816_v41, %v5348_v3  ;;  %v5824_v44 = vadd.f32 %v5777_v59, %v5309_v48  ;;  %v5818_v38 = vpop.f32.mrb[73].mxu1  ;;  %v5779_v39 = vpop.f32.mrb[74].mxu0 }
 0x5c7   : > { %v5826_v35 = vadd.f32 %v5818_v38, %v5350_v7  ;;  %v5820_v30 = vpop.f32.mrb[74].mxu1  ;;  %v5780_v57 = vpop.f32.mrb[75].mxu0 }
 0x5c8   : > { %v5821_v61 = vpop.f32.mrb[75].mxu1 }
 0x604   : > { %v6248_v60 = vpop.f32.mrb[76].mxu0 }
 0x605   : > { %v6296_v21 = vadd.f32 %v6248_v60, %v5823_v26  ;;  %v6289_v22 = vpop.f32.mrb[76].mxu1  ;;  %v6250_v4 = vpop.f32.mrb[77].mxu0 }
 0x606   : > { %v6298_v6 = vadd.f32 %v6289_v22, %v5825_v40  ;;  %v6297_v5 = vadd.f32 %v6250_v4, %v5824_v44  ;;  %v6291_v10 = vpop.f32.mrb[77].mxu1  ;;  %v6252_v28 = vpop.f32.mrb[78].mxu0 }
 0x607   : > { %v6322_v32 = vadd.f32 %v6305_v25, %v6296_v21  ;;  %v6299_v15 = vadd.f32 %v6291_v10, %v5826_v35  ;;  %v6293_v20 = vpop.f32.mrb[78].mxu1  ;;  %v6253_v9 = vpop.f32.mrb[79].mxu0 }
 0x608   : > { %v6324_v42 = vadd.f32 %v6313_v11, %v6298_v6  ;;  %v6323_v45 = vadd.f32 %v6309_v14, %v6297_v5  ;;  %v6294_v23 = vpop.f32.mrb[79].mxu1 }
 0x609   : > { %v6326_v43 = vmax.f32 %v6322_v32, 0.0  ;;  %v6325_v2 = vadd.f32 %v6317_v19, %v6299_v15 }
 0x60a   : > { %v6328_v12 = vmax.f32 %v6324_v42, 0.0  ;;  %v6327_v54 = vmax.f32 %v6323_v45, 0.0 }
 0x60b   : > { %v6329_v36 = vmax.f32 %v6325_v2, 0.0  ;;  %v6330_v46 = vpack.c.bf16 %v6326_v43, %v6326_v43 }
 0x60c   : > { %v6331_v18 = vpack.c.bf16 %v6327_v54, %v6327_v54  ;;  %v6332_v17 = vpack.c.bf16 %v6328_v12, %v6328_v12 }
 0x60d   : > { %v6333_v16 = vpack.c.bf16 %v6329_v36, %v6329_v36 }
 0x60e   : > { %6629 = vmatprep.mubr.bf16.mxu0 %v6331_v18 }
 0x60f   : > { %6669 = vmatprep.mubr.bf16.mxu1 %v6333_v16  ;;  %6630 = vmatmul.mubr.bf16.vlgmr.msra.gmra.mrb[80].mxu0 %v6330_v46 }
 0x610   : > { %6670 = vmatmul.mubr.bf16.vlgmr.msra.gmra.mrb[80].mxu1 %v6332_v17 }
 0x6e2   : > { %v7698_v49 = vpop.f32.mrb[80].mxu0 }
 0x6e3   : > { %v7720_v63 = vpop.f32.mrb[80].mxu1  ;;  %v7699_v3 = vpop.f32.mrb[81].mxu0 }
 0x6e4   : > { %v7700_v29 = vadd.f32 %v7699_v3, %v7698_v49  ;;  %v7721_v34 = vpop.f32.mrb[81].mxu1  ;;  %v7701_v48 = vpop.f32.mrb[82].mxu0 }
 0x6e5   : > { %v7722_v7 = vadd.f32 %v7721_v34, %v7720_v63  ;;  %v7723_v27 = vpop.f32.mrb[82].mxu1  ;;  %v7702_v33 = vpop.f32.mrb[83].mxu0 }
 0x6e6   : > { %v6632_v31 = vadd.f32 %v7700_v29, %v7645_v55  ;;  %v7724_v24 = vpop.f32.mrb[83].mxu1 }
 0x6e8   : > { %v6672_v50 = vadd.f32 %v7722_v7, %v6632_v31 }
 0x6ea   : > { %6677 = vmax.xlane.f32.xlu0 %v6672_v50 }
 0x777   : > { %v6678_v51 = vpop.xlane.xlu0 %6677 }
 0x778   : > { %v6679_v52 = vsub.f32 %v6672_v50, %v6678_v51 }
 0x77a   : > { %v6680_v58 = vmul.f32 1.442695, %v6679_v52 }
 0x77c   : > { %8880 = vpow2.f32 %v6680_v58 }
 0x786   : > { %v8881_v1 = vpop.eup %8880 }
 0x787   : > { %6682 = vadd.xlane.f32.xlu0 %v8881_v1 }
 0x814   : > { %v6683_v47 = vpop.xlane.xlu0 %6682 }
 0x815   : > { %8882 = vlog2.f32 %v6683_v47 }
 0x81f   : > { %v8883_v0 = vpop.eup %8882 }
 0x820   : > { %v6685_v62 = vmul.f32 0.6931472, %v8883_v0 }
 0x822   : > { %v6686_v13 = vsub.f32 %v6679_v52, %v6685_v62 }
 0x824   : > { %6687 = vst [vmem:[%s325_s16] sm:$0xff] %v6686_v13 }
 0x825   : > { %9069 = shalt.err (!%p9066_p3)
}
 0x826   : > { %s9070_s29 = scalar_lea.hbm %s12977_s24, 128  ;;  %s9074_s16 = scalar_lea.hbm %s13028_s9, 256 }
 0x827   : > { %p9071_p4 = scmp.ne.s32.totalorder %s12977_s24, %s9070_s29  ;;  %p9075_p9 = scmp.lt.u32.totalorder %s12977_s24, %s13028_s9 }
 0x828   : > { %p9076_p10 = scmp.lt.u32.totalorder %s9074_s16, %s9070_s29  ;;  %p9078_p12 = scmp.lt.u32.totalorder %s9070_s29, %s12977_s24 }
 0x829   : > { %p9072_p7 = pnand %p9071_p4, %p9209_p5 }
 0x82a   : > { %p9077_p11 = por %p9076_p10, %p9075_p9 }
 0x82b   : > { %p9073_p8 = pneg %p9072_p7 }
 0x82c   : > { %p9079_p13 = por %p9078_p12, %p9077_p11 }
 0x82e   : > { %p9080_p0 = pnand %p9079_p13, %p9073_p8 }
 0x830   : > { %9083 = shalt.err (!%p9080_p0)
}
 0x831   : > { %7855 = dma.vmem_to_hbm [thread:$0]  (%p9209_p5), %s12979_s17, 128, %s12977_s24, %s6689_s25  }
 0x832 PF: > { %p7861_p1 = scmp.ge.s32.totalorder %s9118_s12, 2  ;;  %s6714_s14 = sand.u32 1, %s9106_s30  }
 0x833   : > { %s6715_s13 = scalar_lea.sflag [#allocation3], %s6714_s14 }
 0x834   : > { %p7858_p2 = pnand %p7861_p1, %p9213_p6 }
 0x836   : > { %9101 = dma.done.wait (!%p7858_p2), %s6715_s13, 128  }
 0x837   : > { %9103 = vsyncadd (!%p7858_p2), %s6715_s13, 4294967168  ;;  %p19_p3 = scmp.ge.s32.totalorder %s9196_s15, 4   ;;  %s13366_s30 = smov %s9110_s10 }
 0x838   : > { %s13367_s10 = smov %s9114_s11  ;;  %s13368_s11 = smov %s9207_s18 }
 0x839   : > { %s13369_s12 = smov %s9196_s15  ;;  %21 = sbr.rel (!%p19_p3) target bundleno = 3 (0x3), region = 97 }
 0x840   :  { %6720 = vsyncpa [#allocation3], 1 }
 0x841   :  { %6722 = vsyncpa [#allocation3 + $0x1], 1 }

</bundles_post_ra>
